<compile_context>
chip_gen: v7x
topology: tpu7x:2x2x1
jax: 0.10.0
libtpu: 0.0.40
codegen_flags: <defaults>
</compile_context>

<pallas_src>
import functools

import numpy as np
import jax
import jax.numpy as jnp
from jax.experimental import pallas as pl
from jax.experimental.pallas import tpu as pltpu

NEIGHBOR_K = 3
KK = NEIGHBOR_K * NEIGHBOR_K  # 9


# --------------------------------------------------------------------------- kernel
def _fusion_kernel(xp_ref, m_ref, b_ref, sc_ref, sh_ref, out_ref, *,
                   n_group, c_per_group, wp, lspan, pairs_per_block):
    """Processes `pairs_per_block` frame pairs per grid step.

    xp_ref : (Pb, 2, C, Hp*Wp)  replication-padded even/odd frames, flat spatial lanes
    m_ref  : (2*G*KK, KK*C)     fused (group-sum + grouped 1x1 conv) weight; rows
                                ordered as (neighbour, even/odd, group)
    b_ref  : (2*G*KK, 1)        conv bias (same row order)
    sc_ref : (C, 1)             folded BN scale (original channel order)
    sh_ref : (C, 1)             folded BN shift (original channel order)
    out_ref: (Pb, C, Lspan)     fused output on the covering lane range
    """
    G, CPG = n_group, c_per_group
    C = G * CPG
    L = lspan

    m = m_ref[...]
    bias = b_ref[...]
    sc = sc_ref[...]
    sh = sh_ref[...]

    # flat lane offset of the 3x3 window (i, j) inside the padded spatial axis
    starts = [i * wp + j for i in range(NEIGHBOR_K) for j in range(NEIGHBOR_K)]
    center = wp + 1  # window (1, 1): equals the un-padded frame on all valid lanes

    for b in range(pairs_per_block):
        # even frame on the covering range (== un-padded even frame at valid lanes)
        e_c = xp_ref[b, 0, :, pl.ds(center, L)].astype(jnp.float32)          # (C, L)

        # ---- correlation products for the 9 neighbours, stacked along sublanes ----
        prods = []
        for s in starts:
            o_s = xp_ref[b, 1, :, pl.ds(s, L)].astype(jnp.float32)           # (C, L)
            prods.append(e_c * o_s)
        prod_all = jnp.concatenate(prods, axis=0)                            # (KK*C, L)

        # ---- fused per-group channel reduction + grouped 1x1 conv on the MXU ----
        z = jnp.dot(m, prod_all, preferred_element_type=jnp.float32) + bias  # (2*G*KK, L)

        # ---- temporal fusion: weighted sum of shifted even/odd frames ----
        acc = jnp.zeros((C, L), jnp.float32)
        for idx, s in enumerate(starts):
            e_s = xp_ref[b, 0, :, pl.ds(s, L)].astype(jnp.float32)
            o_s = xp_ref[b, 1, :, pl.ds(s, L)].astype(jnp.float32)
            ze = z[idx * 2 * G:idx * 2 * G + G, :]          # (G, L) even weights
            zo = z[idx * 2 * G + G:(idx + 1) * 2 * G, :]    # (G, L) odd weights
            # per-channel weight rows: channel c uses fusion group c % G
            we = jnp.concatenate([ze] * CPG, axis=0)        # (C, L)
            wo = jnp.concatenate([zo] * CPG, axis=0)        # (C, L)
            acc = acc + e_s * we + o_s * wo

        # ---- BatchNorm2d (inference) folded into scale/shift ----
        out_ref[b] = (acc * sc + sh).astype(out_ref.dtype)


# --------------------------------------------------------------------------- helpers
def _pick_pairs_per_block(n_pairs, per_pair_bytes, budget=4 << 20):
    """Largest divisor of n_pairs that fits the VMEM budget, preferring >=2 grid steps."""
    divisors = [d for d in range(1, n_pairs + 1)
                if n_pairs % d == 0 and d * per_pair_bytes <= budget]
    if not divisors:
        return 1
    multi_step = [d for d in divisors if n_pairs // d >= 2]
    return max(multi_step) if multi_step else max(divisors)


# --------------------------------------------------------------------------- wrapper
def temporal_fusion_forward(x, conv_w, conv_b, bn_gamma, bn_beta, bn_mean, bn_var,
                            *, n_segment, n_group, fuse_ave=False, eps=1e-5):
    nt, c, h, w = x.shape
    assert nt % n_segment == 0 and nt % 2 == 0 and c % n_group == 0
    cpg = c // n_group
    P = nt // 2
    pad = NEIGHBOR_K // 2
    hp, wp = h + 2 * pad, w + 2 * pad
    hwp = hp * wp
    # contiguous flat-lane range covering every valid (y, x): index k = y*wp + x
    lspan = (h - 1) * wp + w
    oc = 2 * n_group * KK

    # ---- single data-prep pass: replication pad + flatten spatial onto the lane axis ----
    x_pad = jnp.pad(x, ((0, 0), (0, 0), (pad, pad), (pad, pad)), mode='edge')
    xp = x_pad.reshape(P, 2, c, hwp).astype(jnp.float32)         # (P, 2, C, Hp*Wp)

    # ---- trace-time constants -----------------------------------------------------
    # dense block-diagonal grouped 1x1 conv weight  Wd: (oc, KK*G)
    conv_w_np = np.asarray(conv_w, np.float32)
    Wd = np.zeros((oc, KK * n_group), np.float32)
    for k in range(n_group):
        Wd[k * 2 * KK:(k + 1) * 2 * KK, k * KK:(k + 1) * KK] = \
            conv_w_np[k * 2 * KK:(k + 1) * 2 * KK]
    # S: correlation group-sum indicator (KK*G, KK*C); corr group of channel ch is ch // cpg
    S = np.zeros((KK * n_group, KK * c), np.float32)
    for idx in range(KK):
        for ch in range(c):
            S[idx * n_group + ch // cpg, idx * c + ch] = 1.0
    M_np = Wd @ S                                                # (oc, KK*C)
    # reorder conv-output rows:  new row  o' = idx*2G + eo*G + g  <-  old row idx*2G + 2g + eo
    row_perm = np.array([(o // (2 * n_group)) * (2 * n_group)
                         + 2 * ((o % (2 * n_group)) % n_group)
                         + ((o % (2 * n_group)) // n_group)
                         for o in range(oc)])
    M = jnp.asarray(M_np[row_perm])
    bias = jnp.asarray(np.asarray(conv_b, np.float32)[row_perm].reshape(oc, 1))

    # fold BN (inference) + optional fuse_ave into scale / shift (original channel order)
    scale = bn_gamma / jnp.sqrt(bn_var + eps)
    shift = bn_beta - bn_mean * scale
    if fuse_ave:
        scale = scale * 0.5
    scale = scale.reshape(c, 1).astype(jnp.float32)
    shift = shift.reshape(c, 1).astype(jnp.float32)

    # ---- grid / block choice --------------------------------------------------------
    per_pair_bytes = (2 * c * hwp + c * lspan) * 4
    pb = _pick_pairs_per_block(P, per_pair_bytes)
    grid = (P // pb,)
    in_block = pb * 2 * c * hwp * 4
    out_block = pb * c * lspan * 4
    vmem_limit = int(min(64 << 20, max(32 << 20, 6 * (in_block + out_block))))

    kernel = functools.partial(_fusion_kernel, n_group=n_group, c_per_group=cpg,
                               wp=wp, lspan=lspan, pairs_per_block=pb)

    out_cover = pl.pallas_call(
        kernel,
        out_shape=jax.ShapeDtypeStruct((P, c, lspan), jnp.float32),
        grid=grid,
        in_specs=[
            pl.BlockSpec((pb, 2, c, hwp), lambda p: (p, 0, 0, 0)),
            pl.BlockSpec((oc, KK * c), lambda p: (0, 0)),
            pl.BlockSpec((oc, 1), lambda p: (0, 0)),
            pl.BlockSpec((c, 1), lambda p: (0, 0)),
            pl.BlockSpec((c, 1), lambda p: (0, 0)),
        ],
        out_specs=pl.BlockSpec((pb, c, lspan), lambda p: (p, 0, 0)),
        compiler_params=pltpu.CompilerParams(
            dimension_semantics=("parallel",),
            vmem_limit_bytes=vmem_limit),
    )(xp, M, bias, scale, shift)

    # ---- unpack the covering-range lanes back to (h, w) ------------------------------
    y = jnp.pad(out_cover, ((0, 0), (0, 0), (0, wp - w)))        # length -> h*wp
    y = y.reshape(P, c, h, wp)[:, :, :, :w]
    return y


# --------------------------------------------------------------------------- reference
def reference_forward(x, conv_w, conv_b, bn_gamma, bn_beta, bn_mean, bn_var,
                      *, n_segment, n_group, fuse_ave=False, eps=1e-5):
    """Pure-JAX transcription of the PyTorch forward (correlation + downsample + GroupConv)."""
    nt, c, h, w = x.shape
    cpg = c // n_group
    pad = NEIGHBOR_K // 2
    out_per_grp = 2 * KK
    hp = jax.lax.Precision.HIGHEST

    x_pad = jnp.pad(x, ((0, 0), (0, 0), (pad, pad), (pad, pad)), mode='edge')
    corr_list = []
    for i in range(NEIGHBOR_K):
        for j in range(NEIGHBOR_K):
            corr = x[::2] * x_pad[1::2, :, i:i + h, j:j + w]
            corr = corr.reshape(nt // 2, n_group, cpg, h, w).sum(axis=2)
            corr_list.append(corr)
    xc = jnp.transpose(jnp.stack(corr_list), (1, 0, 2, 3, 4)).reshape(nt // 2, KK * n_group, h, w)

    # grouped 1x1 conv
    outs = []
    for k in range(n_group):
        inp = xc[:, KK * k:KK * (k + 1)]
        wk = conv_w[out_per_grp * k:out_per_grp * (k + 1)]
        ok = jnp.einsum('oc,pchw->pohw', wk, inp, precision=hp) \
            + conv_b[out_per_grp * k:out_per_grp * (k + 1)][None, :, None, None]
        outs.append(ok)
    xc = jnp.concatenate(outs, axis=1)                              # (P, 2*G*KK, h, w)

    x_pad_r = jnp.transpose(x_pad.reshape(nt, cpg, n_group, h + 2 * pad, w + 2 * pad),
                            (1, 0, 2, 3, 4))
    xc = xc.reshape(nt // 2, NEIGHBOR_K, NEIGHBOR_K, n_group * 2, h, w)
    x_list = []
    for i in range(NEIGHBOR_K):
        for j in range(NEIGHBOR_K):
            x_list.append(x_pad_r[:, ::2, :, i:i + h, j:j + w] * xc[:, i, j, ::2]
                          + x_pad_r[:, 1::2, :, i:i + h, j:j + w] * xc[:, i, j, 1::2])
    y = jnp.transpose(jnp.stack(x_list).sum(axis=0), (1, 0, 2, 3, 4)).reshape(nt // 2, c, h, w)
    if fuse_ave:
        y = y / 2
    scale = bn_gamma / jnp.sqrt(bn_var + eps)
    shift = bn_beta - bn_mean * scale
    return y * scale[None, :, None, None] + shift[None, :, None, None]


# --------------------------------------------------------------------------- main
if __name__ == "__main__":
    n_segment = 4
    n_batch = 2
    c = 8
    h = w = 16
    n_group = 2
    nt = n_batch * n_segment
    inter = 2 * n_group * KK  # 36

    key = jax.random.PRNGKey(0)
    k1, k2, k3, k4, k5, k6, k7 = jax.random.split(key, 7)
    x = jax.random.normal(k1, (nt, c, h, w), jnp.float32)
    conv_w = 0.1 * jax.random.normal(k2, (inter, KK), jnp.float32)    # Conv2d(9g->18g, groups=g, k=1)
    conv_b = 0.1 * jax.random.normal(k3, (inter,), jnp.float32)
    bn_gamma = 1.0 + 0.1 * jax.random.normal(k4, (c,), jnp.float32)
    bn_beta = 0.1 * jax.random.normal(k5, (c,), jnp.float32)
    bn_mean = 0.1 * jax.random.normal(k6, (c,), jnp.float32)
    bn_var = 1.0 + 0.1 * jnp.abs(jax.random.normal(k7, (c,), jnp.float32))

    out = temporal_fusion_forward(
        x, conv_w, conv_b, bn_gamma, bn_beta, bn_mean, bn_var,
        n_segment=n_segment, n_group=n_group, fuse_ave=False)
    out = jax.block_until_ready(out)
    assert out.shape == (nt // 2, c, h, w)

    ref = reference_forward(
        x, conv_w, conv_b, bn_gamma, bn_beta, bn_mean, bn_var,
        n_segment=n_segment, n_group=n_group, fuse_ave=False)
    ref = jax.block_until_ready(ref)
    np.testing.assert_allclose(np.asarray(out), np.asarray(ref), rtol=1e-2, atol=1e-2)

    print("KERNEL_OK")
</pallas_src>

<mosaic_0001>
module attributes {stable_mosaic.version = 11 : i64} {
  func.func @_fusion_kernel(%arg0: i32, %arg1: memref<2x2x8x324xf32, #tpu.memory_space<vmem>>, %arg2: memref<36x72xf32, #tpu.memory_space<vmem>>, %arg3: memref<36x1xf32, #tpu.memory_space<vmem>>, %arg4: memref<8x1xf32, #tpu.memory_space<vmem>>, %arg5: memref<8x1xf32, #tpu.memory_space<vmem>>, %arg6: memref<2x8x286xf32, #tpu.memory_space<vmem>>) attributes {dimension_semantics = [#tpu.dimension_semantics<parallel>], iteration_bounds = array<i64: 2>, scalar_prefetch = 0 : i64, scratch_operands = 0 : i64, tpu.core_type = #tpu.core_type<tc>, window_params = [{transform_indices = @transform_0, window_bounds = array<i64: 2, 2, 8, 324>}, {pipeline_mode = #tpu.pipeline_mode<synchronous>, transform_indices = @transform_1, window_bounds = array<i64: 36, 72>}, {pipeline_mode = #tpu.pipeline_mode<synchronous>, transform_indices = @transform_2, window_bounds = array<i64: 36, 1>}, {pipeline_mode = #tpu.pipeline_mode<synchronous>, transform_indices = @transform_3, window_bounds = array<i64: 8, 1>}, {pipeline_mode = #tpu.pipeline_mode<synchronous>, transform_indices = @transform_4, window_bounds = array<i64: 8, 1>}, {transform_indices = @transform_5, window_bounds = array<i64: 2, 8, 286>}]} {
    %c0 = arith.constant 0 : index
    %c0_0 = arith.constant 0 : index
    %0 = vector.load %arg2[%c0, %c0_0] : memref<36x72xf32, #tpu.memory_space<vmem>>, vector<36x72xf32>
    %c0_1 = arith.constant 0 : index
    %c0_2 = arith.constant 0 : index
    %1 = vector.load %arg3[%c0_1, %c0_2] : memref<36x1xf32, #tpu.memory_space<vmem>>, vector<36x1xf32>
    %c0_3 = arith.constant 0 : index
    %c0_4 = arith.constant 0 : index
    %2 = vector.load %arg4[%c0_3, %c0_4] : memref<8x1xf32, #tpu.memory_space<vmem>>, vector<8x1xf32>
    %c0_5 = arith.constant 0 : index
    %c0_6 = arith.constant 0 : index
    %3 = vector.load %arg5[%c0_5, %c0_6] : memref<8x1xf32, #tpu.memory_space<vmem>>, vector<8x1xf32>
    %c0_7 = arith.constant 0 : index
    %c0_8 = arith.constant 0 : index
    %c0_9 = arith.constant 0 : index
    %c19 = arith.constant 19 : index
    %4 = vector.load %arg1[%c0_7, %c0_8, %c0_9, %c19] : memref<2x2x8x324xf32, #tpu.memory_space<vmem>>, vector<1x1x8x286xf32>
    %5 = vector.shape_cast %4 : vector<1x1x8x286xf32> to vector<8x286xf32>
    %c0_10 = arith.constant 0 : index
    %c1 = arith.constant 1 : index
    %c0_11 = arith.constant 0 : index
    %c0_12 = arith.constant 0 : index
    %6 = vector.load %arg1[%c0_10, %c1, %c0_11, %c0_12] : memref<2x2x8x324xf32, #tpu.memory_space<vmem>>, vector<1x1x8x286xf32>
    %7 = vector.shape_cast %6 : vector<1x1x8x286xf32> to vector<8x286xf32>
    %8 = arith.mulf %5, %7 : vector<8x286xf32>
    %c0_13 = arith.constant 0 : index
    %c1_14 = arith.constant 1 : index
    %c0_15 = arith.constant 0 : index
    %c1_16 = arith.constant 1 : index
    %9 = vector.load %arg1[%c0_13, %c1_14, %c0_15, %c1_16] : memref<2x2x8x324xf32, #tpu.memory_space<vmem>>, vector<1x1x8x286xf32>
    %10 = vector.shape_cast %9 : vector<1x1x8x286xf32> to vector<8x286xf32>
    %11 = arith.mulf %5, %10 : vector<8x286xf32>
    %c0_17 = arith.constant 0 : index
    %c1_18 = arith.constant 1 : index
    %c0_19 = arith.constant 0 : index
    %c2 = arith.constant 2 : index
    %12 = vector.load %arg1[%c0_17, %c1_18, %c0_19, %c2] : memref<2x2x8x324xf32, #tpu.memory_space<vmem>>, vector<1x1x8x286xf32>
    %13 = vector.shape_cast %12 : vector<1x1x8x286xf32> to vector<8x286xf32>
    %14 = arith.mulf %5, %13 : vector<8x286xf32>
    %c0_20 = arith.constant 0 : index
    %c1_21 = arith.constant 1 : index
    %c0_22 = arith.constant 0 : index
    %c18 = arith.constant 18 : index
    %15 = vector.load %arg1[%c0_20, %c1_21, %c0_22, %c18] : memref<2x2x8x324xf32, #tpu.memory_space<vmem>>, vector<1x1x8x286xf32>
    %16 = vector.shape_cast %15 : vector<1x1x8x286xf32> to vector<8x286xf32>
    %17 = arith.mulf %5, %16 : vector<8x286xf32>
    %c0_23 = arith.constant 0 : index
    %c1_24 = arith.constant 1 : index
    %c0_25 = arith.constant 0 : index
    %c19_26 = arith.constant 19 : index
    %18 = vector.load %arg1[%c0_23, %c1_24, %c0_25, %c19_26] : memref<2x2x8x324xf32, #tpu.memory_space<vmem>>, vector<1x1x8x286xf32>
    %19 = vector.shape_cast %18 : vector<1x1x8x286xf32> to vector<8x286xf32>
    %20 = arith.mulf %5, %19 : vector<8x286xf32>
    %c0_27 = arith.constant 0 : index
    %c1_28 = arith.constant 1 : index
    %c0_29 = arith.constant 0 : index
    %c20 = arith.constant 20 : index
    %21 = vector.load %arg1[%c0_27, %c1_28, %c0_29, %c20] : memref<2x2x8x324xf32, #tpu.memory_space<vmem>>, vector<1x1x8x286xf32>
    %22 = vector.shape_cast %21 : vector<1x1x8x286xf32> to vector<8x286xf32>
    %23 = arith.mulf %5, %22 : vector<8x286xf32>
    %c0_30 = arith.constant 0 : index
    %c1_31 = arith.constant 1 : index
    %c0_32 = arith.constant 0 : index
    %c36 = arith.constant 36 : index
    %24 = vector.load %arg1[%c0_30, %c1_31, %c0_32, %c36] : memref<2x2x8x324xf32, #tpu.memory_space<vmem>>, vector<1x1x8x286xf32>
    %25 = vector.shape_cast %24 : vector<1x1x8x286xf32> to vector<8x286xf32>
    %26 = arith.mulf %5, %25 : vector<8x286xf32>
    %c0_33 = arith.constant 0 : index
    %c1_34 = arith.constant 1 : index
    %c0_35 = arith.constant 0 : index
    %c37 = arith.constant 37 : index
    %27 = vector.load %arg1[%c0_33, %c1_34, %c0_35, %c37] : memref<2x2x8x324xf32, #tpu.memory_space<vmem>>, vector<1x1x8x286xf32>
    %28 = vector.shape_cast %27 : vector<1x1x8x286xf32> to vector<8x286xf32>
    %29 = arith.mulf %5, %28 : vector<8x286xf32>
    %c0_36 = arith.constant 0 : index
    %c1_37 = arith.constant 1 : index
    %c0_38 = arith.constant 0 : index
    %c38 = arith.constant 38 : index
    %30 = vector.load %arg1[%c0_36, %c1_37, %c0_38, %c38] : memref<2x2x8x324xf32, #tpu.memory_space<vmem>>, vector<1x1x8x286xf32>
    %31 = vector.shape_cast %30 : vector<1x1x8x286xf32> to vector<8x286xf32>
    %32 = arith.mulf %5, %31 : vector<8x286xf32>
    %33 = tpu.concatenate %8, %11, %14, %17, %20, %23, %26, %29, %32 in 0 : vector<8x286xf32>, vector<8x286xf32>, vector<8x286xf32>, vector<8x286xf32>, vector<8x286xf32>, vector<8x286xf32>, vector<8x286xf32>, vector<8x286xf32>, vector<8x286xf32> -> vector<72x286xf32>
    %cst = arith.constant dense<0.000000e+00> : vector<36x286xf32>
    %34 = tpu.matmul %0, %33, %cst {dimension_numbers = #tpu.dot_dimension_numbers<[1], [0], [0], [1], [0, 0, 1, 1], [], []>} : vector<36x72xf32>, vector<72x286xf32>, vector<36x286xf32> -> vector<36x286xf32>
    %35 = vector.broadcast %1 : vector<36x1xf32> to vector<36x286xf32>
    %36 = arith.addf %34, %35 : vector<36x286xf32>
    %cst_39 = arith.constant 0.000000e+00 : f32
    %37 = vector.broadcast %cst_39 : f32 to vector<8x286xf32>
    %c0_40 = arith.constant 0 : index
    %c0_41 = arith.constant 0 : index
    %c0_42 = arith.constant 0 : index
    %c0_43 = arith.constant 0 : index
    %38 = vector.load %arg1[%c0_40, %c0_41, %c0_42, %c0_43] : memref<2x2x8x324xf32, #tpu.memory_space<vmem>>, vector<1x1x8x286xf32>
    %39 = vector.shape_cast %38 : vector<1x1x8x286xf32> to vector<8x286xf32>
    %c0_44 = arith.constant 0 : index
    %c1_45 = arith.constant 1 : index
    %c0_46 = arith.constant 0 : index
    %c0_47 = arith.constant 0 : index
    %40 = vector.load %arg1[%c0_44, %c1_45, %c0_46, %c0_47] : memref<2x2x8x324xf32, #tpu.memory_space<vmem>>, vector<1x1x8x286xf32>
    %41 = vector.shape_cast %40 : vector<1x1x8x286xf32> to vector<8x286xf32>
    %42 = vector.extract_strided_slice %36 {offsets = [0, 0], sizes = [2, 286], strides = [1, 1]} : vector<36x286xf32> to vector<2x286xf32>
    %43 = vector.extract_strided_slice %36 {offsets = [2, 0], sizes = [2, 286], strides = [1, 1]} : vector<36x286xf32> to vector<2x286xf32>
    %44 = tpu.concatenate %42, %42, %42, %42 in 0 : vector<2x286xf32>, vector<2x286xf32>, vector<2x286xf32>, vector<2x286xf32> -> vector<8x286xf32>
    %45 = tpu.concatenate %43, %43, %43, %43 in 0 : vector<2x286xf32>, vector<2x286xf32>, vector<2x286xf32>, vector<2x286xf32> -> vector<8x286xf32>
    %46 = arith.mulf %39, %44 : vector<8x286xf32>
    %47 = arith.addf %37, %46 : vector<8x286xf32>
    %48 = arith.mulf %41, %45 : vector<8x286xf32>
    %49 = arith.addf %47, %48 : vector<8x286xf32>
    %c0_48 = arith.constant 0 : index
    %c0_49 = arith.constant 0 : index
    %c0_50 = arith.constant 0 : index
    %c1_51 = arith.constant 1 : index
    %50 = vector.load %arg1[%c0_48, %c0_49, %c0_50, %c1_51] : memref<2x2x8x324xf32, #tpu.memory_space<vmem>>, vector<1x1x8x286xf32>
    %51 = vector.shape_cast %50 : vector<1x1x8x286xf32> to vector<8x286xf32>
    %c0_52 = arith.constant 0 : index
    %c1_53 = arith.constant 1 : index
    %c0_54 = arith.constant 0 : index
    %c1_55 = arith.constant 1 : index
    %52 = vector.load %arg1[%c0_52, %c1_53, %c0_54, %c1_55] : memref<2x2x8x324xf32, #tpu.memory_space<vmem>>, vector<1x1x8x286xf32>
    %53 = vector.shape_cast %52 : vector<1x1x8x286xf32> to vector<8x286xf32>
    %54 = vector.extract_strided_slice %36 {offsets = [4, 0], sizes = [2, 286], strides = [1, 1]} : vector<36x286xf32> to vector<2x286xf32>
    %55 = vector.extract_strided_slice %36 {offsets = [6, 0], sizes = [2, 286], strides = [1, 1]} : vector<36x286xf32> to vector<2x286xf32>
    %56 = tpu.concatenate %54, %54, %54, %54 in 0 : vector<2x286xf32>, vector<2x286xf32>, vector<2x286xf32>, vector<2x286xf32> -> vector<8x286xf32>
    %57 = tpu.concatenate %55, %55, %55, %55 in 0 : vector<2x286xf32>, vector<2x286xf32>, vector<2x286xf32>, vector<2x286xf32> -> vector<8x286xf32>
    %58 = arith.mulf %51, %56 : vector<8x286xf32>
    %59 = arith.addf %49, %58 : vector<8x286xf32>
    %60 = arith.mulf %53, %57 : vector<8x286xf32>
    %61 = arith.addf %59, %60 : vector<8x286xf32>
    %c0_56 = arith.constant 0 : index
    %c0_57 = arith.constant 0 : index
    %c0_58 = arith.constant 0 : index
    %c2_59 = arith.constant 2 : index
    %62 = vector.load %arg1[%c0_56, %c0_57, %c0_58, %c2_59] : memref<2x2x8x324xf32, #tpu.memory_space<vmem>>, vector<1x1x8x286xf32>
    %63 = vector.shape_cast %62 : vector<1x1x8x286xf32> to vector<8x286xf32>
    %c0_60 = arith.constant 0 : index
    %c1_61 = arith.constant 1 : index
    %c0_62 = arith.constant 0 : index
    %c2_63 = arith.constant 2 : index
    %64 = vector.load %arg1[%c0_60, %c1_61, %c0_62, %c2_63] : memref<2x2x8x324xf32, #tpu.memory_space<vmem>>, vector<1x1x8x286xf32>
    %65 = vector.shape_cast %64 : vector<1x1x8x286xf32> to vector<8x286xf32>
    %66 = vector.extract_strided_slice %36 {offsets = [8, 0], sizes = [2, 286], strides = [1, 1]} : vector<36x286xf32> to vector<2x286xf32>
    %67 = vector.extract_strided_slice %36 {offsets = [10, 0], sizes = [2, 286], strides = [1, 1]} : vector<36x286xf32> to vector<2x286xf32>
    %68 = tpu.concatenate %66, %66, %66, %66 in 0 : vector<2x286xf32>, vector<2x286xf32>, vector<2x286xf32>, vector<2x286xf32> -> vector<8x286xf32>
    %69 = tpu.concatenate %67, %67, %67, %67 in 0 : vector<2x286xf32>, vector<2x286xf32>, vector<2x286xf32>, vector<2x286xf32> -> vector<8x286xf32>
    %70 = arith.mulf %63, %68 : vector<8x286xf32>
    %71 = arith.addf %61, %70 : vector<8x286xf32>
    %72 = arith.mulf %65, %69 : vector<8x286xf32>
    %73 = arith.addf %71, %72 : vector<8x286xf32>
    %c0_64 = arith.constant 0 : index
    %c0_65 = arith.constant 0 : index
    %c0_66 = arith.constant 0 : index
    %c18_67 = arith.constant 18 : index
    %74 = vector.load %arg1[%c0_64, %c0_65, %c0_66, %c18_67] : memref<2x2x8x324xf32, #tpu.memory_space<vmem>>, vector<1x1x8x286xf32>
    %75 = vector.shape_cast %74 : vector<1x1x8x286xf32> to vector<8x286xf32>
    %c0_68 = arith.constant 0 : index
    %c1_69 = arith.constant 1 : index
    %c0_70 = arith.constant 0 : index
    %c18_71 = arith.constant 18 : index
    %76 = vector.load %arg1[%c0_68, %c1_69, %c0_70, %c18_71] : memref<2x2x8x324xf32, #tpu.memory_space<vmem>>, vector<1x1x8x286xf32>
    %77 = vector.shape_cast %76 : vector<1x1x8x286xf32> to vector<8x286xf32>
    %78 = vector.extract_strided_slice %36 {offsets = [12, 0], sizes = [2, 286], strides = [1, 1]} : vector<36x286xf32> to vector<2x286xf32>
    %79 = vector.extract_strided_slice %36 {offsets = [14, 0], sizes = [2, 286], strides = [1, 1]} : vector<36x286xf32> to vector<2x286xf32>
    %80 = tpu.concatenate %78, %78, %78, %78 in 0 : vector<2x286xf32>, vector<2x286xf32>, vector<2x286xf32>, vector<2x286xf32> -> vector<8x286xf32>
    %81 = tpu.concatenate %79, %79, %79, %79 in 0 : vector<2x286xf32>, vector<2x286xf32>, vector<2x286xf32>, vector<2x286xf32> -> vector<8x286xf32>
    %82 = arith.mulf %75, %80 : vector<8x286xf32>
    %83 = arith.addf %73, %82 : vector<8x286xf32>
    %84 = arith.mulf %77, %81 : vector<8x286xf32>
    %85 = arith.addf %83, %84 : vector<8x286xf32>
    %c0_72 = arith.constant 0 : index
    %c0_73 = arith.constant 0 : index
    %c0_74 = arith.constant 0 : index
    %c19_75 = arith.constant 19 : index
    %86 = vector.load %arg1[%c0_72, %c0_73, %c0_74, %c19_75] : memref<2x2x8x324xf32, #tpu.memory_space<vmem>>, vector<1x1x8x286xf32>
    %87 = vector.shape_cast %86 : vector<1x1x8x286xf32> to vector<8x286xf32>
    %c0_76 = arith.constant 0 : index
    %c1_77 = arith.constant 1 : index
    %c0_78 = arith.constant 0 : index
    %c19_79 = arith.constant 19 : index
    %88 = vector.load %arg1[%c0_76, %c1_77, %c0_78, %c19_79] : memref<2x2x8x324xf32, #tpu.memory_space<vmem>>, vector<1x1x8x286xf32>
    %89 = vector.shape_cast %88 : vector<1x1x8x286xf32> to vector<8x286xf32>
    %90 = vector.extract_strided_slice %36 {offsets = [16, 0], sizes = [2, 286], strides = [1, 1]} : vector<36x286xf32> to vector<2x286xf32>
    %91 = vector.extract_strided_slice %36 {offsets = [18, 0], sizes = [2, 286], strides = [1, 1]} : vector<36x286xf32> to vector<2x286xf32>
    %92 = tpu.concatenate %90, %90, %90, %90 in 0 : vector<2x286xf32>, vector<2x286xf32>, vector<2x286xf32>, vector<2x286xf32> -> vector<8x286xf32>
    %93 = tpu.concatenate %91, %91, %91, %91 in 0 : vector<2x286xf32>, vector<2x286xf32>, vector<2x286xf32>, vector<2x286xf32> -> vector<8x286xf32>
    %94 = arith.mulf %87, %92 : vector<8x286xf32>
    %95 = arith.addf %85, %94 : vector<8x286xf32>
    %96 = arith.mulf %89, %93 : vector<8x286xf32>
    %97 = arith.addf %95, %96 : vector<8x286xf32>
    %c0_80 = arith.constant 0 : index
    %c0_81 = arith.constant 0 : index
    %c0_82 = arith.constant 0 : index
    %c20_83 = arith.constant 20 : index
    %98 = vector.load %arg1[%c0_80, %c0_81, %c0_82, %c20_83] : memref<2x2x8x324xf32, #tpu.memory_space<vmem>>, vector<1x1x8x286xf32>
    %99 = vector.shape_cast %98 : vector<1x1x8x286xf32> to vector<8x286xf32>
    %c0_84 = arith.constant 0 : index
    %c1_85 = arith.constant 1 : index
    %c0_86 = arith.constant 0 : index
    %c20_87 = arith.constant 20 : index
    %100 = vector.load %arg1[%c0_84, %c1_85, %c0_86, %c20_87] : memref<2x2x8x324xf32, #tpu.memory_space<vmem>>, vector<1x1x8x286xf32>
    %101 = vector.shape_cast %100 : vector<1x1x8x286xf32> to vector<8x286xf32>
    %102 = vector.extract_strided_slice %36 {offsets = [20, 0], sizes = [2, 286], strides = [1, 1]} : vector<36x286xf32> to vector<2x286xf32>
    %103 = vector.extract_strided_slice %36 {offsets = [22, 0], sizes = [2, 286], strides = [1, 1]} : vector<36x286xf32> to vector<2x286xf32>
    %104 = tpu.concatenate %102, %102, %102, %102 in 0 : vector<2x286xf32>, vector<2x286xf32>, vector<2x286xf32>, vector<2x286xf32> -> vector<8x286xf32>
    %105 = tpu.concatenate %103, %103, %103, %103 in 0 : vector<2x286xf32>, vector<2x286xf32>, vector<2x286xf32>, vector<2x286xf32> -> vector<8x286xf32>
    %106 = arith.mulf %99, %104 : vector<8x286xf32>
    %107 = arith.addf %97, %106 : vector<8x286xf32>
    %108 = arith.mulf %101, %105 : vector<8x286xf32>
    %109 = arith.addf %107, %108 : vector<8x286xf32>
    %c0_88 = arith.constant 0 : index
    %c0_89 = arith.constant 0 : index
    %c0_90 = arith.constant 0 : index
    %c36_91 = arith.constant 36 : index
    %110 = vector.load %arg1[%c0_88, %c0_89, %c0_90, %c36_91] : memref<2x2x8x324xf32, #tpu.memory_space<vmem>>, vector<1x1x8x286xf32>
    %111 = vector.shape_cast %110 : vector<1x1x8x286xf32> to vector<8x286xf32>
    %c0_92 = arith.constant 0 : index
    %c1_93 = arith.constant 1 : index
    %c0_94 = arith.constant 0 : index
    %c36_95 = arith.constant 36 : index
    %112 = vector.load %arg1[%c0_92, %c1_93, %c0_94, %c36_95] : memref<2x2x8x324xf32, #tpu.memory_space<vmem>>, vector<1x1x8x286xf32>
    %113 = vector.shape_cast %112 : vector<1x1x8x286xf32> to vector<8x286xf32>
    %114 = vector.extract_strided_slice %36 {offsets = [24, 0], sizes = [2, 286], strides = [1, 1]} : vector<36x286xf32> to vector<2x286xf32>
    %115 = vector.extract_strided_slice %36 {offsets = [26, 0], sizes = [2, 286], strides = [1, 1]} : vector<36x286xf32> to vector<2x286xf32>
    %116 = tpu.concatenate %114, %114, %114, %114 in 0 : vector<2x286xf32>, vector<2x286xf32>, vector<2x286xf32>, vector<2x286xf32> -> vector<8x286xf32>
    %117 = tpu.concatenate %115, %115, %115, %115 in 0 : vector<2x286xf32>, vector<2x286xf32>, vector<2x286xf32>, vector<2x286xf32> -> vector<8x286xf32>
    %118 = arith.mulf %111, %116 : vector<8x286xf32>
    %119 = arith.addf %109, %118 : vector<8x286xf32>
    %120 = arith.mulf %113, %117 : vector<8x286xf32>
    %121 = arith.addf %119, %120 : vector<8x286xf32>
    %c0_96 = arith.constant 0 : index
    %c0_97 = arith.constant 0 : index
    %c0_98 = arith.constant 0 : index
    %c37_99 = arith.constant 37 : index
    %122 = vector.load %arg1[%c0_96, %c0_97, %c0_98, %c37_99] : memref<2x2x8x324xf32, #tpu.memory_space<vmem>>, vector<1x1x8x286xf32>
    %123 = vector.shape_cast %122 : vector<1x1x8x286xf32> to vector<8x286xf32>
    %c0_100 = arith.constant 0 : index
    %c1_101 = arith.constant 1 : index
    %c0_102 = arith.constant 0 : index
    %c37_103 = arith.constant 37 : index
    %124 = vector.load %arg1[%c0_100, %c1_101, %c0_102, %c37_103] : memref<2x2x8x324xf32, #tpu.memory_space<vmem>>, vector<1x1x8x286xf32>
    %125 = vector.shape_cast %124 : vector<1x1x8x286xf32> to vector<8x286xf32>
    %126 = vector.extract_strided_slice %36 {offsets = [28, 0], sizes = [2, 286], strides = [1, 1]} : vector<36x286xf32> to vector<2x286xf32>
    %127 = vector.extract_strided_slice %36 {offsets = [30, 0], sizes = [2, 286], strides = [1, 1]} : vector<36x286xf32> to vector<2x286xf32>
    %128 = tpu.concatenate %126, %126, %126, %126 in 0 : vector<2x286xf32>, vector<2x286xf32>, vector<2x286xf32>, vector<2x286xf32> -> vector<8x286xf32>
    %129 = tpu.concatenate %127, %127, %127, %127 in 0 : vector<2x286xf32>, vector<2x286xf32>, vector<2x286xf32>, vector<2x286xf32> -> vector<8x286xf32>
    %130 = arith.mulf %123, %128 : vector<8x286xf32>
    %131 = arith.addf %121, %130 : vector<8x286xf32>
    %132 = arith.mulf %125, %129 : vector<8x286xf32>
    %133 = arith.addf %131, %132 : vector<8x286xf32>
    %c0_104 = arith.constant 0 : index
    %c0_105 = arith.constant 0 : index
    %c0_106 = arith.constant 0 : index
    %c38_107 = arith.constant 38 : index
    %134 = vector.load %arg1[%c0_104, %c0_105, %c0_106, %c38_107] : memref<2x2x8x324xf32, #tpu.memory_space<vmem>>, vector<1x1x8x286xf32>
    %135 = vector.shape_cast %134 : vector<1x1x8x286xf32> to vector<8x286xf32>
    %c0_108 = arith.constant 0 : index
    %c1_109 = arith.constant 1 : index
    %c0_110 = arith.constant 0 : index
    %c38_111 = arith.constant 38 : index
    %136 = vector.load %arg1[%c0_108, %c1_109, %c0_110, %c38_111] : memref<2x2x8x324xf32, #tpu.memory_space<vmem>>, vector<1x1x8x286xf32>
    %137 = vector.shape_cast %136 : vector<1x1x8x286xf32> to vector<8x286xf32>
    %138 = vector.extract_strided_slice %36 {offsets = [32, 0], sizes = [2, 286], strides = [1, 1]} : vector<36x286xf32> to vector<2x286xf32>
    %139 = vector.extract_strided_slice %36 {offsets = [34, 0], sizes = [2, 286], strides = [1, 1]} : vector<36x286xf32> to vector<2x286xf32>
    %140 = tpu.concatenate %138, %138, %138, %138 in 0 : vector<2x286xf32>, vector<2x286xf32>, vector<2x286xf32>, vector<2x286xf32> -> vector<8x286xf32>
    %141 = tpu.concatenate %139, %139, %139, %139 in 0 : vector<2x286xf32>, vector<2x286xf32>, vector<2x286xf32>, vector<2x286xf32> -> vector<8x286xf32>
    %142 = arith.mulf %135, %140 : vector<8x286xf32>
    %143 = arith.addf %133, %142 : vector<8x286xf32>
    %144 = arith.mulf %137, %141 : vector<8x286xf32>
    %145 = arith.addf %143, %144 : vector<8x286xf32>
    %146 = vector.broadcast %2 : vector<8x1xf32> to vector<8x286xf32>
    %147 = arith.mulf %145, %146 : vector<8x286xf32>
    %148 = vector.broadcast %3 : vector<8x1xf32> to vector<8x286xf32>
    %149 = arith.addf %147, %148 : vector<8x286xf32>
    %c0_112 = arith.constant 0 : index
    %c0_113 = arith.constant 0 : index
    %c0_114 = arith.constant 0 : index
    %150 = vector.load %arg6[%c0_112, %c0_113, %c0_114] : memref<2x8x286xf32, #tpu.memory_space<vmem>>, vector<1x8x286xf32>
    %151 = vector.shape_cast %150 : vector<1x8x286xf32> to vector<8x286xf32>
    %152 = vector.shape_cast %149 : vector<8x286xf32> to vector<1x8x286xf32>
    tpu.vector_store %arg6[%c0_112, %c0_113, %c0_114], %152 {strides = array<i32>} : memref<2x8x286xf32, #tpu.memory_space<vmem>>, vector<1x8x286xf32>,
    %c1_115 = arith.constant 1 : index
    %c0_116 = arith.constant 0 : index
    %c0_117 = arith.constant 0 : index
    %c19_118 = arith.constant 19 : index
    %153 = vector.load %arg1[%c1_115, %c0_116, %c0_117, %c19_118] : memref<2x2x8x324xf32, #tpu.memory_space<vmem>>, vector<1x1x8x286xf32>
    %154 = vector.shape_cast %153 : vector<1x1x8x286xf32> to vector<8x286xf32>
    %c1_119 = arith.constant 1 : index
    %c1_120 = arith.constant 1 : index
    %c0_121 = arith.constant 0 : index
    %c0_122 = arith.constant 0 : index
    %155 = vector.load %arg1[%c1_119, %c1_120, %c0_121, %c0_122] : memref<2x2x8x324xf32, #tpu.memory_space<vmem>>, vector<1x1x8x286xf32>
    %156 = vector.shape_cast %155 : vector<1x1x8x286xf32> to vector<8x286xf32>
    %157 = arith.mulf %154, %156 : vector<8x286xf32>
    %c1_123 = arith.constant 1 : index
    %c1_124 = arith.constant 1 : index
    %c0_125 = arith.constant 0 : index
    %c1_126 = arith.constant 1 : index
    %158 = vector.load %arg1[%c1_123, %c1_124, %c0_125, %c1_126] : memref<2x2x8x324xf32, #tpu.memory_space<vmem>>, vector<1x1x8x286xf32>
    %159 = vector.shape_cast %158 : vector<1x1x8x286xf32> to vector<8x286xf32>
    %160 = arith.mulf %154, %159 : vector<8x286xf32>
    %c1_127 = arith.constant 1 : index
    %c1_128 = arith.constant 1 : index
    %c0_129 = arith.constant 0 : index
    %c2_130 = arith.constant 2 : index
    %161 = vector.load %arg1[%c1_127, %c1_128, %c0_129, %c2_130] : memref<2x2x8x324xf32, #tpu.memory_space<vmem>>, vector<1x1x8x286xf32>
    %162 = vector.shape_cast %161 : vector<1x1x8x286xf32> to vector<8x286xf32>
    %163 = arith.mulf %154, %162 : vector<8x286xf32>
    %c1_131 = arith.constant 1 : index
    %c1_132 = arith.constant 1 : index
    %c0_133 = arith.constant 0 : index
    %c18_134 = arith.constant 18 : index
    %164 = vector.load %arg1[%c1_131, %c1_132, %c0_133, %c18_134] : memref<2x2x8x324xf32, #tpu.memory_space<vmem>>, vector<1x1x8x286xf32>
    %165 = vector.shape_cast %164 : vector<1x1x8x286xf32> to vector<8x286xf32>
    %166 = arith.mulf %154, %165 : vector<8x286xf32>
    %c1_135 = arith.constant 1 : index
    %c1_136 = arith.constant 1 : index
    %c0_137 = arith.constant 0 : index
    %c19_138 = arith.constant 19 : index
    %167 = vector.load %arg1[%c1_135, %c1_136, %c0_137, %c19_138] : memref<2x2x8x324xf32, #tpu.memory_space<vmem>>, vector<1x1x8x286xf32>
    %168 = vector.shape_cast %167 : vector<1x1x8x286xf32> to vector<8x286xf32>
    %169 = arith.mulf %154, %168 : vector<8x286xf32>
    %c1_139 = arith.constant 1 : index
    %c1_140 = arith.constant 1 : index
    %c0_141 = arith.constant 0 : index
    %c20_142 = arith.constant 20 : index
    %170 = vector.load %arg1[%c1_139, %c1_140, %c0_141, %c20_142] : memref<2x2x8x324xf32, #tpu.memory_space<vmem>>, vector<1x1x8x286xf32>
    %171 = vector.shape_cast %170 : vector<1x1x8x286xf32> to vector<8x286xf32>
    %172 = arith.mulf %154, %171 : vector<8x286xf32>
    %c1_143 = arith.constant 1 : index
    %c1_144 = arith.constant 1 : index
    %c0_145 = arith.constant 0 : index
    %c36_146 = arith.constant 36 : index
    %173 = vector.load %arg1[%c1_143, %c1_144, %c0_145, %c36_146] : memref<2x2x8x324xf32, #tpu.memory_space<vmem>>, vector<1x1x8x286xf32>
    %174 = vector.shape_cast %173 : vector<1x1x8x286xf32> to vector<8x286xf32>
    %175 = arith.mulf %154, %174 : vector<8x286xf32>
    %c1_147 = arith.constant 1 : index
    %c1_148 = arith.constant 1 : index
    %c0_149 = arith.constant 0 : index
    %c37_150 = arith.constant 37 : index
    %176 = vector.load %arg1[%c1_147, %c1_148, %c0_149, %c37_150] : memref<2x2x8x324xf32, #tpu.memory_space<vmem>>, vector<1x1x8x286xf32>
    %177 = vector.shape_cast %176 : vector<1x1x8x286xf32> to vector<8x286xf32>
    %178 = arith.mulf %154, %177 : vector<8x286xf32>
    %c1_151 = arith.constant 1 : index
    %c1_152 = arith.constant 1 : index
    %c0_153 = arith.constant 0 : index
    %c38_154 = arith.constant 38 : index
    %179 = vector.load %arg1[%c1_151, %c1_152, %c0_153, %c38_154] : memref<2x2x8x324xf32, #tpu.memory_space<vmem>>, vector<1x1x8x286xf32>
    %180 = vector.shape_cast %179 : vector<1x1x8x286xf32> to vector<8x286xf32>
    %181 = arith.mulf %154, %180 : vector<8x286xf32>
    %182 = tpu.concatenate %157, %160, %163, %166, %169, %172, %175, %178, %181 in 0 : vector<8x286xf32>, vector<8x286xf32>, vector<8x286xf32>, vector<8x286xf32>, vector<8x286xf32>, vector<8x286xf32>, vector<8x286xf32>, vector<8x286xf32>, vector<8x286xf32> -> vector<72x286xf32>
    %cst_155 = arith.constant dense<0.000000e+00> : vector<36x286xf32>
    %183 = tpu.matmul %0, %182, %cst_155 {dimension_numbers = #tpu.dot_dimension_numbers<[1], [0], [0], [1], [0, 0, 1, 1], [], []>} : vector<36x72xf32>, vector<72x286xf32>, vector<36x286xf32> -> vector<36x286xf32>
    %184 = vector.broadcast %1 : vector<36x1xf32> to vector<36x286xf32>
    %185 = arith.addf %183, %184 : vector<36x286xf32>
    %cst_156 = arith.constant 0.000000e+00 : f32
    %186 = vector.broadcast %cst_156 : f32 to vector<8x286xf32>
    %c1_157 = arith.constant 1 : index
    %c0_158 = arith.constant 0 : index
    %c0_159 = arith.constant 0 : index
    %c0_160 = arith.constant 0 : index
    %187 = vector.load %arg1[%c1_157, %c0_158, %c0_159, %c0_160] : memref<2x2x8x324xf32, #tpu.memory_space<vmem>>, vector<1x1x8x286xf32>
    %188 = vector.shape_cast %187 : vector<1x1x8x286xf32> to vector<8x286xf32>
    %c1_161 = arith.constant 1 : index
    %c1_162 = arith.constant 1 : index
    %c0_163 = arith.constant 0 : index
    %c0_164 = arith.constant 0 : index
    %189 = vector.load %arg1[%c1_161, %c1_162, %c0_163, %c0_164] : memref<2x2x8x324xf32, #tpu.memory_space<vmem>>, vector<1x1x8x286xf32>
    %190 = vector.shape_cast %189 : vector<1x1x8x286xf32> to vector<8x286xf32>
    %191 = vector.extract_strided_slice %185 {offsets = [0, 0], sizes = [2, 286], strides = [1, 1]} : vector<36x286xf32> to vector<2x286xf32>
    %192 = vector.extract_strided_slice %185 {offsets = [2, 0], sizes = [2, 286], strides = [1, 1]} : vector<36x286xf32> to vector<2x286xf32>
    %193 = tpu.concatenate %191, %191, %191, %191 in 0 : vector<2x286xf32>, vector<2x286xf32>, vector<2x286xf32>, vector<2x286xf32> -> vector<8x286xf32>
    %194 = tpu.concatenate %192, %192, %192, %192 in 0 : vector<2x286xf32>, vector<2x286xf32>, vector<2x286xf32>, vector<2x286xf32> -> vector<8x286xf32>
    %195 = arith.mulf %188, %193 : vector<8x286xf32>
    %196 = arith.addf %186, %195 : vector<8x286xf32>
    %197 = arith.mulf %190, %194 : vector<8x286xf32>
    %198 = arith.addf %196, %197 : vector<8x286xf32>
    %c1_165 = arith.constant 1 : index
    %c0_166 = arith.constant 0 : index
    %c0_167 = arith.constant 0 : index
    %c1_168 = arith.constant 1 : index
    %199 = vector.load %arg1[%c1_165, %c0_166, %c0_167, %c1_168] : memref<2x2x8x324xf32, #tpu.memory_space<vmem>>, vector<1x1x8x286xf32>
    %200 = vector.shape_cast %199 : vector<1x1x8x286xf32> to vector<8x286xf32>
    %c1_169 = arith.constant 1 : index
    %c1_170 = arith.constant 1 : index
    %c0_171 = arith.constant 0 : index
    %c1_172 = arith.constant 1 : index
    %201 = vector.load %arg1[%c1_169, %c1_170, %c0_171, %c1_172] : memref<2x2x8x324xf32, #tpu.memory_space<vmem>>, vector<1x1x8x286xf32>
    %202 = vector.shape_cast %201 : vector<1x1x8x286xf32> to vector<8x286xf32>
    %203 = vector.extract_strided_slice %185 {offsets = [4, 0], sizes = [2, 286], strides = [1, 1]} : vector<36x286xf32> to vector<2x286xf32>
    %204 = vector.extract_strided_slice %185 {offsets = [6, 0], sizes = [2, 286], strides = [1, 1]} : vector<36x286xf32> to vector<2x286xf32>
    %205 = tpu.concatenate %203, %203, %203, %203 in 0 : vector<2x286xf32>, vector<2x286xf32>, vector<2x286xf32>, vector<2x286xf32> -> vector<8x286xf32>
    %206 = tpu.concatenate %204, %204, %204, %204 in 0 : vector<2x286xf32>, vector<2x286xf32>, vector<2x286xf32>, vector<2x286xf32> -> vector<8x286xf32>
    %207 = arith.mulf %200, %205 : vector<8x286xf32>
    %208 = arith.addf %198, %207 : vector<8x286xf32>
    %209 = arith.mulf %202, %206 : vector<8x286xf32>
    %210 = arith.addf %208, %209 : vector<8x286xf32>
    %c1_173 = arith.constant 1 : index
    %c0_174 = arith.constant 0 : index
    %c0_175 = arith.constant 0 : index
    %c2_176 = arith.constant 2 : index
    %211 = vector.load %arg1[%c1_173, %c0_174, %c0_175, %c2_176] : memref<2x2x8x324xf32, #tpu.memory_space<vmem>>, vector<1x1x8x286xf32>
    %212 = vector.shape_cast %211 : vector<1x1x8x286xf32> to vector<8x286xf32>
    %c1_177 = arith.constant 1 : index
    %c1_178 = arith.constant 1 : index
    %c0_179 = arith.constant 0 : index
    %c2_180 = arith.constant 2 : index
    %213 = vector.load %arg1[%c1_177, %c1_178, %c0_179, %c2_180] : memref<2x2x8x324xf32, #tpu.memory_space<vmem>>, vector<1x1x8x286xf32>
    %214 = vector.shape_cast %213 : vector<1x1x8x286xf32> to vector<8x286xf32>
    %215 = vector.extract_strided_slice %185 {offsets = [8, 0], sizes = [2, 286], strides = [1, 1]} : vector<36x286xf32> to vector<2x286xf32>
    %216 = vector.extract_strided_slice %185 {offsets = [10, 0], sizes = [2, 286], strides = [1, 1]} : vector<36x286xf32> to vector<2x286xf32>
    %217 = tpu.concatenate %215, %215, %215, %215 in 0 : vector<2x286xf32>, vector<2x286xf32>, vector<2x286xf32>, vector<2x286xf32> -> vector<8x286xf32>
    %218 = tpu.concatenate %216, %216, %216, %216 in 0 : vector<2x286xf32>, vector<2x286xf32>, vector<2x286xf32>, vector<2x286xf32> -> vector<8x286xf32>
    %219 = arith.mulf %212, %217 : vector<8x286xf32>
    %220 = arith.addf %210, %219 : vector<8x286xf32>
    %221 = arith.mulf %214, %218 : vector<8x286xf32>
    %222 = arith.addf %220, %221 : vector<8x286xf32>
    %c1_181 = arith.constant 1 : index
    %c0_182 = arith.constant 0 : index
    %c0_183 = arith.constant 0 : index
    %c18_184 = arith.constant 18 : index
    %223 = vector.load %arg1[%c1_181, %c0_182, %c0_183, %c18_184] : memref<2x2x8x324xf32, #tpu.memory_space<vmem>>, vector<1x1x8x286xf32>
    %224 = vector.shape_cast %223 : vector<1x1x8x286xf32> to vector<8x286xf32>
    %c1_185 = arith.constant 1 : index
    %c1_186 = arith.constant 1 : index
    %c0_187 = arith.constant 0 : index
    %c18_188 = arith.constant 18 : index
    %225 = vector.load %arg1[%c1_185, %c1_186, %c0_187, %c18_188] : memref<2x2x8x324xf32, #tpu.memory_space<vmem>>, vector<1x1x8x286xf32>
    %226 = vector.shape_cast %225 : vector<1x1x8x286xf32> to vector<8x286xf32>
    %227 = vector.extract_strided_slice %185 {offsets = [12, 0], sizes = [2, 286], strides = [1, 1]} : vector<36x286xf32> to vector<2x286xf32>
    %228 = vector.extract_strided_slice %185 {offsets = [14, 0], sizes = [2, 286], strides = [1, 1]} : vector<36x286xf32> to vector<2x286xf32>
    %229 = tpu.concatenate %227, %227, %227, %227 in 0 : vector<2x286xf32>, vector<2x286xf32>, vector<2x286xf32>, vector<2x286xf32> -> vector<8x286xf32>
    %230 = tpu.concatenate %228, %228, %228, %228 in 0 : vector<2x286xf32>, vector<2x286xf32>, vector<2x286xf32>, vector<2x286xf32> -> vector<8x286xf32>
    %231 = arith.mulf %224, %229 : vector<8x286xf32>
    %232 = arith.addf %222, %231 : vector<8x286xf32>
    %233 = arith.mulf %226, %230 : vector<8x286xf32>
    %234 = arith.addf %232, %233 : vector<8x286xf32>
    %c1_189 = arith.constant 1 : index
    %c0_190 = arith.constant 0 : index
    %c0_191 = arith.constant 0 : index
    %c19_192 = arith.constant 19 : index
    %235 = vector.load %arg1[%c1_189, %c0_190, %c0_191, %c19_192] : memref<2x2x8x324xf32, #tpu.memory_space<vmem>>, vector<1x1x8x286xf32>
    %236 = vector.shape_cast %235 : vector<1x1x8x286xf32> to vector<8x286xf32>
    %c1_193 = arith.constant 1 : index
    %c1_194 = arith.constant 1 : index
    %c0_195 = arith.constant 0 : index
    %c19_196 = arith.constant 19 : index
    %237 = vector.load %arg1[%c1_193, %c1_194, %c0_195, %c19_196] : memref<2x2x8x324xf32, #tpu.memory_space<vmem>>, vector<1x1x8x286xf32>
    %238 = vector.shape_cast %237 : vector<1x1x8x286xf32> to vector<8x286xf32>
    %239 = vector.extract_strided_slice %185 {offsets = [16, 0], sizes = [2, 286], strides = [1, 1]} : vector<36x286xf32> to vector<2x286xf32>
    %240 = vector.extract_strided_slice %185 {offsets = [18, 0], sizes = [2, 286], strides = [1, 1]} : vector<36x286xf32> to vector<2x286xf32>
    %241 = tpu.concatenate %239, %239, %239, %239 in 0 : vector<2x286xf32>, vector<2x286xf32>, vector<2x286xf32>, vector<2x286xf32> -> vector<8x286xf32>
    %242 = tpu.concatenate %240, %240, %240, %240 in 0 : vector<2x286xf32>, vector<2x286xf32>, vector<2x286xf32>, vector<2x286xf32> -> vector<8x286xf32>
    %243 = arith.mulf %236, %241 : vector<8x286xf32>
    %244 = arith.addf %234, %243 : vector<8x286xf32>
    %245 = arith.mulf %238, %242 : vector<8x286xf32>
    %246 = arith.addf %244, %245 : vector<8x286xf32>
    %c1_197 = arith.constant 1 : index
    %c0_198 = arith.constant 0 : index
    %c0_199 = arith.constant 0 : index
    %c20_200 = arith.constant 20 : index
    %247 = vector.load %arg1[%c1_197, %c0_198, %c0_199, %c20_200] : memref<2x2x8x324xf32, #tpu.memory_space<vmem>>, vector<1x1x8x286xf32>
    %248 = vector.shape_cast %247 : vector<1x1x8x286xf32> to vector<8x286xf32>
    %c1_201 = arith.constant 1 : index
    %c1_202 = arith.constant 1 : index
    %c0_203 = arith.constant 0 : index
    %c20_204 = arith.constant 20 : index
    %249 = vector.load %arg1[%c1_201, %c1_202, %c0_203, %c20_204] : memref<2x2x8x324xf32, #tpu.memory_space<vmem>>, vector<1x1x8x286xf32>
    %250 = vector.shape_cast %249 : vector<1x1x8x286xf32> to vector<8x286xf32>
    %251 = vector.extract_strided_slice %185 {offsets = [20, 0], sizes = [2, 286], strides = [1, 1]} : vector<36x286xf32> to vector<2x286xf32>
    %252 = vector.extract_strided_slice %185 {offsets = [22, 0], sizes = [2, 286], strides = [1, 1]} : vector<36x286xf32> to vector<2x286xf32>
    %253 = tpu.concatenate %251, %251, %251, %251 in 0 : vector<2x286xf32>, vector<2x286xf32>, vector<2x286xf32>, vector<2x286xf32> -> vector<8x286xf32>
    %254 = tpu.concatenate %252, %252, %252, %252 in 0 : vector<2x286xf32>, vector<2x286xf32>, vector<2x286xf32>, vector<2x286xf32> -> vector<8x286xf32>
    %255 = arith.mulf %248, %253 : vector<8x286xf32>
    %256 = arith.addf %246, %255 : vector<8x286xf32>
    %257 = arith.mulf %250, %254 : vector<8x286xf32>
    %258 = arith.addf %256, %257 : vector<8x286xf32>
    %c1_205 = arith.constant 1 : index
    %c0_206 = arith.constant 0 : index
    %c0_207 = arith.constant 0 : index
    %c36_208 = arith.constant 36 : index
    %259 = vector.load %arg1[%c1_205, %c0_206, %c0_207, %c36_208] : memref<2x2x8x324xf32, #tpu.memory_space<vmem>>, vector<1x1x8x286xf32>
    %260 = vector.shape_cast %259 : vector<1x1x8x286xf32> to vector<8x286xf32>
    %c1_209 = arith.constant 1 : index
    %c1_210 = arith.constant 1 : index
    %c0_211 = arith.constant 0 : index
    %c36_212 = arith.constant 36 : index
    %261 = vector.load %arg1[%c1_209, %c1_210, %c0_211, %c36_212] : memref<2x2x8x324xf32, #tpu.memory_space<vmem>>, vector<1x1x8x286xf32>
    %262 = vector.shape_cast %261 : vector<1x1x8x286xf32> to vector<8x286xf32>
    %263 = vector.extract_strided_slice %185 {offsets = [24, 0], sizes = [2, 286], strides = [1, 1]} : vector<36x286xf32> to vector<2x286xf32>
    %264 = vector.extract_strided_slice %185 {offsets = [26, 0], sizes = [2, 286], strides = [1, 1]} : vector<36x286xf32> to vector<2x286xf32>
    %265 = tpu.concatenate %263, %263, %263, %263 in 0 : vector<2x286xf32>, vector<2x286xf32>, vector<2x286xf32>, vector<2x286xf32> -> vector<8x286xf32>
    %266 = tpu.concatenate %264, %264, %264, %264 in 0 : vector<2x286xf32>, vector<2x286xf32>, vector<2x286xf32>, vector<2x286xf32> -> vector<8x286xf32>
    %267 = arith.mulf %260, %265 : vector<8x286xf32>
    %268 = arith.addf %258, %267 : vector<8x286xf32>
    %269 = arith.mulf %262, %266 : vector<8x286xf32>
    %270 = arith.addf %268, %269 : vector<8x286xf32>
    %c1_213 = arith.constant 1 : index
    %c0_214 = arith.constant 0 : index
    %c0_215 = arith.constant 0 : index
    %c37_216 = arith.constant 37 : index
    %271 = vector.load %arg1[%c1_213, %c0_214, %c0_215, %c37_216] : memref<2x2x8x324xf32, #tpu.memory_space<vmem>>, vector<1x1x8x286xf32>
    %272 = vector.shape_cast %271 : vector<1x1x8x286xf32> to vector<8x286xf32>
    %c1_217 = arith.constant 1 : index
    %c1_218 = arith.constant 1 : index
    %c0_219 = arith.constant 0 : index
    %c37_220 = arith.constant 37 : index
    %273 = vector.load %arg1[%c1_217, %c1_218, %c0_219, %c37_220] : memref<2x2x8x324xf32, #tpu.memory_space<vmem>>, vector<1x1x8x286xf32>
    %274 = vector.shape_cast %273 : vector<1x1x8x286xf32> to vector<8x286xf32>
    %275 = vector.extract_strided_slice %185 {offsets = [28, 0], sizes = [2, 286], strides = [1, 1]} : vector<36x286xf32> to vector<2x286xf32>
    %276 = vector.extract_strided_slice %185 {offsets = [30, 0], sizes = [2, 286], strides = [1, 1]} : vector<36x286xf32> to vector<2x286xf32>
    %277 = tpu.concatenate %275, %275, %275, %275 in 0 : vector<2x286xf32>, vector<2x286xf32>, vector<2x286xf32>, vector<2x286xf32> -> vector<8x286xf32>
    %278 = tpu.concatenate %276, %276, %276, %276 in 0 : vector<2x286xf32>, vector<2x286xf32>, vector<2x286xf32>, vector<2x286xf32> -> vector<8x286xf32>
    %279 = arith.mulf %272, %277 : vector<8x286xf32>
    %280 = arith.addf %270, %279 : vector<8x286xf32>
    %281 = arith.mulf %274, %278 : vector<8x286xf32>
    %282 = arith.addf %280, %281 : vector<8x286xf32>
    %c1_221 = arith.constant 1 : index
    %c0_222 = arith.constant 0 : index
    %c0_223 = arith.constant 0 : index
    %c38_224 = arith.constant 38 : index
    %283 = vector.load %arg1[%c1_221, %c0_222, %c0_223, %c38_224] : memref<2x2x8x324xf32, #tpu.memory_space<vmem>>, vector<1x1x8x286xf32>
    %284 = vector.shape_cast %283 : vector<1x1x8x286xf32> to vector<8x286xf32>
    %c1_225 = arith.constant 1 : index
    %c1_226 = arith.constant 1 : index
    %c0_227 = arith.constant 0 : index
    %c38_228 = arith.constant 38 : index
    %285 = vector.load %arg1[%c1_225, %c1_226, %c0_227, %c38_228] : memref<2x2x8x324xf32, #tpu.memory_space<vmem>>, vector<1x1x8x286xf32>
    %286 = vector.shape_cast %285 : vector<1x1x8x286xf32> to vector<8x286xf32>
    %287 = vector.extract_strided_slice %185 {offsets = [32, 0], sizes = [2, 286], strides = [1, 1]} : vector<36x286xf32> to vector<2x286xf32>
    %288 = vector.extract_strided_slice %185 {offsets = [34, 0], sizes = [2, 286], strides = [1, 1]} : vector<36x286xf32> to vector<2x286xf32>
    %289 = tpu.concatenate %287, %287, %287, %287 in 0 : vector<2x286xf32>, vector<2x286xf32>, vector<2x286xf32>, vector<2x286xf32> -> vector<8x286xf32>
    %290 = tpu.concatenate %288, %288, %288, %288 in 0 : vector<2x286xf32>, vector<2x286xf32>, vector<2x286xf32>, vector<2x286xf32> -> vector<8x286xf32>
    %291 = arith.mulf %284, %289 : vector<8x286xf32>
    %292 = arith.addf %282, %291 : vector<8x286xf32>
    %293 = arith.mulf %286, %290 : vector<8x286xf32>
    %294 = arith.addf %292, %293 : vector<8x286xf32>
    %295 = vector.broadcast %2 : vector<8x1xf32> to vector<8x286xf32>
    %296 = arith.mulf %294, %295 : vector<8x286xf32>
    %297 = vector.broadcast %3 : vector<8x1xf32> to vector<8x286xf32>
    %298 = arith.addf %296, %297 : vector<8x286xf32>
    %c1_229 = arith.constant 1 : index
    %c0_230 = arith.constant 0 : index
    %c0_231 = arith.constant 0 : index
    %299 = vector.load %arg6[%c1_229, %c0_230, %c0_231] : memref<2x8x286xf32, #tpu.memory_space<vmem>>, vector<1x8x286xf32>
    %300 = vector.shape_cast %299 : vector<1x8x286xf32> to vector<8x286xf32>
    %301 = vector.shape_cast %298 : vector<8x286xf32> to vector<1x8x286xf32>
    tpu.vector_store %arg6[%c1_229, %c0_230, %c0_231], %301 {strides = array<i32>} : memref<2x8x286xf32, #tpu.memory_space<vmem>>, vector<1x8x286xf32>,
    return
  }
  func.func @transform_0(%arg0: i32) -> (i32, i32, i32, i32) {
    %c0_i32 = arith.constant 0 : i32
    %c0_i32_0 = arith.constant 0 : i32
    %c0_i32_1 = arith.constant 0 : i32
    %c0_i32_2 = arith.constant 0 : i32
    return %arg0, %c0_i32, %c0_i32_0, %c0_i32_1 : i32, i32, i32, i32
  }
  func.func @transform_1(%arg0: i32) -> (i32, i32) {
    %c0_i32 = arith.constant 0 : i32
    %c0_i32_0 = arith.constant 0 : i32
    %c0_i32_1 = arith.constant 0 : i32
    return %c0_i32, %c0_i32_0 : i32, i32
  }
  func.func @transform_2(%arg0: i32) -> (i32, i32) {
    %c0_i32 = arith.constant 0 : i32
    %c0_i32_0 = arith.constant 0 : i32
    %c0_i32_1 = arith.constant 0 : i32
    return %c0_i32, %c0_i32_0 : i32, i32
  }
  func.func @transform_3(%arg0: i32) -> (i32, i32) {
    %c0_i32 = arith.constant 0 : i32
    %c0_i32_0 = arith.constant 0 : i32
    %c0_i32_1 = arith.constant 0 : i32
    return %c0_i32, %c0_i32_0 : i32, i32
  }
  func.func @transform_4(%arg0: i32) -> (i32, i32) {
    %c0_i32 = arith.constant 0 : i32
    %c0_i32_0 = arith.constant 0 : i32
    %c0_i32_1 = arith.constant 0 : i32
    return %c0_i32, %c0_i32_0 : i32, i32
  }
  func.func @transform_5(%arg0: i32) -> (i32, i32, i32) {
    %c0_i32 = arith.constant 0 : i32
    %c0_i32_0 = arith.constant 0 : i32
    %c0_i32_1 = arith.constant 0 : i32
    return %arg0, %c0_i32, %c0_i32_0 : i32, i32, i32
  }
}

</mosaic_0001>

<bundles_post_ra>
// kernel: tpu_custom_call.1
= control target key start
LH: loop header
LB: loop body
LE: loop exit
PB: predicated region body
PF: predicated region fallthrough
CT: control target
= control target key end

     0   :  { %10 = vsyncpa [#allocation3], 0  ;;  %s6185_s0 = inlined_call_operand.hbm [shape: f32[4,2,8,324], index: 0, kind: input, shape index: {}]   ;;  %s6186_s1 = inlined_call_operand.vmem [shape: f32[36,72], index: 1, kind: input, shape index: {}]   ;;  %s6187_s2 = inlined_call_operand.vmem [shape: f32[36,1], index: 2, kind: input, shape index: {}]   ;;  %s6188_s3 = inlined_call_operand.vmem [shape: f32[8,1], index: 3, kind: input, shape index: {}]   ;;  %s6189_s4 = inlined_call_operand.vmem [shape: f32[8,1], index: 4, kind: input, shape index: {}]   ;;  %s6190_s5 = inlined_call_operand.hbm [shape: f32[4,8,286], index: 5, kind: output, shape index: {}]  }
   0x1   :  { %12 = vsyncpa [#allocation3 + $0x1], 0 }
   0x2   :  { %13 = vsyncpa [#allocation4], 0 }
   0x3   :  { %15 = vsyncpa [#allocation4 + $0x1], 0  ;;  %s3524_s18 = smov 0   ;;  %s3526_s19 = smov 0  }
   0x4   :  { %s3528_s20 = smov 0   ;;  %s3530_s21 = smov 0  }
   0x5 LB: > { %s3545_s22 = sadd.s32 4294967295, %s3464_s21   ;;  %s2957_s23 = sadd.s32 4294967294, %s3464_s21   ;;  %s3464_s21 = sphi %s3530_s21, %s6295_s21   ;;  %s3460_s20 = sphi %s3528_s20, %s6294_s20   ;;  %s3456_s19 = sphi %s3526_s19, %s6293_s19   ;;  %s3452_s18 = sphi %s3524_s18, %s6292_s18  }
   0x6   : > { %s3549_s24 = sadd.s32 1, %s3464_s21   ;;  %s28_s25 = sadd.s32 1, %s3460_s20 }
   0x7   : > { %s25_s26 = ssub.s32 %s3464_s21, %s3549_s24  ;;  %p35_p0 = scmp.ne.s32.totalorder %s3460_s20, %s3456_s19 }
   0x8   : > { %p26_p1 = scmp.eq.s32.totalorder %s25_s26, 0  ;;  %p36_p2 = scmp.eq.s32.totalorder %s3464_s21, 0 }
   0x9   : > { %p41_p3 = scmp.ne.s32.totalorder %s3456_s19, %s3452_s18  ;;  %p42_p4 = scmp.eq.s32.totalorder %s3545_s22, 0 }
   0xa   : > { %s3561_s27 = scalar_select %p26_p1, %s3460_s20, %s28_s25  }
   0xb   : > { %p37_p5 = por %p36_p2, %p35_p0  ;;  %p3563_p6 = por %p42_p4, %p41_p3 }
   0xc   : > { %p149_p7 = scmp.eq.s32.totalorder %s3545_s22, 1  ;;  %p155_p8 = scmp.eq.s32.totalorder %s2957_s23, 1 }
   0xd   : > { %p3168_p10 = scmp.lt.s32.totalorder %s3464_s21, 2  ;;  %s187_s6 = sand.u32 1, %s3460_s20  }
   0xe   : > { %p3570_p11 = por %p149_p7, %p35_p0  ;;  %p3574_p12 = por %p155_p8, %p41_p3 }
   0xf   : > { %s3152_s7 = smul.u32 1536, %s3464_s21  ;;  %p3585_p13 = pnand %p3168_p10, %p37_p5 }
  0x10   : > { %s6219_s29 = scalar_select %p3570_p11, 1, 0 }
  0x11   : > { %s6220_s30 = scalar_select %p3574_p12, 1, 0 }
  0x12   : > { %s3151_s8 = smul.u32 96, %s187_s6  ;;  %s3583_s11 = scalar_lea.hbm %s6185_s0, %s3152_s7 }
  0x13   : > { %s3591_s15 = scalar_lea.sflag [#allocation3], %s187_s6  ;;  %s3368_s16 = scalar_lea.hbm %s3583_s11, 1536 }
  0x14   : > { %s191_s13 = scalar_lea.vmem [#allocation2], %s3151_s8  ;;  %p3369_p0 = scmp.ne.s32.totalorder %s3583_s11, %s3368_s16 }
  0x15   : > { %s199_s14 = sshll.u32 %s191_s13, 4  ;;  %p3370_p1 = pneg %p3585_p13  ;;  %s3589_s14 = int_to_ptr.vmem [resolvable:$true] %s199_s14 }
  0x16   : > { %s3373_s25 = scalar_lea.hbm %s6185_s0, 3072  ;;  %p3374_p4 = scmp.lt.u32.totalorder %s3583_s11, %s6185_s0 }
  0x17   : > { %p3371_p2 = pnand %p3370_p1, %p3369_p0  ;;  %p3375_p5 = scmp.lt.u32.totalorder %s3373_s25, %s3368_s16 }
  0x18   : > { %p3377_p8 = scmp.lt.u32.totalorder %s3368_s16, %s3583_s11 }
  0x19   : > { %p3372_p3 = pneg %p3371_p2  ;;  %p3376_p7 = por %p3375_p5, %p3374_p4 }
  0x1b   : > { %p3378_p10 = por %p3377_p8, %p3376_p7 }
  0x1d   : > { %p3379_p9 = pnand %p3378_p10, %p3372_p3 }
  0x1f   : > { %3382 = shalt.err (!%p3379_p9)
}
  0x20   : > { %s3383_s6 = scalar_lea.vmem %s3589_s14, 1536  ;;  %s3466_s8 = smov [#allocation2]  }
  0x21   : > { %p3384_p0 = scmp.ne.s32.totalorder %s3589_s14, %s3383_s6  ;;  %s3388_s9 = sshll.u32 %s3466_s8, 4  ;;  %s3389_s9 = int_to_ptr.vmem [resolvable:$false] %s3388_s9 }
  0x22   : > { %s3390_s10 = scalar_lea.vmem %s3389_s9, 3072  ;;  %p3391_p11 = scmp.lt.s32.totalorder %s3589_s14, %s3389_s9 }
  0x23   : > { %p3386_p2 = pnand %p3384_p0, %p3370_p1  ;;  %p3392_p4 = scmp.lt.s32.totalorder %s3390_s10, %s3383_s6 }
  0x25   : > { %p3387_p12 = pneg %p3386_p2  ;;  %p3393_p5 = por %p3392_p4, %p3391_p11 }
  0x27   : > { %p3394_p7 = pnand %p3393_p5, %p3387_p12 }
  0x29   : > { %3397 = shalt.err (!%p3394_p7)
}
  0x2a   : > { %s3467_s13 = smov 384   ;;  %s3468_s16 = smov 24  }
  0x2b   : > { %3163 = dma.hbm_to_vmem [thread:$0]  (!%p3585_p13), %s3583_s11, 1536, %s3589_s14, %s3591_s15, %s3467_s13, %s3467_s13, %s3468_s16  }
  0x2c   : > { %p2963_p9 = scmp.ge.s32.totalorder %s3464_s21, 1  ;;  %p207_p1 = scmp.lt.s32.totalorder %s3464_s21, 3 }
  0x2e   : > { %p208_p3 = pnand %p2963_p9, %p207_p1 }
  0x30   : > { %211 = sbr.rel (%p208_p3) target bundleno = 1093 (0x445), region = 40 }
  0x37   : > { %s3622_s17 = sand.u32 1, %s3456_s19  }
  0x38   : > { %s3153_s23 = smul.u32 96, %s3622_s17  ;;  %s214_s25 = scalar_lea.sflag [#allocation3], %s3622_s17 }
  0x3a   : > { %s3626_s26 = scalar_lea.vmem [#allocation2], %s3153_s23 }
  0x3b   : > { %3443 = dma.done.wait (%p3563_p6), %s214_s25, 1536  }
  0x3c   : > { %3445 = vsyncadd (%p3563_p6), %s214_s25, 4294965760  ;;  %v3469_v0 = vmov 0   ;;  %v3633_v1 = vld [vmem:[%s3626_s26 + $0x28] sm:$0xff]  ;;  %v2964_v2 = vld [vmem:[%s3626_s26 + $0x18] sm:$0xff]  ;;  %s3470_s11 = smov 19   ;;  %s3471_s12 = smov 18  }
  0x3d   : > { %3229 = vset.pattern.permute.xlu1 %v3469_v0  ;;  %3228 = vset.pattern.permute.xlu0 %v3469_v0  ;;  %v2965_v3 = vld [vmem:[%s3626_s26 + $0x20] sm:$0xff]  ;;  %s3472_s28 = smov 17   ;;  %s3473_s14 = smov 1   ;;  %v252_v4 = vld [vmem:[%s6187_s2 + $0x8] sm:$0xff]  ;;  %v253_v10 = vld [vmem:[%s6187_s2 + $0x10] sm:$0xff]  ;;  %vm274_vm0 = vcmask 154624  }
  0x3e   : > { %272 = vrot.lane.b32.xlu1 %v3633_v1, %s3470_s11  ;;  %268 = vrot.lane.b32.xlu0 %v2964_v2, %s3470_s11  ;;  %s3474_s15 = smov 127   ;;  %s3475_s7 = smov 111   ;;  %v251_v5 = vld [vmem:[%s6187_s2] sm:$0xff]  ;;  %v3679_v7 = vld [vmem:[%s3626_s26 + $0x8] sm:$0xff]  ;;  %v3478_v19 = vmov 0.0|0.0   ;;  %vm289_vm1 = vcmask 146432  }
  0x3f   : > { %s3476_s6 = smov 110   ;;  %s3477_s8 = smov 109   ;;  %v3676_v6 = vld [vmem:[%s3626_s26] sm:$0xff]  ;;  %v329_v9 = vmul.f32 %v2965_v3, %v3679_v7  ;;  %v254_v11 = vld [vmem:[%s6187_s2 + $0x18] sm:$0xff]  ;;  %v3694_v14 = vld [vmem:[%s3626_s26 + $0x50] sm:$0xff]  ;;  %3111 = vmatprep.subr.bf16.mxu1 %v3478_v19  ;;  %vm304_vm2 = vcmask 138240  }
  0x40   : > { %v328_v8 = vmul.f32 %v2964_v2, %v3676_v6  ;;  %v255_v13 = vld [vmem:[%s6187_s2 + $0x20] sm:$0xf]  ;;  %v3697_v15 = vld [vmem:[%s3626_s26 + $0x48] sm:$0xff]  ;;  %v3704_v16 = vld [vmem:[%s3626_s26 + $0x58] sm:$0xff]  ;;  %vm319_vm3 = vcmask 7168   ;;  %vm337_vm4 = vcmask 1039360  }
  0x41   : > { %v3752_v20 = vld [vmem:[%s3626_s26 + $0x10] sm:$0xff]  ;;  %vm352_vm5 = vcmask 908288   ;;  %vm367_vm6 = vcmask 900096   ;;  %vm3480_vm7 = vmmov 0   ;;  %vm382_vm8 = vcmask 891904   ;;  %s3481_s13 = smov 2  }
  0x42   : > { %283 = vrot.lane.b32.xlu1 %v2964_v2, %s3471_s12  ;;  %270 = vrot.lane.b32.xlu0 %v2965_v3, %s3470_s11  ;;  %v3230_v12 = vpack.i.bf16 %v329_v9, %v328_v8  ;;  %v330_v59 = vmul.f32 %v3633_v1, %v3752_v20  ;;  %vm542_vm9 = vcmask 588800   ;;  %vm764_vm10 = vcmask 1041408   ;;  %s3482_s16 = smov 20   ;;  %s3485_s23 = smov 38  }
  0x43   : > { %vm768_vm11 = vcmask 1043456   ;;  %vm772_vm12 = vcmask 1045504   ;;  %vm931_vm13 = vcmask 15360   ;;  %vm1212_vm14 = vcmask 162816   ;;  %s3490_s25 = smov 90   ;;  %p6289_p11 = scmp.ne.s32.totalorder %s6219_s29, 0 }
  0x44   : > { %vm1321_vm15 = vcmask 293888  }
  0x46   : > { %287 = vrot.lane.b32.xlu1 %v3633_v1, %s3471_s12  ;;  %285 = vrot.lane.b32.xlu0 %v2965_v3, %s3471_s12 }
  0x4a   : > { %300 = vrot.lane.b32.xlu1 %v2965_v3, %s3472_s28  ;;  %298 = vrot.lane.b32.xlu0 %v2964_v2, %s3472_s28 }
  0x4e   : > { %313 = vrot.lane.b32.xlu1 %v2964_v2, %s3473_s14  ;;  %302 = vrot.lane.b32.xlu0 %v3633_v1, %s3472_s28 }
  0x52   : > { %317 = vrot.lane.b32.xlu1 %v3633_v1, %s3473_s14  ;;  %315 = vrot.lane.b32.xlu0 %v2965_v3, %s3473_s14 }
  0x56   : > { %333 = vrot.lane.b32.xlu1 %v2965_v3, %s3474_s15  ;;  %331 = vrot.lane.b32.xlu0 %v2964_v2, %s3474_s15 }
  0x5a   : > { %346 = vrot.lane.b32.xlu1 %v2964_v2, %s3475_s7  ;;  %335 = vrot.lane.b32.xlu0 %v3633_v1, %s3474_s15 }
  0x5e   : > { %350 = vrot.lane.b32.xlu1 %v3633_v1, %s3475_s7  ;;  %348 = vrot.lane.b32.xlu0 %v2965_v3, %s3475_s7 }
  0x62   : > { %363 = vrot.lane.b32.xlu1 %v2965_v3, %s3476_s6  ;;  %361 = vrot.lane.b32.xlu0 %v2964_v2, %s3476_s6 }
  0x66   : > { %376 = vrot.lane.b32.xlu1 %v2964_v2, %s3477_s8  ;;  %365 = vrot.lane.b32.xlu0 %v3633_v1, %s3476_s6 }
  0x6a   : > { %380 = vrot.lane.b32.xlu1 %v3633_v1, %s3477_s8  ;;  %378 = vrot.lane.b32.xlu0 %v2965_v3, %s3477_s8 }
  0x6e   : > { %398 = vperm.xlu1 %3229, %v252_v4   ;;  %393 = vperm.xlu0 %3228, %v251_v5  }
  0x72   : > { %403 = vperm.xlu1 %3229, %v253_v10   ;;  %408 = vperm.xlu0 %3228, %v254_v11  }
  0x76   : > { %413 = vperm.xlu1 %3229, %v255_v13   ;;  %3231 = vrot.lane.b32.xlu0 %v3230_v12, %s3477_s8 }
  0x7a   : > { %1612 = vrot.lane.b32.xlu1 %v3694_v14, %s3470_s11  ;;  %1610 = vrot.lane.b32.xlu0 %v3697_v15, %s3470_s11 }
  0x7e   : > { %1624 = vrot.lane.b32.xlu1 %v3697_v15, %s3471_s12  ;;  %1614 = vrot.lane.b32.xlu0 %v3704_v16, %s3470_s11 }
  0x82   : > { %1628 = vrot.lane.b32.xlu1 %v3704_v16, %s3471_s12  ;;  %1626 = vrot.lane.b32.xlu0 %v3694_v14, %s3471_s12 }
  0x86   : > { %1640 = vrot.lane.b32.xlu1 %v3694_v14, %s3472_s28  ;;  %1638 = vrot.lane.b32.xlu0 %v3697_v15, %s3472_s28 }
  0x8a   : > { %1652 = vrot.lane.b32.xlu1 %v3697_v15, %s3473_s14  ;;  %1642 = vrot.lane.b32.xlu0 %v3704_v16, %s3472_s28  ;;  %s3483_s28 = smov 36  }
  0x8e   : > { %1656 = vrot.lane.b32.xlu1 %v3704_v16, %s3473_s14  ;;  %1654 = vrot.lane.b32.xlu0 %v3694_v14, %s3473_s14 }
  0x92   : > { %1673 = vrot.lane.b32.xlu1 %v3704_v16, %s3474_s15  ;;  %1671 = vrot.lane.b32.xlu0 %v3694_v14, %s3474_s15 }
  0x96   : > { %1685 = vrot.lane.b32.xlu1 %v3694_v14, %s3475_s7  ;;  %1669 = vrot.lane.b32.xlu0 %v3697_v15, %s3474_s15 }
  0x9a   : > { %1699 = vrot.lane.b32.xlu1 %v3694_v14, %s3476_s6  ;;  %1687 = vrot.lane.b32.xlu0 %v3704_v16, %s3475_s7 }
  0x9e   : > { %1683 = vrot.lane.b32.xlu1 %v3697_v15, %s3475_s7  ;;  %1701 = vrot.lane.b32.xlu0 %v3704_v16, %s3476_s6  ;;  %s3484_s7 = smov 37  }
  0xa2   : > { %1697 = vrot.lane.b32.xlu0 %v3697_v15, %s3476_s6  ;;  %1713 = vrot.lane.b32.xlu1 %v3694_v14, %s3477_s8 }
  0xa6   : > { %1715 = vrot.lane.b32.xlu0 %v3704_v16, %s3477_s8  ;;  %1711 = vrot.lane.b32.xlu1 %v3697_v15, %s3477_s8 }
  0xb0   : > { %v273_v17 = vpop.permute.xlu1 %272  ;;  %v269_v18 = vpop.permute.xlu0 %268 }
  0xb1   : > { %v280_v26 = vmul.f32 %v269_v18, %v3676_v6 }
  0xb4   : > { %v284_v21 = vpop.permute.xlu1 %283  ;;  %v271_v22 = vpop.permute.xlu0 %270 }
  0xb5   : > { %v295_v23 = vmul.f32 %v284_v21, %v3676_v6  ;;  %v275_v24 = vsel %vm274_vm0, %v269_v18, %v271_v22  ;;  %v276_v25 = vsel %vm274_vm0, %v271_v22, %v273_v17 }
  0xb6   : > { %v281_v27 = vmul.f32 %v275_v24, %v3679_v7  ;;  %v282_v28 = vmul.f32 %v276_v25, %v3752_v20 }
  0xb8   : > { %v288_v29 = vpop.permute.xlu1 %287  ;;  %v286_v30 = vpop.permute.xlu0 %285  ;;  %v3240_v31 = vpack.i.bf16 %v295_v23, %v282_v28  ;;  %v3235_v32 = vpack.i.bf16 %v281_v27, %v280_v26  ;;  %v3479_v27 = vmov 0.0  }
  0xb9   : > { %v290_v33 = vsel %vm289_vm1, %v284_v21, %v286_v30  ;;  %v291_v34 = vsel %vm289_vm1, %v286_v30, %v288_v29  ;;  %622 = vmatprep.mubr.f32.mxu0 %v3479_v27  ;;  %3047 = vmatprep.mubr.msk.f32.mxu1 %vm3480_vm7, %v3479_v27 }
  0xba   : > { %v296_v35 = vmul.f32 %v290_v33, %v3679_v7  ;;  %v297_v36 = vmul.f32 %v291_v34, %v3752_v20  ;;  %3241 = vrot.lane.b32.xlu1 %v3240_v31, %s3477_s8  ;;  %3236 = vrot.lane.b32.xlu0 %v3235_v32, %s3477_s8 }
  0xbc   : > { %v301_v37 = vpop.permute.xlu1 %300  ;;  %v299_v38 = vpop.permute.xlu0 %298  ;;  %v3245_v39 = vpack.i.bf16 %v297_v36, %v296_v35 }
  0xbd   : > { %v305_v40 = vsel %vm304_vm2, %v299_v38, %v301_v37  ;;  %v310_v41 = vmul.f32 %v299_v38, %v3676_v6 }
  0xbe   : > { %v311_v42 = vmul.f32 %v305_v40, %v3679_v7  ;;  %3246 = vrot.lane.b32.xlu0 %v3245_v39, %s3477_s8 }
  0xc0   : > { %v314_v43 = vpop.permute.xlu1 %313  ;;  %v303_v44 = vpop.permute.xlu0 %302  ;;  %v3250_v45 = vpack.i.bf16 %v311_v42, %v310_v41 }
  0xc1   : > { %v325_v46 = vmul.f32 %v314_v43, %v3676_v6  ;;  %v306_v47 = vsel %vm304_vm2, %v301_v37, %v303_v44 }
  0xc2   : > { %v312_v48 = vmul.f32 %v306_v47, %v3752_v20  ;;  %3251 = vrot.lane.b32.xlu1 %v3250_v45, %s3477_s8  ;;  %v3826_v45 = vld [vmem:[%s3626_s26 + $0x38] sm:$0xff] }
  0xc4   : > { %v318_v49 = vpop.permute.xlu1 %317  ;;  %v316_v50 = vpop.permute.xlu0 %315  ;;  %v3255_v51 = vpack.i.bf16 %v325_v46, %v312_v48  ;;  %v3830_v46 = vld [vmem:[%s3626_s26 + $0x40] sm:$0xff] }
  0xc5   : > { %v320_v52 = vsel %vm319_vm3, %v314_v43, %v316_v50  ;;  %v321_v53 = vsel %vm319_vm3, %v316_v50, %v318_v49 }
  0xc6   : > { %v326_v54 = vmul.f32 %v320_v52, %v3679_v7  ;;  %v327_v55 = vmul.f32 %v321_v53, %v3752_v20  ;;  %3256 = vrot.lane.b32.xlu0 %v3255_v51, %s3477_s8  ;;  %v3836_v52 = vld [vmem:[%s3626_s26 + $0x30] sm:$0xff] }
  0xc8   : > { %v334_v56 = vpop.permute.xlu1 %333  ;;  %v332_v57 = vpop.permute.xlu0 %331  ;;  %v3260_v58 = vpack.i.bf16 %v327_v55, %v326_v54 }
  0xc9   : > { %v338_v60 = vsel %vm337_vm4, %v332_v57, %v334_v56 }
  0xca   : > { %v343_v61 = vmul.f32 %v338_v60, %v3676_v6  ;;  %3261 = vrot.lane.b32.xlu1 %v3260_v58, %s3477_s8 }
  0xcc   : > { %v347_v62 = vpop.permute.xlu1 %346  ;;  %v336_v63 = vpop.permute.xlu0 %335  ;;  %v3265_v0 = vpack.i.bf16 %v343_v61, %v330_v59 }
  0xcd   : > { %v339_v2 = vsel %vm337_vm4, %v334_v56, %v336_v63  ;;  %v345_v3 = vmul.f32 %v336_v63, %v3752_v20 }
  0xce   : > { %v344_v4 = vmul.f32 %v339_v2, %v3679_v7  ;;  %3266 = vrot.lane.b32.xlu1 %v3265_v0, %s3477_s8 }
  0xd0   : > { %v351_v5 = vpop.permute.xlu1 %350  ;;  %v349_v1 = vpop.permute.xlu0 %348  ;;  %v3270_v8 = vpack.i.bf16 %v345_v3, %v344_v4 }
  0xd1   : > { %v360_v9 = vmul.f32 %v351_v5, %v3752_v20  ;;  %v354_v10 = vsel %vm352_vm5, %v349_v1, %v351_v5  ;;  %v353_v12 = vsel %vm352_vm5, %v347_v62, %v349_v1 }
  0xd2   : > { %v359_v11 = vmul.f32 %v354_v10, %v3679_v7  ;;  %3271 = vrot.lane.b32.xlu0 %v3270_v8, %s3477_s8  ;;  %v358_v22 = vmul.f32 %v353_v12, %v3676_v6 }
  0xd4   : > { %v364_v13 = vpop.permute.xlu1 %363  ;;  %v362_v17 = vpop.permute.xlu0 %361  ;;  %v3275_v18 = vpack.i.bf16 %v360_v9, %v359_v11 }
  0xd5   : > { %v368_v21 = vsel %vm367_vm6, %v362_v17, %v364_v13 }
  0xd6   : > { %v373_v23 = vmul.f32 %v368_v21, %v3676_v6  ;;  %3276 = vrot.lane.b32.xlu1 %v3275_v18, %s3477_s8  ;;  %v1667_v21 = vmul.f32 %v3694_v14, %v3826_v45 }
  0xd8   : > { %v377_v24 = vpop.permute.xlu1 %376  ;;  %v366_v25 = vpop.permute.xlu0 %365  ;;  %v3285_v26 = vpack.i.bf16 %v373_v23, %v358_v22 }
  0xd9   : > { %v369_v28 = vsel %vm367_vm6, %v364_v13, %v366_v25  ;;  %v375_v29 = vmul.f32 %v366_v25, %v3752_v20  ;;  %v1668_v25 = vmul.f32 %v3704_v16, %v3830_v46  ;;  %v1666_v16 = vmul.f32 %v3697_v15, %v3836_v52 }
  0xda   : > { %v374_v30 = vmul.f32 %v369_v28, %v3679_v7  ;;  %3286 = vrot.lane.b32.xlu1 %v3285_v26, %s3477_s8 }
  0xdc   : > { %v381_v31 = vpop.permute.xlu1 %380  ;;  %v379_v32 = vpop.permute.xlu0 %378  ;;  %v3280_v33 = vpack.i.bf16 %v375_v29, %v374_v30 }
  0xdd   : > { %v390_v34 = vmul.f32 %v381_v31, %v3752_v20  ;;  %v384_v35 = vsel %vm382_vm8, %v379_v32, %v381_v31  ;;  %v383_v37 = vsel %vm382_vm8, %v377_v24, %v379_v32 }
  0xde   : > { %3281 = vrot.lane.b32.xlu0 %v3280_v33, %s3477_s8  ;;  %v389_v36 = vmul.f32 %v384_v35, %v3679_v7  ;;  %v388_v38 = vmul.f32 %v383_v37, %v3676_v6  ;;  %v3320_v33 = vpack.i.bf16 %v1668_v25, %v1667_v21 }
  0xdf   : > { %495 = vrot.lane.b32.xlu1 %v390_v34, %s3477_s8 }
  0xe2   : > { %493 = vrot.lane.b32.xlu0 %v389_v36, %s3477_s8 }
  0xe6   : > { %491 = vrot.lane.b32.xlu0 %v388_v38, %s3477_s8 }
  0xed   : > { %v3813_v39 = vpop.permute.xlu1 %398  ;;  %v3815_v20 = vpop.permute.xlu0 %393 }
  0xf1   : > { %v3817_v40 = vpop.permute.xlu1 %403  ;;  %v3819_v41 = vpop.permute.xlu0 %408 }
  0xf5   : > { %v3821_v42 = vpop.permute.xlu1 %413  ;;  %v3823_v7 = vpop.permute.xlu0 %3231 }
  0xf9   : > { %v1613_v43 = vpop.permute.xlu1 %1612  ;;  %v1611_v44 = vpop.permute.xlu0 %1610 }
  0xfa   : > { %v1616_v6 = vsel %vm274_vm0, %v1611_v44, %v1613_v43  ;;  %v1621_v59 = vmul.f32 %v3836_v52, %v1611_v44 }
  0xfb   : > { %v1622_v50 = vmul.f32 %v3826_v45, %v1616_v6 }
  0xfd   : > { %v1625_v47 = vpop.permute.xlu1 %1624  ;;  %v1615_v48 = vpop.permute.xlu0 %1614 }
  0xfe   : > { %v1617_v49 = vsel %vm274_vm0, %v1613_v43, %v1615_v48  ;;  %v1635_v53 = vmul.f32 %v3836_v52, %v1625_v47 }
  0xff   : > { %v1623_v51 = vmul.f32 %v3830_v46, %v1617_v49 }
 0x100   : > { %v3300_v0 = vpack.i.bf16 %v1635_v53, %v1621_v59 }
 0x101   : > { %v1629_v54 = vpop.permute.xlu1 %1628  ;;  %v1627_v55 = vpop.permute.xlu0 %1626  ;;  %v3290_v56 = vpack.i.bf16 %v1623_v51, %v1622_v50 }
 0x102   : > { %v1630_v57 = vsel %vm289_vm1, %v1625_v47, %v1627_v55  ;;  %v1631_v58 = vsel %vm289_vm1, %v1627_v55, %v1629_v54 }
 0x103   : > { %v1636_v60 = vmul.f32 %v3826_v45, %v1630_v57  ;;  %v1637_v61 = vmul.f32 %v3830_v46, %v1631_v58  ;;  %3291 = vrot.lane.b32.xlu1 %v3290_v56, %s3477_s8 }
 0x105   : > { %v1641_v62 = vpop.permute.xlu1 %1640  ;;  %v1639_v63 = vpop.permute.xlu0 %1638  ;;  %v3295_v2 = vpack.i.bf16 %v1637_v61, %v1636_v60 }
 0x106   : > { %v1644_v3 = vsel %vm304_vm2, %v1639_v63, %v1641_v62  ;;  %v1649_v22 = vmul.f32 %v3836_v52, %v1639_v63 }
 0x107   : > { %3301 = vrot.lane.b32.xlu1 %v3300_v0, %s3477_s8  ;;  %3296 = vrot.lane.b32.xlu0 %v3295_v2, %s3477_s8  ;;  %v1650_v8 = vmul.f32 %v3826_v45, %v1644_v3 }
 0x109   : > { %v1653_v4 = vpop.permute.xlu1 %1652  ;;  %v1643_v5 = vpop.permute.xlu0 %1642 }
 0x10a   : > { %v1645_v1 = vsel %vm304_vm2, %v1641_v62, %v1643_v5  ;;  %v1663_v10 = vmul.f32 %v3836_v52, %v1653_v4  ;;  %vm1409_vm2 = vcmask 302080  }
 0x10b   : > { %v1651_v9 = vmul.f32 %v3830_v46, %v1645_v1 }
 0x10c   : > { %v3315_v29 = vpack.i.bf16 %v1663_v10, %v1649_v22 }
 0x10d   : > { %v1657_v11 = vpop.permute.xlu1 %1656  ;;  %v1655_v12 = vpop.permute.xlu0 %1654  ;;  %v3305_v13 = vpack.i.bf16 %v1651_v9, %v1650_v8 }
 0x10e   : > { %v1658_v17 = vsel %vm319_vm3, %v1653_v4, %v1655_v12  ;;  %v1659_v18 = vsel %vm319_vm3, %v1655_v12, %v1657_v11  ;;  %v256_v11 = vld [vmem:[%s6188_s3] sm:$0xff] }
 0x10f   : > { %v1664_v23 = vmul.f32 %v3826_v45, %v1658_v17  ;;  %v1665_v24 = vmul.f32 %v3830_v46, %v1659_v18  ;;  %3306 = vrot.lane.b32.xlu0 %v3305_v13, %s3477_s8 }
 0x111   : > { %v1674_v26 = vpop.permute.xlu1 %1673  ;;  %v1672_v28 = vpop.permute.xlu0 %1671  ;;  %v3310_v30 = vpack.i.bf16 %v1665_v24, %v1664_v23 }
 0x112   : > { %v1682_v31 = vmul.f32 %v3830_v46, %v1674_v26  ;;  %v1676_v32 = vsel %vm337_vm4, %v1672_v28, %v1674_v26 }
 0x113   : > { %v1681_v14 = vmul.f32 %v3826_v45, %v1676_v32  ;;  %3316 = vrot.lane.b32.xlu0 %v3315_v29, %s3477_s8  ;;  %3311 = vrot.lane.b32.xlu1 %v3310_v30, %s3477_s8 }
 0x115   : > { %v1686_v34 = vpop.permute.xlu1 %1685  ;;  %v1670_v35 = vpop.permute.xlu0 %1669  ;;  %v3325_v36 = vpack.i.bf16 %v1682_v31, %v1681_v14 }
 0x116   : > { %v1675_v37 = vsel %vm337_vm4, %v1670_v35, %v1672_v28 }
 0x117   : > { %v1680_v38 = vmul.f32 %v3836_v52, %v1675_v37  ;;  %3321 = vrot.lane.b32.xlu1 %v3320_v33, %s3477_s8  ;;  %3326 = vrot.lane.b32.xlu0 %v3325_v36, %s3477_s8 }
 0x119   : > { %v1700_v43 = vpop.permute.xlu1 %1699  ;;  %v1688_v44 = vpop.permute.xlu0 %1687  ;;  %v3330_v6 = vpack.i.bf16 %v1680_v38, %v1666_v16 }
 0x11a   : > { %v1690_v47 = vsel %vm352_vm5, %v1686_v34, %v1688_v44  ;;  %v1696_v48 = vmul.f32 %v3830_v46, %v1688_v44 }
 0x11b   : > { %v1695_v49 = vmul.f32 %v3826_v45, %v1690_v47  ;;  %3331 = vrot.lane.b32.xlu1 %v3330_v6, %s3477_s8 }
 0x11d   : > { %v1684_v15 = vpop.permute.xlu1 %1683  ;;  %v1702_v50 = vpop.permute.xlu0 %1701  ;;  %v3335_v51 = vpack.i.bf16 %v1696_v48, %v1695_v49 }
 0x11e   : > { %v1704_v53 = vsel %vm367_vm6, %v1700_v43, %v1702_v50  ;;  %v1710_v54 = vmul.f32 %v3830_v46, %v1702_v50  ;;  %v1689_v56 = vsel %vm352_vm5, %v1684_v15, %v1686_v34  ;;  %v3234_v15 = vunpack.i.h.bf16 %v3823_v7 }
 0x11f   : > { %v1709_v55 = vmul.f32 %v3826_v45, %v1704_v53  ;;  %3336 = vrot.lane.b32.xlu0 %v3335_v51, %s3477_s8  ;;  %v1694_v61 = vmul.f32 %v3836_v52, %v1689_v56  ;;  %v3233_v50 = vunpack.i.l.bf16 %v3823_v7  ;;  %vm1518_vm5 = vcmask 310272  }
 0x121   : > { %v1698_v57 = vpop.permute.xlu0 %1697  ;;  %v1714_v58 = vpop.permute.xlu1 %1713  ;;  %v3340_v59 = vpack.i.bf16 %v1710_v54, %v1709_v55 }
 0x122   : > { %v1703_v60 = vsel %vm367_vm6, %v1698_v57, %v1700_v43  ;;  %v505_v57 = vsel %vm382_vm8, %v3233_v50, %v3234_v15 }
 0x123   : > { %v1708_v62 = vmul.f32 %v3836_v52, %v1703_v60  ;;  %3341 = vrot.lane.b32.xlu1 %v3340_v59, %s3477_s8 }
 0x125   : > { %v1716_v63 = vpop.permute.xlu0 %1715  ;;  %v1712_v0 = vpop.permute.xlu1 %1711  ;;  %v3345_v2 = vpack.i.bf16 %v1708_v62, %v1694_v61 }
 0x126   : > { %v1718_v3 = vsel %vm382_vm8, %v1714_v58, %v1716_v63  ;;  %v1724_v4 = vmul.f32 %v3830_v46, %v1716_v63  ;;  %v1717_v1 = vsel %vm382_vm8, %v1712_v0, %v1714_v58 }
 0x127   : > { %3346 = vrot.lane.b32.xlu0 %v3345_v2, %s3477_s8  ;;  %v1723_v5 = vmul.f32 %v3826_v45, %v1718_v3  ;;  %v1722_v8 = vmul.f32 %v3836_v52, %v1717_v1  ;;  %v257_v45 = vld [vmem:[%s6189_s4] sm:$0xff] }
 0x129   : > { %1802 = vrot.lane.b32.xlu1 %v1723_v5, %s3477_s8 }
 0x12b   : > { %1804 = vrot.lane.b32.xlu0 %v1724_v4, %s3477_s8 }
 0x12c   : > { %v3242_v9 = vpop.permute.xlu1 %3241  ;;  %v3237_v10 = vpop.permute.xlu0 %3236 }
 0x12d   : > { %1800 = vrot.lane.b32.xlu1 %v1722_v8, %s3477_s8  ;;  %v3239_v46 = vunpack.i.h.bf16 %v3237_v10  ;;  %v3243_v12 = vunpack.i.l.bf16 %v3242_v9  ;;  %v3238_v13 = vunpack.i.l.bf16 %v3237_v10  ;;  %v3244_v52 = vunpack.i.h.bf16 %v3242_v9 }
 0x12f   : > { %1581 = vperm.xlu0 %3228, %v256_v11   ;;  %v498_v22 = vsel %vm382_vm8, %v3239_v46, %v3243_v12  ;;  %v497_v25 = vsel %vm382_vm8, %v3238_v13, %v3239_v46 }
 0x130   : > { %v3247_v17 = vpop.permute.xlu0 %3246 }
 0x131   : > { %v3248_v18 = vunpack.i.l.bf16 %v3247_v17  ;;  %1589 = vperm.xlu1 %3229, %v257_v45   ;;  %v3249_v21 = vunpack.i.h.bf16 %v3247_v17 }
 0x133   : > { %v3112_v23 = vpack.c.bf16 %v3249_v21, %v3243_v12  ;;  %v500_v24 = vsel %vm382_vm8, %v3248_v18, %v3249_v21  ;;  %v499_v26 = vsel %vm382_vm8, %v3244_v52, %v3248_v18 }
 0x134   : > { %v3095_v28 = vpack.c.bf16 %v500_v24, %v498_v22  ;;  %v3097_v29 = vpack.c.bf16 %v499_v26, %v497_v25  ;;  %v3252_v30 = vpop.permute.xlu1 %3251  ;;  %v3927_v22 = vld [vmem:[%s6186_s1] sm:$0xff]  ;;  %v3938_v25 = vld [vmem:[%s6186_s1 + $0x8] sm:$0xff]  ;;  %v3950_v26 = vld [vmem:[%s6186_s1 + $0x10] sm:$0xff] }
 0x135   : > { %3113 = vmatpush3.bf16.msra.mxu1 %v3112_v23  ;;  %v3254_v32 = vunpack.i.h.bf16 %v3252_v30  ;;  %v3253_v14 = vunpack.i.l.bf16 %v3252_v30 }
 0x136   : > { %3096 = vmatprep.subr.bf16.mxu0 %v3095_v28  ;;  %3114 = vmatprep.subr.bf16.mxu1 %v3478_v19  ;;  %v3962_v28 = vld [vmem:[%s6186_s1 + $0x18] sm:$0xff] }
 0x137   : > { %3098 = vmatpush1.bf16.msra.mxu0 %v3097_v29  ;;  %v501_v37 = vsel %vm382_vm8, %v3253_v14, %v3254_v32  ;;  %v3974_v29 = vld [vmem:[%s6186_s1 + $0x20] sm:$0xf] }
 0x138   : > { %v3257_v31 = vpop.permute.xlu0 %3256 }
 0x139   : > { %v3258_v33 = vunpack.i.l.bf16 %v3257_v31  ;;  %v3259_v35 = vunpack.i.h.bf16 %v3257_v31 }
 0x13b   : > { %v502_v43 = vsel %vm382_vm8, %v3254_v32, %v3258_v33 }
 0x13c   : > { %v3262_v34 = vpop.permute.xlu1 %3261 }
 0x13d   : > { %v3264_v36 = vunpack.i.h.bf16 %v3262_v34  ;;  %v3263_v16 = vunpack.i.l.bf16 %v3262_v34 }
 0x13f   : > { %v3115_v38 = vpack.c.bf16 %v3264_v36, %v3258_v33  ;;  %v504_v44 = vsel %vm382_vm8, %v3263_v16, %v3264_v36  ;;  %v503_v6 = vsel %vm382_vm8, %v3259_v35, %v3263_v16 }
 0x140   : > { %v3267_v47 = vpop.permute.xlu1 %3266  ;;  %v3099_v48 = vpack.c.bf16 %v504_v44, %v502_v43  ;;  %v3101_v49 = vpack.c.bf16 %v503_v6, %v501_v37 }
 0x141   : > { %3116 = vmatpush3.bf16.msra.mxu1 %v3115_v38  ;;  %v3268_v51 = vunpack.i.l.bf16 %v3267_v47  ;;  %v3269_v54 = vunpack.i.h.bf16 %v3267_v47 }
 0x142   : > { %3100 = vmatprep.subr.bf16.mxu0 %v3099_v48  ;;  %3117 = vmatprep.subr.bf16.mxu1 %v3478_v19 }
 0x143   : > { %3102 = vmatpush1.bf16.msra.mxu0 %v3101_v49  ;;  %v506_v59 = vsel %vm382_vm8, %v3234_v15, %v3268_v51 }
 0x144   : > { %v3272_v53 = vpop.permute.xlu0 %3271 }
 0x145   : > { %v3274_v55 = vunpack.i.h.bf16 %v3272_v53  ;;  %v3273_v56 = vunpack.i.l.bf16 %v3272_v53 }
 0x147   : > { %v3118_v58 = vpack.c.bf16 %v3274_v55, %v3268_v51  ;;  %v508_v60 = vsel %vm382_vm8, %v3273_v56, %v3274_v55  ;;  %v507_v61 = vsel %vm382_vm8, %v3269_v54, %v3273_v56 }
 0x148   : > { %v3277_v62 = vpop.permute.xlu1 %3276  ;;  %v3103_v7 = vpack.c.bf16 %v508_v60, %v506_v59  ;;  %v3105_v63 = vpack.c.bf16 %v507_v61, %v505_v57 }
 0x149   : > { %3119 = vmatpush3.bf16.msra.mxu1 %v3118_v58  ;;  %v3279_v2 = vunpack.i.h.bf16 %v3277_v62  ;;  %v3278_v3 = vunpack.i.l.bf16 %v3277_v62 }
 0x14a   : > { %3104 = vmatprep.subr.bf16.mxu0 %v3103_v7  ;;  %3120 = vmatprep.subr.bf16.mxu1 %v3478_v19 }
 0x14b   : > { %3106 = vmatpush1.bf16.msra.mxu0 %v3105_v63  ;;  %v510_v10 = vsel %vm382_vm8, %v3278_v3, %v3279_v2 }
 0x14c   : > { %v3287_v0 = vpop.permute.xlu1 %3286 }
 0x14d   : > { %v3288_v4 = vunpack.i.l.bf16 %v3287_v0  ;;  %v3289_v1 = vunpack.i.h.bf16 %v3287_v0 }
 0x14f   : > { %v509_v45 = vsel %vm382_vm8, %v3288_v4, %v3278_v3 }
 0x150   : > { %v3282_v5 = vpop.permute.xlu0 %3281 }
 0x151   : > { %v3284_v8 = vunpack.i.h.bf16 %v3282_v5  ;;  %v3283_v9 = vunpack.i.l.bf16 %v3282_v5  ;;  %v496_v13 = vpop.permute.xlu1 %495 }
 0x153   : > { %v3121_v11 = vpack.c.bf16 %v3284_v8, %v3279_v2  ;;  %v512_v46 = vsel %vm382_vm8, %v3283_v9, %v3284_v8  ;;  %v511_v12 = vsel %vm382_vm8, %v3289_v1, %v3283_v9 }
 0x154   : > { %v494_v17 = vpop.permute.xlu0 %493  ;;  %v3107_v52 = vpack.c.bf16 %v512_v46, %v510_v10  ;;  %v3109_v18 = vpack.c.bf16 %v511_v12, %v509_v45 }
 0x155   : > { %3122 = vmatpush3.bf16.msra.mxu1 %v3121_v11  ;;  %v514_v21 = vsel %vm382_vm8, %v494_v17, %v496_v13 }
 0x156   : > { %3108 = vmatprep.subr.bf16.mxu0 %v3107_v52  ;;  %3045 = vmatprep.subr.mxu1 %v3479_v27 }
 0x157   : > { %3110 = vmatpush1.bf16.msra.mxu0 %v3109_v18 }
 0x158   : > { %v492_v23 = vpop.permute.xlu0 %491  ;;  %574 = vmatprep.subr.mxu0 %v514_v21 }
 0x159   : > { %3046 = vmatpush3.msra.mxu1 %v496_v13  ;;  %v513_v24 = vsel %vm382_vm8, %v492_v23, %v494_v17 }
 0x15a   : > { %3048 = vmatmul.mubr.msk.f32.vlgmr.msra.gmra.mrb[0].mxu1 %vm542_vm9, %v3927_v22  ;;  %3139 = vmatprep.subr.bf16.mxu1 %v3478_v19 }
 0x15b   : > { %575 = vmatpush1.msra.mxu0 %v513_v24  ;;  %3050 = vmatprep.mubr.msk.f32.mxu1 %vm3480_vm7, %v3479_v27 }
 0x15c   : > { %2967 = vmatmul.mubr.msk.f32.vlgmr.msra.gmra.mrb[0].mxu0 %vm542_vm9, %v3927_v22 }
 0x15d   : > { %628 = vmatprep.mubr.f32.mxu0 %v3479_v27 }
 0x15e   : > { %3051 = vmatmul.mubr.msk.f32.gmra.mrb[2].mxu1 %vm542_vm9, %v3938_v25 }
 0x15f   : > { %3053 = vmatprep.mubr.msk.f32.mxu1 %vm3480_vm7, %v3479_v27 }
 0x160   : > { %2968 = vmatmul.mubr.msk.f32.gmra.mrb[2].mxu0 %vm542_vm9, %v3938_v25 }
 0x161   : > { %634 = vmatprep.mubr.f32.mxu0 %v3479_v27 }
 0x162   : > { %3054 = vmatmul.mubr.msk.f32.gmra.mrb[4].mxu1 %vm542_vm9, %v3950_v26 }
 0x163   : > { %3056 = vmatprep.mubr.msk.f32.mxu1 %vm3480_vm7, %v3479_v27 }
 0x164   : > { %2969 = vmatmul.mubr.msk.f32.gmra.mrb[4].mxu0 %vm542_vm9, %v3950_v26 }
 0x165   : > { %640 = vmatprep.mubr.f32.mxu0 %v3479_v27 }
 0x166   : > { %3057 = vmatmul.mubr.msk.f32.gmra.mrb[6].mxu1 %vm542_vm9, %v3962_v28 }
 0x167   : > { %3059 = vmatprep.mubr.msk.f32.mxu1 %vm3480_vm7, %v3479_v27 }
 0x168   : > { %2970 = vmatmul.mubr.msk.f32.gmra.mrb[6].mxu0 %vm542_vm9, %v3962_v28 }
 0x169   : > { %646 = vmatprep.mubr.f32.mxu0 %v3479_v27 }
 0x16a   : > { %3060 = vmatmul.mubr.msk.f32.gmra.mrb[8].mxu1 %vm542_vm9, %v3974_v29 }
 0x16b   : > { %3080 = vmatprep.mubr.msk.f32.mxu1 %vm3480_vm7, %v3479_v27 }
 0x16c   : > { %2971 = vmatmul.mubr.msk.f32.gmra.mrb[8].mxu0 %vm542_vm9, %v3974_v29 }
 0x16d   : > { %1915 = vmatprep.mubr.f32.mxu0 %v3479_v27 }
 0x175   : > { %v3292_v30 = vpop.permute.xlu1 %3291 }
 0x176   : > { %v3294_v31 = vunpack.i.h.bf16 %v3292_v30  ;;  %v3293_v32 = vunpack.i.l.bf16 %v3292_v30 }
 0x178   : > { %v1807_v37 = vsel %vm382_vm8, %v3293_v32, %v3294_v31 }
 0x179   : > { %v3302_v14 = vpop.permute.xlu1 %3301  ;;  %v3297_v33 = vpop.permute.xlu0 %3296 }
 0x17a   : > { %v3304_v34 = vunpack.i.h.bf16 %v3302_v14  ;;  %v3303_v35 = vunpack.i.l.bf16 %v3302_v14  ;;  %v3299_v36 = vunpack.i.h.bf16 %v3297_v33  ;;  %v3298_v16 = vunpack.i.l.bf16 %v3297_v33 }
 0x17c   : > { %v1806_v38 = vsel %vm382_vm8, %v3303_v35, %v3293_v32  ;;  %v3140_v43 = vpack.c.bf16 %v3299_v36, %v3294_v31  ;;  %v1808_v44 = vsel %vm382_vm8, %v3304_v34, %v3298_v16  ;;  %v1809_v6 = vsel %vm382_vm8, %v3298_v16, %v3299_v36 }
 0x17d   : > { %v3123_v47 = vpack.c.bf16 %v1809_v6, %v1807_v37  ;;  %v3125_v48 = vpack.c.bf16 %v1808_v44, %v1806_v38 }
 0x17e   : > { %3141 = vmatpush3.bf16.msra.mxu1 %v3140_v43 }
 0x17f   : > { %3124 = vmatprep.subr.bf16.mxu0 %v3123_v47  ;;  %3142 = vmatprep.subr.bf16.mxu1 %v3478_v19 }
 0x180   : > { %3126 = vmatpush1.bf16.msra.mxu0 %v3125_v48 }
 0x181   : > { %v3307_v49 = vpop.permute.xlu0 %3306 }
 0x182   : > { %v3309_v15 = vunpack.i.h.bf16 %v3307_v49  ;;  %v3308_v50 = vunpack.i.l.bf16 %v3307_v49 }
 0x184   : > { %v1811_v58 = vsel %vm382_vm8, %v3308_v50, %v3309_v15 }
 0x185   : > { %v3312_v51 = vpop.permute.xlu1 %3311  ;;  %v3317_v53 = vpop.permute.xlu0 %3316 }
 0x186   : > { %v3314_v54 = vunpack.i.h.bf16 %v3312_v51  ;;  %v3313_v55 = vunpack.i.l.bf16 %v3312_v51  ;;  %v3319_v56 = vunpack.i.h.bf16 %v3317_v53  ;;  %v3318_v57 = vunpack.i.l.bf16 %v3317_v53 }
 0x188   : > { %v3143_v59 = vpack.c.bf16 %v3314_v54, %v3309_v15  ;;  %v1812_v60 = vsel %vm382_vm8, %v3319_v56, %v3313_v55  ;;  %v1810_v61 = vsel %vm382_vm8, %v3318_v57, %v3308_v50  ;;  %v1813_v62 = vsel %vm382_vm8, %v3313_v55, %v3314_v54 }
 0x189   : > { %v3322_v7 = vpop.permute.xlu1 %3321  ;;  %v3327_v63 = vpop.permute.xlu0 %3326  ;;  %v3127_v0 = vpack.c.bf16 %v1813_v62, %v1811_v58  ;;  %v3129_v2 = vpack.c.bf16 %v1812_v60, %v1810_v61 }
 0x18a   : > { %v3324_v3 = vunpack.i.h.bf16 %v3322_v7  ;;  %v3323_v4 = vunpack.i.l.bf16 %v3322_v7  ;;  %v3329_v5 = vunpack.i.h.bf16 %v3327_v63  ;;  %v3328_v1 = vunpack.i.l.bf16 %v3327_v63  ;;  %3144 = vmatpush3.bf16.msra.mxu1 %v3143_v59 }
 0x18b   : > { %3128 = vmatprep.subr.bf16.mxu0 %v3127_v0  ;;  %3145 = vmatprep.subr.bf16.mxu1 %v3478_v19 }
 0x18c   : > { %v3146_v8 = vpack.c.bf16 %v3329_v5, %v3324_v3  ;;  %3130 = vmatpush1.bf16.msra.mxu0 %v3129_v2  ;;  %v1815_v9 = vsel %vm382_vm8, %v3323_v4, %v3324_v3  ;;  %v1817_v10 = vsel %vm382_vm8, %v3328_v1, %v3329_v5 }
 0x18d   : > { %v3332_v11 = vpop.permute.xlu1 %3331  ;;  %v3131_v46 = vpack.c.bf16 %v1817_v10, %v1815_v9 }
 0x18e   : > { %v3334_v45 = vunpack.i.h.bf16 %v3332_v11  ;;  %v3333_v12 = vunpack.i.l.bf16 %v3332_v11  ;;  %3147 = vmatpush3.bf16.msra.mxu1 %v3146_v8 }
 0x18f   : > { %3132 = vmatprep.subr.bf16.mxu0 %v3131_v46  ;;  %3148 = vmatprep.subr.bf16.mxu1 %v3478_v19 }
 0x190   : > { %v1814_v13 = vsel %vm382_vm8, %v3333_v12, %v3323_v4  ;;  %v1816_v17 = vsel %vm382_vm8, %v3334_v45, %v3328_v1 }
 0x191   : > { %v3337_v52 = vpop.permute.xlu0 %3336  ;;  %v3133_v18 = vpack.c.bf16 %v1816_v17, %v1814_v13 }
 0x192   : > { %v3339_v21 = vunpack.i.h.bf16 %v3337_v52  ;;  %v3338_v23 = vunpack.i.l.bf16 %v3337_v52 }
 0x193   : > { %3134 = vmatpush1.bf16.msra.mxu0 %v3133_v18 }
 0x194   : > { %v1819_v14 = vsel %vm382_vm8, %v3338_v23, %v3339_v21 }
 0x195   : > { %v3342_v24 = vpop.permute.xlu1 %3341 }
 0x196   : > { %v3344_v30 = vunpack.i.h.bf16 %v3342_v24  ;;  %v3343_v31 = vunpack.i.l.bf16 %v3342_v24 }
 0x198   : > { %v3149_v32 = vpack.c.bf16 %v3344_v30, %v3339_v21  ;;  %v1821_v33 = vsel %vm382_vm8, %v3343_v31, %v3344_v30 }
 0x199   : > { %v3347_v34 = vpop.permute.xlu0 %3346  ;;  %v3135_v35 = vpack.c.bf16 %v1821_v33, %v1819_v14 }
 0x19a   : > { %v3349_v19 = vunpack.i.h.bf16 %v3347_v34  ;;  %v3348_v36 = vunpack.i.l.bf16 %v3347_v34  ;;  %3150 = vmatpush3.bf16.msra.mxu1 %v3149_v32 }
 0x19b   : > { %v1803_v16 = vpop.permute.xlu1 %1802  ;;  %3136 = vmatprep.subr.bf16.mxu0 %v3135_v35  ;;  %3078 = vmatprep.subr.mxu1 %v3479_v27 }
 0x19c   : > { %v1820_v37 = vsel %vm382_vm8, %v3349_v19, %v3343_v31  ;;  %v1818_v38 = vsel %vm382_vm8, %v3348_v36, %v3338_v23 }
 0x19d   : > { %v1805_v43 = vpop.permute.xlu0 %1804  ;;  %v3137_v44 = vpack.c.bf16 %v1820_v37, %v1818_v38 }
 0x19e   : > { %3079 = vmatpush3.msra.mxu1 %v1805_v43  ;;  %v1823_v6 = vsel %vm382_vm8, %v1803_v16, %v1805_v43 }
 0x19f   : > { %v1801_v47 = vpop.permute.xlu1 %1800  ;;  %3138 = vmatpush1.bf16.msra.mxu0 %v3137_v44  ;;  %3081 = vmatmul.mubr.msk.f32.vlgmr.msra.gmra.mrb[10].mxu1 %vm542_vm9, %v3927_v22 }
 0x1a0   : > { %1867 = vmatprep.subr.mxu0 %v1823_v6  ;;  %3083 = vmatprep.mubr.msk.f32.mxu1 %vm3480_vm7, %v3479_v27  ;;  %v1822_v48 = vsel %vm382_vm8, %v1801_v47, %v1803_v16 }
 0x1a3   : > { %1868 = vmatpush1.msra.mxu0 %v1822_v48  ;;  %3084 = vmatmul.mubr.msk.f32.gmra.mrb[12].mxu1 %vm542_vm9, %v3938_v25 }
 0x1a4   : > { %2983 = vmatmul.mubr.msk.f32.vlgmr.msra.gmra.mrb[10].mxu0 %vm542_vm9, %v3927_v22  ;;  %3086 = vmatprep.mubr.msk.f32.mxu1 %vm3480_vm7, %v3479_v27 }
 0x1a5   : > { %1921 = vmatprep.mubr.f32.mxu0 %v3479_v27 }
 0x1a7   : > { %3087 = vmatmul.mubr.msk.f32.gmra.mrb[14].mxu1 %vm542_vm9, %v3950_v26 }
 0x1a8   : > { %2984 = vmatmul.mubr.msk.f32.gmra.mrb[12].mxu0 %vm542_vm9, %v3938_v25  ;;  %3089 = vmatprep.mubr.msk.f32.mxu1 %vm3480_vm7, %v3479_v27 }
 0x1a9   : > { %1927 = vmatprep.mubr.f32.mxu0 %v3479_v27 }
 0x1ab   : > { %3090 = vmatmul.mubr.msk.f32.gmra.mrb[16].mxu1 %vm542_vm9, %v3962_v28 }
 0x1ac   : > { %2985 = vmatmul.mubr.msk.f32.gmra.mrb[14].mxu0 %vm542_vm9, %v3950_v26  ;;  %3092 = vmatprep.mubr.msk.f32.mxu1 %vm3480_vm7, %v3479_v27  ;;  %vm1427_vm7 = vcmask 744448  }
 0x1ad   : > { %1933 = vmatprep.mubr.f32.mxu0 %v3479_v27 }
 0x1af   : > { %3093 = vmatmul.mubr.msk.f32.gmra.mrb[18].mxu1 %vm542_vm9, %v3974_v29 }
 0x1b0   : > { %2986 = vmatmul.mubr.msk.f32.gmra.mrb[16].mxu0 %vm542_vm9, %v3962_v28 }
 0x1b1   : > { %1939 = vmatprep.mubr.f32.mxu0 %v3479_v27 }
 0x1b4   : > { %2987 = vmatmul.mubr.msk.f32.gmra.mrb[18].mxu0 %vm542_vm9, %v3974_v29  ;;  %vm1536_vm9 = vcmask 736256  }
 0x22d   : > { %v719_v22 = vpop.f32.mrb[0].mxu1 }
 0x22e   : > { %v4041_v25 = vadd.f32 %v719_v22, %v3815_v20  ;;  %v3049_v26 = vpop.f32.mrb[1].mxu1 }
 0x22f   : > { %v624_v49 = vpop.f32.mrb[0].mxu0 }
 0x230   : > { %v4044_v15 = vadd.f32 %v624_v49, %v3815_v20  ;;  %v626_v50 = vpop.f32.mrb[1].mxu0  ;;  %v4047_v51 = vrot.slane %v4041_v25, 6  ;;  %v4050_v27 = vrot.slane %v4041_v25, 4  ;;  %v4053_v28 = vrot.slane %v4041_v25, 2 }
 0x231   : > { %v4056_v29 = vadd.f32 %v626_v50, %v3815_v20  ;;  %v724_v53 = vpop.f32.mrb[2].mxu1 }
 0x232   : > { %v3052_v54 = vpop.f32.mrb[3].mxu1  ;;  %v799_v55 = vsel %vm764_vm10, %v4050_v27, %v4053_v28  ;;  %v808_v56 = vsel %vm764_vm10, %v4047_v51, %v4050_v27  ;;  %v4080_v63 = vrot.slane %v4044_v15, 4  ;;  %v4099_v9 = vrot.slane %v4044_v15, 6 }
 0x233   : > { %v4064_v57 = vpop.f32.mrb[2].mxu0  ;;  %v802_v58 = vsel %vm768_vm11, %v799_v55, %v4041_v25  ;;  %v4069_v59 = vrot.slane %v4056_v29, 6  ;;  %v4072_v60 = vrot.slane %v4056_v29, 4  ;;  %v4075_v61 = vrot.slane %v4056_v29, 2 }
 0x234   : > { %v632_v62 = vpop.f32.mrb[3].mxu0  ;;  %v805_v7 = vsel %vm772_vm12, %v802_v58, %v4047_v51  ;;  %v811_v4 = vsel %vm768_vm11, %v808_v56, %v4053_v28  ;;  %v4102_v10 = vrot.slane %v4044_v15, 2  ;;  %v4105_v11 = vadd.f32 %v724_v53, %v3813_v39 }
 0x235   : > { %v4083_v0 = vadd.f32 %v632_v62, %v3813_v39  ;;  %822 = vrot.lane.b32.xlu0 %v805_v7, %s3473_s14  ;;  %v4086_v2 = vpop.f32.mrb[4].mxu1  ;;  %v798_v3 = vsel %vm764_vm10, %v4072_v60, %v4075_v61  ;;  %v807_v5 = vsel %vm764_vm10, %v4069_v59, %v4072_v60  ;;  %v814_v17 = vsel %vm772_vm12, %v811_v4, %v4041_v25 }
 0x236   : > { %v3055_v1 = vpop.f32.mrb[5].mxu1  ;;  %v801_v8 = vsel %vm768_vm11, %v798_v3, %v4056_v29  ;;  %v810_v52 = vsel %vm768_vm11, %v807_v5, %v4075_v61  ;;  %v797_v18 = vsel %vm764_vm10, %v4080_v63, %v4102_v10  ;;  %v806_v14 = vsel %vm764_vm10, %v4099_v9, %v4080_v63 }
 0x237   : > { %v4107_v46 = vpop.f32.mrb[4].mxu0  ;;  %v804_v45 = vsel %vm772_vm12, %v801_v8, %v4069_v59  ;;  %v887_v12 = vrot.slane %v4083_v0, 6  ;;  %v893_v21 = vrot.slane %v4083_v0, 4  ;;  %v800_v24 = vsel %vm768_vm11, %v797_v18, %v4044_v15 }
 0x238   : > { %v638_v13 = vpop.f32.mrb[5].mxu0  ;;  %820 = vrot.lane.b32.xlu1 %v804_v45, %s3473_s14  ;;  %v899_v30 = vrot.slane %v4083_v0, 2  ;;  %v813_v34 = vsel %vm772_vm12, %v810_v52, %v4056_v29  ;;  %v888_v35 = vrot.slane %v4105_v11, 6  ;;  %v803_v36 = vsel %vm772_vm12, %v800_v24, %v4099_v9 }
 0x239   : > { %856 = vrot.lane.b32.xlu0 %v814_v17, %s3473_s14  ;;  %v4122_v23 = vpop.f32.mrb[6].mxu1  ;;  %v905_v31 = vsel %vm764_vm10, %v4083_v0, %v887_v12  ;;  %v809_v38 = vsel %vm768_vm11, %v806_v14, %v4102_v10  ;;  %v894_v44 = vrot.slane %v4105_v11, 4  ;;  %v900_v6 = vrot.slane %v4105_v11, 2 }
 0x23a   : > { %v3058_v32 = vpop.f32.mrb[7].mxu1  ;;  %v908_v16 = vsel %vm768_vm11, %v905_v31, %v893_v21  ;;  %v914_v43 = vsel %vm764_vm10, %v899_v30, %v4083_v0  ;;  %v906_v47 = vsel %vm764_vm10, %v4105_v11, %v888_v35  ;;  %v812_v50 = vsel %vm772_vm12, %v809_v38, %v4044_v15 }
 0x23b   : > { %v4132_v33 = vpop.f32.mrb[6].mxu0  ;;  %v911_v26 = vsel %vm772_vm12, %v908_v16, %v899_v30  ;;  %v917_v53 = vsel %vm768_vm11, %v914_v43, %v887_v12  ;;  %v4162_v54 = vadd.f32 %v638_v13, %v3817_v40  ;;  %v909_v55 = vsel %vm768_vm11, %v906_v47, %v894_v44 }
 0x23c   : > { %v644_v19 = vpop.f32.mrb[7].mxu0  ;;  %854 = vrot.lane.b32.xlu1 %v813_v34, %s3473_s14  ;;  %v993_v56 = vsel %vm764_vm10, %v893_v21, %v899_v30  ;;  %v915_v58 = vsel %vm764_vm10, %v900_v6, %v4105_v11  ;;  %v920_v62 = vsel %vm772_vm12, %v917_v53, %v893_v21  ;;  %v912_v7 = vsel %vm772_vm12, %v909_v55, %v900_v6 }
 0x23d   : > { %v4141_v37 = vpop.f32.mrb[8].mxu1  ;;  %818 = vrot.lane.b32.xlu0 %v803_v36, %s3473_s14  ;;  %v996_v3 = vsel %vm768_vm11, %v993_v56, %v4083_v0  ;;  %v918_v4 = vsel %vm768_vm11, %v915_v58, %v888_v35  ;;  %v1002_v5 = vsel %vm764_vm10, %v887_v12, %v893_v21  ;;  %v1082_v1 = vrot.slane %v4162_v54, 6 }
 0x23e   : > { %v3061_v48 = vpop.f32.mrb[9].mxu1  ;;  %v4180_v8 = vadd.f32 %v4064_v57, %v3813_v39  ;;  %v994_v45 = vsel %vm764_vm10, %v894_v44, %v900_v6  ;;  %v999_v13 = vsel %vm772_vm12, %v996_v3, %v887_v12  ;;  %v921_v17 = vsel %vm772_vm12, %v918_v4, %v894_v44 }
 0x23f   : > { %v4152_v22 = vpop.f32.mrb[8].mxu0  ;;  %v1005_v52 = vsel %vm768_vm11, %v1002_v5, %v899_v30  ;;  %v1088_v18 = vrot.slane %v4162_v54, 4  ;;  %v997_v21 = vsel %vm768_vm11, %v994_v45, %v4105_v11  ;;  %v1094_v57 = vrot.slane %v4162_v54, 2 }
 0x240   : > { %v4155_v49 = vpop.f32.mrb[9].mxu0  ;;  %927 = vrot.lane.b32.xlu1 %v911_v26, %s3481_s13  ;;  %v1100_v24 = vsel %vm764_vm10, %v4162_v54, %v1082_v1  ;;  %v1003_v12 = vsel %vm764_vm10, %v888_v35, %v894_v44  ;;  %v886_v31 = vrot.slane %v4180_v8, 6  ;;  %v1008_v32 = vsel %vm772_vm12, %v1005_v52, %v4083_v0 }
 0x241   : > { %852 = vrot.lane.b32.xlu0 %v812_v50, %s3473_s14  ;;  %v1000_v30 = vsel %vm772_vm12, %v997_v21, %v888_v35  ;;  %v1103_v14 = vsel %vm768_vm11, %v1100_v24, %v1088_v18  ;;  %v1006_v34 = vsel %vm768_vm11, %v1003_v12, %v900_v6  ;;  %v1109_v36 = vsel %vm764_vm10, %v1094_v57, %v4162_v54 }
 0x242   : > { %v892_v16 = vrot.slane %v4180_v8, 4  ;;  %v898_v38 = vrot.slane %v4180_v8, 2  ;;  %v904_v0 = vsel %vm764_vm10, %v4180_v8, %v886_v31  ;;  %v1106_v43 = vsel %vm772_vm12, %v1103_v14, %v1094_v57 }
 0x243   : > { %v1009_v35 = vsel %vm772_vm12, %v1006_v34, %v4105_v11  ;;  %v1112_v44 = vsel %vm768_vm11, %v1109_v36, %v1082_v1  ;;  %v4215_v6 = vadd.f32 %v644_v19, %v3819_v41  ;;  %v1186_v48 = vsel %vm764_vm10, %v1088_v18, %v1094_v57 }
 0x244   : > { %963 = vrot.lane.b32.xlu1 %v920_v62, %s3481_s13  ;;  %v907_v47 = vsel %vm768_vm11, %v904_v0, %v892_v16  ;;  %v913_v26 = vsel %vm764_vm10, %v898_v38, %v4180_v8  ;;  %v4224_v50 = vadd.f32 %v4086_v2, %v3817_v40  ;;  %v1115_v11 = vsel %vm772_vm12, %v1112_v44, %v1088_v18 }
 0x245   : > { %929 = vrot.lane.b32.xlu0 %v912_v7, %s3481_s13  ;;  %v910_v19 = vsel %vm772_vm12, %v907_v47, %v898_v38  ;;  %v1189_v53 = vsel %vm768_vm11, %v1186_v48, %v4162_v54  ;;  %v916_v55 = vsel %vm768_vm11, %v913_v26, %v886_v31  ;;  %v1195_v56 = vsel %vm764_vm10, %v1082_v1, %v1088_v18 }
 0x246   : > { %v992_v58 = vsel %vm764_vm10, %v892_v16, %v898_v38  ;;  %v1277_v2 = vrot.slane %v4215_v6, 6  ;;  %v1192_v62 = vsel %vm772_vm12, %v1189_v53, %v1082_v1  ;;  %v919_v7 = vsel %vm772_vm12, %v916_v55, %v892_v16 }
 0x247   : > { %v1198_v3 = vsel %vm768_vm11, %v1195_v56, %v1094_v57  ;;  %v1289_v4 = vrot.slane %v4215_v6, 2  ;;  %v995_v5 = vsel %vm768_vm11, %v992_v58, %v4180_v8  ;;  %v1283_v45 = vrot.slane %v4215_v6, 4 }
 0x248   : > { %1015 = vrot.lane.b32.xlu1 %v999_v13, %s3471_s12  ;;  %v4245_v13 = vrot.slane %v4224_v50, 6  ;;  %v1295_v1 = vsel %vm764_vm10, %v4215_v6, %v1277_v2  ;;  %v4255_v52 = vadd.f32 %v4155_v49, %v3821_v42  ;;  %v1001_v18 = vsel %vm764_vm10, %v886_v31, %v892_v16 }
 0x249   : > { %965 = vrot.lane.b32.xlu0 %v921_v17, %s3481_s13  ;;  %v4248_v17 = vrot.slane %v4224_v50, 2  ;;  %v1201_v21 = vsel %vm772_vm12, %v1198_v3, %v4162_v54  ;;  %v998_v57 = vsel %vm772_vm12, %v995_v5, %v886_v31  ;;  %v1304_v24 = vsel %vm764_vm10, %v1289_v4, %v4215_v6 }
 0x24a   : > { %v4264_v12 = vrot.slane %v4224_v50, 4  ;;  %v1101_v49 = vsel %vm764_vm10, %v4224_v50, %v4245_v13  ;;  %v1004_v31 = vsel %vm768_vm11, %v1001_v18, %v898_v38  ;;  %v1307_v14 = vsel %vm768_vm11, %v1304_v24, %v1277_v2 }
 0x24b   : > { %v1110_v54 = vsel %vm764_vm10, %v4248_v17, %v4224_v50  ;;  %v1392_v38 = vsel %vm764_vm10, %v1277_v2, %v1283_v45  ;;  %v1474_v44 = vrot.slane %v4255_v52, 6  ;;  %v4295_v47 = vadd.f32 %v4107_v46, %v3817_v40 }
 0x24c   : > { %1049 = vrot.lane.b32.xlu1 %v1008_v32, %s3471_s12  ;;  %v1298_v32 = vsel %vm768_vm11, %v1295_v1, %v1283_v45  ;;  %v1104_v36 = vsel %vm768_vm11, %v1101_v49, %v4264_v12  ;;  %v1113_v0 = vsel %vm768_vm11, %v1110_v54, %v4245_v13  ;;  %v1310_v48 = vsel %vm772_vm12, %v1307_v14, %v1283_v45  ;;  %v3353_v54 = vld [vmem:[%s3626_s26 + $0x20] sm:$0xff] }
 0x24d   : > { %1017 = vrot.lane.b32.xlu0 %v1000_v30, %s3471_s12  ;;  %v1383_v30 = vsel %vm764_vm10, %v1283_v45, %v1289_v4  ;;  %v1301_v34 = vsel %vm772_vm12, %v1298_v32, %v1289_v4  ;;  %v1395_v46 = vsel %vm768_vm11, %v1392_v38, %v1289_v4  ;;  %v1480_v55 = vrot.slane %v4255_v52, 4  ;;  %v4328_v4 = vld [vmem:[%s3626_s26 + $0x10] sm:$0xff] }
 0x24e   : > { %v1386_v16 = vsel %vm768_vm11, %v1383_v30, %v4215_v6  ;;  %v1486_v58 = vrot.slane %v4255_v52, 2  ;;  %6222 = vst [vmem:[#allocation8_spill] sm:$0xff] %v4328_v4  ;;  %v766_v45 = vsel %vm764_vm10, %v4056_v29, %v4069_v59  ;;  %v776_v1 = vsel %vm764_vm10, %v4102_v10, %v4044_v15 }
 0x24f   : > { %v1389_v26 = vsel %vm772_vm12, %v1386_v16, %v1277_v2  ;;  %v1492_v2 = vsel %vm764_vm10, %v4255_v52, %v1474_v44  ;;  %v765_v18 = vsel %vm764_vm10, %v4044_v15, %v4099_v9 }
 0x250   : > { %1122 = vrot.lane.b32.xlu1 %v1106_v43, %s3470_s11  ;;  %v1007_v43 = vsel %vm772_vm12, %v1004_v31, %v4180_v8  ;;  %v1107_v8 = vsel %vm772_vm12, %v1104_v36, %v4248_v17  ;;  %v769_v32 = vsel %vm768_vm11, %v765_v18, %v4080_v63  ;;  %v1081_v36 = vrot.slane %v4295_v47, 6 }
 0x251   : > { %1051 = vrot.lane.b32.xlu0 %v1009_v35, %s3471_s12  ;;  %v1187_v35 = vsel %vm764_vm10, %v4264_v12, %v4248_v17  ;;  %v773_v30 = vsel %vm772_vm12, %v769_v32, %v4102_v10  ;;  %v1196_v10 = vsel %vm764_vm10, %v4245_v13, %v4264_v12 }
 0x252   : > { %v1190_v53 = vsel %vm768_vm11, %v1187_v35, %v4224_v50  ;;  %v1501_v35 = vsel %vm764_vm10, %v1486_v58, %v4255_v52 }
 0x254   : > { %1156 = vrot.lane.b32.xlu1 %v1115_v11, %s3470_s11  ;;  %v1116_v11 = vsel %vm772_vm12, %v1113_v0, %v4264_v12  ;;  %v4385_v0 = vadd.f32 %v4122_v23, %v3819_v41  ;;  %v1495_v12 = vsel %vm768_vm11, %v1492_v2, %v1480_v55  ;;  %v1093_v23 = vrot.slane %v4295_v47, 2 }
 0x255   : > { %925 = vrot.lane.b32.xlu0 %v910_v19, %s3481_s13  ;;  %v767_v19 = vsel %vm764_vm10, %v4041_v25, %v4047_v51 }
 0x256   : > { %v771_v56 = vsel %vm768_vm11, %v767_v19, %v4050_v27  ;;  %v1278_v19 = vrot.slane %v4385_v0, 6 }
 0x258   : > { %1208 = vrot.lane.b32.xlu1 %v1192_v62, %s3482_s16  ;;  %v775_v62 = vsel %vm772_vm12, %v771_v56, %v4053_v28  ;;  %v1290_v56 = vrot.slane %v4385_v0, 2 }
 0x259   : > { %961 = vrot.lane.b32.xlu0 %v919_v7, %s3481_s13  ;;  %v778_v7 = vsel %vm764_vm10, %v4053_v28, %v4041_v25  ;;  %v787_v5 = vmul.f32 %v4328_v4, %v775_v62  ;;  %v770_v28 = vsel %vm768_vm11, %v766_v45, %v4072_v60 }
 0x25a   : > { %v781_v3 = vsel %vm768_vm11, %v778_v7, %v4047_v51  ;;  %v777_v51 = vsel %vm764_vm10, %v4075_v61, %v4056_v29  ;;  %v3352_v29 = vld [vmem:[%s3626_s26 + $0x8] sm:$0xff] }
 0x25b   : > { %v784_v25 = vsel %vm772_vm12, %v781_v3, %v4050_v27  ;;  %v774_v27 = vsel %vm772_vm12, %v770_v28, %v4075_v61  ;;  %v780_v24 = vsel %vm768_vm11, %v777_v51, %v4069_v59  ;;  %v779_v61 = vsel %vm768_vm11, %v776_v1, %v4099_v9  ;;  %v4380_v9 = vld [vmem:[%s3626_s26 + $0x18] sm:$0xff] }
 0x25c   : > { %1244 = vrot.lane.b32.xlu1 %v1201_v21, %s3482_s16  ;;  %v4348_v21 = vld [vmem:[%s3626_s26 + $0x28] sm:$0xff]  ;;  %v783_v15 = vsel %vm772_vm12, %v780_v24, %v4072_v60  ;;  %v786_v49 = vmul.f32 %v3352_v29, %v774_v27  ;;  %v782_v14 = vsel %vm772_vm12, %v779_v61, %v4080_v63  ;;  %6226 = vst [vmem:[#allocation12_spill] sm:$0xff] %v4380_v9 }
 0x25d   : > { %1013 = vrot.lane.b32.xlu0 %v998_v57, %s3471_s12  ;;  %6223 = vst [vmem:[#allocation9_spill] sm:$0xff] %v4348_v21  ;;  %v793_v57 = vmul.f32 %v4348_v21, %v784_v25  ;;  %v792_v31 = vmul.f32 %v3353_v54, %v783_v15  ;;  %v791_v16 = vmul.f32 %v4380_v9, %v782_v14 }
 0x25e   : > { %v1398_v63 = vsel %vm772_vm12, %v1395_v46, %v4215_v6  ;;  %v1199_v6 = vsel %vm768_vm11, %v1196_v10, %v4248_v17  ;;  %v1108_v17 = vsel %vm764_vm10, %v1093_v23, %v4295_v47  ;;  %v1296_v1 = vsel %vm764_vm10, %v4385_v0, %v1278_v19 }
 0x25f   : > { %v4366_v59 = vadd.f32 %v793_v57, %v787_v5  ;;  %v4391_v38 = vadd.f32 %v792_v31, %v786_v49  ;;  %v1202_v46 = vsel %vm772_vm12, %v1199_v6, %v4224_v50  ;;  %v1111_v5 = vsel %vm768_vm11, %v1108_v17, %v1081_v36 }
 0x260   : > { %1317 = vrot.lane.b32.xlu1 %v1301_v34, %s3483_s28  ;;  %v4372_v34 = vld [vmem:[%s3626_s26] sm:$0xff]  ;;  %v4448_v28 = vadd.f32 %v4152_v22, %v3821_v42 }
 0x261   : > { %1047 = vrot.lane.b32.xlu0 %v1007_v43, %s3471_s12  ;;  %6224 = vst [vmem:[#allocation10_spill] sm:$0xff] %v4366_v59  ;;  %6225 = vst [vmem:[#allocation11_spill] sm:$0xff] %v4372_v34  ;;  %v785_v60 = vmul.f32 %v4372_v34, %v773_v30  ;;  %v1193_v43 = vsel %vm772_vm12, %v1190_v53, %v4245_v13  ;;  %v1087_v13 = vrot.slane %v4295_v47, 4  ;;  %v1284_v53 = vrot.slane %v4385_v0, 4 }
 0x262   : > { %6227 = vst [vmem:[#allocation13_spill] sm:$0xff] %v4391_v38  ;;  %6230 = vst [vmem:[#allocation16_spill] sm:$0xff] %v4448_v28 }
 0x263   : > { %v1185_v62 = vsel %vm764_vm10, %v1087_v13, %v1093_v23  ;;  %v1194_v45 = vsel %vm764_vm10, %v1081_v36, %v1087_v13  ;;  %v1384_v25 = vsel %vm764_vm10, %v1284_v53, %v1290_v56  ;;  %v1114_v27 = vsel %vm772_vm12, %v1111_v5, %v1087_v13 }
 0x264   : > { %1353 = vrot.lane.b32.xlu1 %v1310_v48, %s3483_s28  ;;  %v4400_v48 = vadd.f32 %v791_v16, %v785_v60  ;;  %v1188_v51 = vsel %vm768_vm11, %v1185_v62, %v4295_v47  ;;  %v1197_v24 = vsel %vm768_vm11, %v1194_v45, %v1093_v23  ;;  %v1299_v32 = vsel %vm768_vm11, %v1296_v1, %v1284_v53 }
 0x265   : > { %1124 = vrot.lane.b32.xlu0 %v1107_v8, %s3470_s11  ;;  %v1099_v8 = vsel %vm764_vm10, %v4295_v47, %v1081_v36  ;;  %v1393_v22 = vsel %vm764_vm10, %v1278_v19, %v1284_v53  ;;  %v1387_v61 = vsel %vm768_vm11, %v1384_v25, %v4385_v0  ;;  %v1191_v14 = vsel %vm772_vm12, %v1188_v51, %v1081_v36 }
 0x266   : > { %6228 = vst [vmem:[#allocation14_spill] sm:$0xff] %v4400_v48  ;;  %v4492_v36 = vsel %vm772_vm12, %v1299_v32, %v1290_v56 }
 0x268   : > { %1405 = vrot.lane.b32.xlu1 %v1389_v26, %s3484_s7  ;;  %v1498_v26 = vsel %vm772_vm12, %v1495_v12, %v1486_v58  ;;  %v1102_v58 = vsel %vm768_vm11, %v1099_v8, %v1087_v13  ;;  %v1396_v12 = vsel %vm768_vm11, %v1393_v22, %v1290_v56  ;;  %v4502_v13 = vsel %vm772_vm12, %v1387_v61, %v1278_v19 }
 0x269   : > { %1158 = vrot.lane.b32.xlu0 %v1116_v11, %s3470_s11  ;;  %v1504_v11 = vsel %vm768_vm11, %v1501_v35, %v1474_v44  ;;  %v4424_v44 = vadd.f32 %v4132_v33, %v3819_v41  ;;  %v4439_v33 = vadd.f32 %v4141_v37, %v3821_v42  ;;  %v1105_v52 = vsel %vm772_vm12, %v1102_v58, %v1093_v23 }
 0x26a   : > { %v1507_v50 = vsel %vm772_vm12, %v1504_v11, %v1480_v55  ;;  %v1305_v55 = vsel %vm764_vm10, %v1290_v56, %v4385_v0  ;;  %v4522_v58 = vsel %vm772_vm12, %v1396_v12, %v4385_v0  ;;  %v1473_v22 = vrot.slane %v4448_v28, 6 }
 0x26b   : > { %v1308_v30 = vsel %vm768_vm11, %v1305_v55, %v1278_v19  ;;  %v4476_v60 = vrot.slane %v4424_v44, 6  ;;  %v4479_v10 = vrot.slane %v4424_v44, 4  ;;  %v1288_v8 = vrot.slane %v4424_v44, 2 }
 0x26c   : > { %1441 = vrot.lane.b32.xlu1 %v1398_v63, %s3484_s7  ;;  %v4499_v6 = vsel %vm772_vm12, %v1308_v30, %v1284_v53  ;;  %v1475_v0 = vrot.slane %v4439_v33, 6  ;;  %v1487_v25 = vrot.slane %v4439_v33, 2  ;;  %v6234_v48 = vrot.slane %v4439_v33, 4 }
 0x26d   : > { %1210 = vrot.lane.b32.xlu0 %v1193_v43, %s3482_s16  ;;  %v1200_v43 = vsel %vm772_vm12, %v1197_v24, %v4295_v47  ;;  %v1382_v55 = vsel %vm764_vm10, %v4479_v10, %v1288_v8 }
 0x26e   : > { %v1385_v12 = vsel %vm768_vm11, %v1382_v55, %v4424_v44  ;;  %v1491_v55 = vsel %vm764_vm10, %v4448_v28, %v1473_v22 }
 0x270   : > { %1514 = vrot.lane.b32.xlu1 %v1498_v26, %s3485_s23 }
 0x271   : > { %1246 = vrot.lane.b32.xlu0 %v1202_v46, %s3482_s16 }
 0x272   : > { %v2012_v2 = vpop.f32.mrb[10].mxu1 }
 0x273   : > { %v4431_v7 = vadd.f32 %v2012_v2, %v3815_v20  ;;  %v3082_v3 = vpop.f32.mrb[11].mxu1  ;;  %v1294_v2 = vsel %vm764_vm10, %v4424_v44, %v4476_v60 }
 0x274   : > { %1550 = vrot.lane.b32.xlu1 %v1507_v50, %s3485_s23  ;;  %v1391_v50 = vsel %vm764_vm10, %v4476_v60, %v4479_v10 }
 0x275   : > { %6229 = vst [vmem:[#allocation15_spill] sm:$0xff] %v4431_v7  ;;  %1120 = vrot.lane.b32.xlu0 %v1105_v52, %s3470_s11  ;;  %v4454_v37 = vrot.slane %v4431_v7, 6  ;;  %v4457_v18 = vrot.slane %v4431_v7, 4  ;;  %v1303_v52 = vsel %vm764_vm10, %v1288_v8, %v4424_v44 }
 0x276   : > { %v2017_v57 = vpop.f32.mrb[12].mxu1 }
 0x277   : > { %6231 = vst [vmem:[#allocation17_spill] sm:$0xff] %v4454_v37  ;;  %6232 = vst [vmem:[#allocation18_spill] sm:$0xff] %v4457_v18  ;;  %v4464_v15 = vadd.f32 %v2017_v57, %v3813_v39  ;;  %v4466_v29 = vpop.f32.mrb[10].mxu0  ;;  %v3085_v49 = vpop.f32.mrb[13].mxu1  ;;  %v2059_v54 = vsel %vm764_vm10, %v4431_v7, %v4454_v37 }
 0x278   : > { %v1919_v31 = vpop.f32.mrb[11].mxu0  ;;  %v4483_v16 = vsel %vm768_vm11, %v2059_v54, %v4457_v18 }
 0x279   : > { %6233 = vst [vmem:[#allocation19_spill] sm:$0xff] %v4483_v16  ;;  %v4486_v63 = vadd.f32 %v1919_v31, %v3815_v20  ;;  %1154 = vrot.lane.b32.xlu0 %v1114_v27, %s3470_s11  ;;  %v4496_v23 = vrot.slane %v4464_v15, 6  ;;  %v4515_v56 = vrot.slane %v4464_v15, 4  ;;  %v4551_v24 = vrot.slane %v4464_v15, 2 }
 0x27a   : > { %v2022_v35 = vpop.f32.mrb[14].mxu1 }
 0x27b   : > { %v1923_v26 = vpop.f32.mrb[12].mxu0  ;;  %v3088_v11 = vpop.f32.mrb[15].mxu1  ;;  %v4506_v47 = vrot.slane %v4486_v63, 6  ;;  %v4509_v46 = vrot.slane %v4486_v63, 4  ;;  %v4512_v17 = vrot.slane %v4486_v63, 2  ;;  %v2291_v32 = vsel %vm764_vm10, %v4496_v23, %v4515_v56 }
 0x27c   : > { %v4518_v53 = vadd.f32 %v1923_v26, %v3813_v39  ;;  %v1925_v19 = vpop.f32.mrb[13].mxu0  ;;  %v1394_v26 = vsel %vm768_vm11, %v1391_v50, %v1288_v8  ;;  %v2294_v50 = vsel %vm768_vm11, %v2291_v32, %v4551_v24 }
 0x27d   : > { %1206 = vrot.lane.b32.xlu0 %v1191_v14, %s3482_s16  ;;  %v2088_v62 = vsel %vm764_vm10, %v4509_v46, %v4512_v17  ;;  %v2097_v3 = vsel %vm764_vm10, %v4506_v47, %v4509_v46  ;;  %v4558_v49 = vadd.f32 %v1925_v19, %v3813_v39  ;;  %v1297_v14 = vsel %vm768_vm11, %v1294_v2, %v4479_v10 }
 0x27e   : > { %v4539_v45 = vpop.f32.mrb[16].mxu1  ;;  %v2091_v1 = vsel %vm768_vm11, %v2088_v62, %v4486_v63  ;;  %v2100_v61 = vsel %vm768_vm11, %v2097_v3, %v4512_v17  ;;  %v4564_v54 = vrot.slane %v4518_v53, 6  ;;  %v4567_v31 = vrot.slane %v4518_v53, 4 }
 0x27f   : > { %v1929_v51 = vpop.f32.mrb[14].mxu0  ;;  %v2094_v57 = vsel %vm772_vm12, %v2091_v1, %v4506_v47  ;;  %v3091_v27 = vpop.f32.mrb[17].mxu1  ;;  %v1306_v39 = vsel %vm768_vm11, %v1303_v52, %v4476_v60  ;;  %v1493_v19 = vsel %vm764_vm10, %v4439_v33, %v1475_v0  ;;  %v1502_v62 = vsel %vm764_vm10, %v1487_v25, %v4439_v33 }
 0x280   : > { %v1931_v30 = vpop.f32.mrb[15].mxu0  ;;  %2110 = vrot.lane.b32.xlu1 %v2094_v57, %s3473_s14  ;;  %v1485_v2 = vrot.slane %v4448_v28, 2  ;;  %v2103_v1 = vsel %vm772_vm12, %v2100_v61, %v4486_v63  ;;  %v4592_v52 = vrot.slane %v4518_v53, 2  ;;  %v4597_v27 = vadd.f32 %v2022_v35, %v3817_v40 }
 0x281   : > { %1242 = vrot.lane.b32.xlu0 %v1200_v43, %s3482_s16  ;;  %v2289_v61 = vsel %vm764_vm10, %v4564_v54, %v4567_v31  ;;  %v4604_v5 = vrot.slane %v4558_v49, 6  ;;  %v4607_v32 = vsel %vm772_vm12, %v1297_v14, %v1288_v8  ;;  %v4613_v35 = vsel %vm772_vm12, %v1306_v39, %v4479_v10 }
 0x282   : > { %v4577_v11 = vpop.f32.mrb[18].mxu1  ;;  %v1496_v8 = vsel %vm768_vm11, %v1493_v19, %v6234_v48  ;;  %v2297_v14 = vsel %vm772_vm12, %v2294_v50, %v4464_v15  ;;  %v6235_v10 = vrot.slane %v4448_v28, 4  ;;  %v4640_v48 = vrot.slane %v4558_v49, 4 }
 0x283   : > { %v4585_v3 = vpop.f32.mrb[16].mxu0  ;;  %v3094_v57 = vpop.f32.mrb[19].mxu1  ;;  %v4643_v19 = vrot.slane %v4558_v49, 2  ;;  %v4653_v50 = vrot.slane %v4597_v27, 2  ;;  %v4728_v59 = vadd.f32 %v4539_v45, %v3819_v41  ;;  %v2203_v16 = vsel %vm764_vm10, %v4592_v52, %v4518_v53 }
 0x284   : > { %v1937_v43 = vpop.f32.mrb[17].mxu0  ;;  %2144 = vrot.lane.b32.xlu1 %v2103_v1, %s3473_s14  ;;  %v4617_v1 = vsel %vm772_vm12, %v1385_v12, %v4476_v60  ;;  %v4621_v57 = vsel %vm772_vm12, %v1394_v26, %v4424_v44  ;;  %v1494_v39 = vsel %vm768_vm11, %v1491_v55, %v6235_v10  ;;  %v1500_v60 = vsel %vm764_vm10, %v1485_v2, %v4448_v28 }
 0x285   : > { %1319 = vrot.lane.b32.xlu0 %v4492_v36, %s3483_s28  ;;  %v1505_v36 = vsel %vm768_vm11, %v1502_v62, %v1475_v0  ;;  %v4635_v12 = vadd.f32 %v1929_v51, %v3817_v40  ;;  %v2292_v26 = vsel %vm768_vm11, %v2289_v61, %v4592_v52  ;;  %v4646_v0 = vadd.f32 %v1931_v30, %v3817_v40 }
 0x286   : > { %v2195_v51 = vsel %vm764_vm10, %v4558_v49, %v4604_v5  ;;  %v4656_v55 = vsel %vm772_vm12, %v1496_v8, %v1487_v25  ;;  %v4660_v61 = vadd.f32 %v4466_v29, %v3815_v20  ;;  %v6236_v40 = vrot.slane %v4439_v33, 4 }
 0x287   : > { %v1941_v44 = vpop.f32.mrb[18].mxu0  ;;  %v4673_v10 = vrot.slane %v4431_v7, 2  ;;  %v2295_v25 = vsel %vm772_vm12, %v2292_v26, %v4518_v53  ;;  %v4678_v20 = vrot.slane %v4597_v27, 6  ;;  %v4681_v29 = vrot.slane %v4597_v27, 4 }
 0x288   : > { %v1943_v62 = vpop.f32.mrb[19].mxu0  ;;  %2339 = vrot.lane.b32.xlu1 %v2297_v14, %s3471_s12  ;;  %v4667_v30 = vsel %vm772_vm12, %v1505_v36, %v6236_v40  ;;  %v4670_v14 = vsel %vm768_vm11, %v1500_v60, %v1473_v22  ;;  %v4684_v33 = vsel %vm772_vm12, %v1494_v39, %v1485_v2  ;;  %v2204_v22 = vsel %vm764_vm10, %v4643_v19, %v4558_v49 }
 0x289   : > { %1355 = vrot.lane.b32.xlu0 %v4499_v6, %s3483_s28  ;;  %6237 = vst [vmem:[#allocation20_spill] sm:$0xff] %v4670_v14  ;;  %v2198_v6 = vsel %vm768_vm11, %v2195_v51, %v4640_v48  ;;  %v2281_v8 = vsel %vm764_vm10, %v4640_v48, %v4643_v19  ;;  %v4695_v36 = vrot.slane %v4635_v12, 2  ;;  %v2398_v2 = vsel %vm764_vm10, %v4653_v50, %v4597_v27 }
 0x28a   : > { %v4702_v39 = vrot.slane %v4635_v12, 6  ;;  %v4705_v60 = vrot.slane %v4635_v12, 4  ;;  %v4708_v26 = vrot.slane %v4646_v0, 6  ;;  %v4715_v51 = vsel %vm764_vm10, %v4457_v18, %v4673_v10 }
 0x28b   : > { %6238 = vst [vmem:[#allocation21_spill] sm:$0xff] %v4715_v51  ;;  %v4718_v40 = vrot.slane %v4660_v61, 6  ;;  %v4724_v38 = vrot.slane %v4660_v61, 2  ;;  %v2284_v21 = vsel %vm768_vm11, %v2281_v8, %v4558_v49  ;;  %v2484_v4 = vsel %vm764_vm10, %v4678_v20, %v4681_v29 }
 0x28c   : > { %2335 = vrot.lane.b32.xlu1 %v2295_v25, %s3471_s12  ;;  %v4721_v25 = vrot.slane %v4660_v61, 4  ;;  %v2201_v9 = vsel %vm772_vm12, %v2198_v6, %v4643_v19  ;;  %v2401_v34 = vsel %vm768_vm11, %v2398_v2, %v4678_v20  ;;  %v2396_v45 = vsel %vm764_vm10, %v4695_v36, %v4635_v12 }
 0x28d   : > { %1407 = vrot.lane.b32.xlu0 %v4502_v13, %s3484_s7  ;;  %v2207_v13 = vsel %vm768_vm11, %v2204_v22, %v4604_v5  ;;  %v4745_v51 = vrot.slane %v4646_v0, 4  ;;  %v4749_v22 = vadd.f32 %v4577_v11, %v3821_v42  ;;  %v4753_v8 = vadd.f32 %v4585_v3, %v3819_v41 }
 0x28e   : > { %v2482_v6 = vsel %vm764_vm10, %v4702_v39, %v4705_v60  ;;  %v2388_v2 = vsel %vm764_vm10, %v4646_v0, %v4708_v26  ;;  %v4763_v14 = vadd.f32 %v1937_v43, %v3819_v41  ;;  %v2210_v11 = vsel %vm772_vm12, %v2207_v13, %v4640_v48 }
 0x28f   : > { %v2487_v3 = vsel %vm768_vm11, %v2484_v4, %v4653_v50  ;;  %v2404_v28 = vsel %vm772_vm12, %v2401_v34, %v4681_v29  ;;  %v2399_v18 = vsel %vm768_vm11, %v2396_v45, %v4702_v39  ;;  %v4778_v41 = vrot.slane %v4646_v0, 2 }
 0x290   : > { %2217 = vrot.lane.b32.xlu1 %v2201_v9, %s3481_s13  ;;  %v2287_v9 = vsel %vm772_vm12, %v2284_v21, %v4604_v5  ;;  %v2485_v43 = vsel %vm768_vm11, %v2482_v6, %v4695_v36  ;;  %v2391_v21 = vsel %vm768_vm11, %v2388_v2, %v4745_v51  ;;  %v2205_v34 = vsel %vm764_vm10, %v4551_v24, %v4464_v15 }
 0x291   : > { %1443 = vrot.lane.b32.xlu0 %v4522_v58, %s3484_s7  ;;  %v2196_v58 = vsel %vm764_vm10, %v4464_v15, %v4496_v23  ;;  %v4793_v13 = vadd.f32 %v1941_v44, %v3821_v42  ;;  %v2490_v45 = vsel %vm772_vm12, %v2487_v3, %v4597_v27  ;;  %v2208_v2 = vsel %vm768_vm11, %v2205_v34, %v4496_v23 }
 0x292   : > { %v2199_v4 = vsel %vm768_vm11, %v2196_v58, %v4515_v56  ;;  %v4805_v58 = vadd.f32 %v1943_v62, %v3821_v42  ;;  %v4811_v44 = vsel %vm772_vm12, %v2399_v18, %v4705_v60  ;;  %v4818_v3 = vsel %vm772_vm12, %v2208_v2, %v4515_v56 }
 0x293   : > { %v4800_v6 = vsel %vm772_vm12, %v2199_v4, %v4551_v24  ;;  %6240 = vst [vmem:[#allocation23_spill] sm:$0xff] %v4818_v3  ;;  %v4822_v4 = vsel %vm772_vm12, %v2485_v43, %v4635_v12  ;;  %v4826_v42 = vsel %vm772_vm12, %v2391_v21, %v4778_v41  ;;  %v4831_v18 = vsel %vm764_vm10, %v4745_v51, %v4778_v41 }
 0x294   : > { %2251 = vrot.lane.b32.xlu1 %v2210_v11, %s3481_s13  ;;  %6239 = vst [vmem:[#allocation22_spill] sm:$0xff] %v4800_v6  ;;  %v4814_v11 = vrot.slane %v4728_v59, 6  ;;  %v4837_v62 = vrot.slane %v4728_v59, 4  ;;  %v4840_v34 = vrot.slane %v4728_v59, 2  ;;  %v4843_v43 = vrot.slane %v4753_v8, 6 }
 0x295   : > { %1315 = vrot.lane.b32.xlu0 %v4607_v32, %s3483_s28  ;;  %v2282_v32 = vsel %vm764_vm10, %v4515_v56, %v4551_v24  ;;  %v4849_v2 = vrot.slane %v4753_v8, 4  ;;  %v4852_v3 = vrot.slane %v4753_v8, 2  ;;  %v2194_v24 = vsel %vm764_vm10, %v4518_v53, %v4564_v54 }
 0x296   : > { %v2285_v21 = vsel %vm768_vm11, %v2282_v32, %v4464_v15  ;;  %v4864_v15 = vrot.slane %v4763_v14, 6  ;;  %v4870_v32 = vrot.slane %v4763_v14, 2  ;;  %v6210_v6 = vrot.slane %v4793_v13, 2 }
 0x297   : > { %v4856_v56 = vsel %vm772_vm12, %v2285_v21, %v4496_v23  ;;  %v2197_v23 = vsel %vm768_vm11, %v2194_v24, %v4567_v31  ;;  %v6211_v21 = vrot.slane %v4749_v22, 6  ;;  %v2280_v24 = vsel %vm764_vm10, %v4567_v31, %v4592_v52 }
 0x298   : > { %2303 = vrot.lane.b32.xlu1 %v2287_v9, %s3471_s12  ;;  %6241 = vst [vmem:[#allocation24_spill] sm:$0xff] %v4856_v56  ;;  %v4867_v9 = vrot.slane %v4763_v14, 4  ;;  %v2283_v56 = vsel %vm768_vm11, %v2280_v24, %v4518_v53  ;;  %v2290_v7 = vsel %vm764_vm10, %v4604_v5, %v4640_v48  ;;  %v6209_v37 = vrot.slane %v4805_v58, 6  ;;  %v4972_v24 = vpop.permute.xlu0 %1581 }
 0x299   : > { %1351 = vrot.lane.b32.xlu0 %v4613_v35, %s3483_s28  ;;  %v4879_v35 = vsel %vm772_vm12, %v2197_v23, %v4592_v52  ;;  %v2206_v23 = vsel %vm768_vm11, %v2203_v16, %v4564_v54  ;;  %v4907_v52 = vsel %vm772_vm12, %v2283_v56, %v4564_v54  ;;  %v2293_v16 = vsel %vm768_vm11, %v2290_v7, %v4643_v19 }
 0x29a   : > { %v4913_v53 = vsel %vm772_vm12, %v2293_v16, %v4558_v49  ;;  %v2389_v5 = vsel %vm764_vm10, %v4597_v27, %v4678_v20  ;;  %v2387_v54 = vsel %vm764_vm10, %v4635_v12, %v4702_v39  ;;  %v2473_v48 = vsel %vm764_vm10, %v4705_v60, %v4695_v36  ;;  %6242 = vst [vmem:[#allocation25_spill] sm:$0xff] %v4972_v24  ;;  %v5139_v24 = vld [vmem:[%s3626_s26 + $0x38] sm:$0xff] }
 0x29b   : > { %v2390_v49 = vsel %vm768_vm11, %v2387_v54, %v4705_v60  ;;  %v2580_v54 = vsel %vm764_vm10, %v4753_v8, %v4843_v43 }
 0x29c   : > { %2446 = vrot.lane.b32.xlu1 %v2404_v28, %s3470_s11  ;;  %v4903_v28 = vsel %vm772_vm12, %v2206_v23, %v4567_v31  ;;  %v2475_v31 = vsel %vm764_vm10, %v4681_v29, %v4653_v50 }
 0x29d   : > { %1403 = vrot.lane.b32.xlu0 %v4617_v1, %s3484_s7  ;;  %v2392_v1 = vsel %vm768_vm11, %v2389_v5, %v4681_v29  ;;  %v2478_v7 = vsel %vm768_vm11, %v2475_v31, %v4597_v27  ;;  %v4944_v27 = vsel %vm772_vm12, %v2390_v49, %v4695_v36  ;;  %v2476_v29 = vsel %vm768_vm11, %v2473_v48, %v4635_v12 }
 0x29e   : > { %v4936_v19 = vsel %vm772_vm12, %v2392_v1, %v4653_v50  ;;  %v4940_v56 = vsel %vm772_vm12, %v2478_v7, %v4678_v20  ;;  %v4952_v60 = vsel %vm772_vm12, %v2476_v29, %v4702_v39  ;;  %v2397_v50 = vsel %vm764_vm10, %v4778_v41, %v4646_v0  ;;  %v5013_v29 = vpop.permute.xlu1 %1589 }
 0x29f   : > { %v2483_v20 = vsel %vm764_vm10, %v4708_v26, %v4745_v51  ;;  %v2582_v36 = vsel %vm764_vm10, %v4728_v59, %v4814_v11  ;;  %v2400_v12 = vsel %vm768_vm11, %v2397_v50, %v4708_v26  ;;  %v6207_v31 = vrot.slane %v4805_v58, 2  ;;  %6243 = vst [vmem:[#allocation26_spill] sm:$0xff] %v5013_v29  ;;  %v6254_v29 = vld [vmem:[#allocation17_spill] sm:$0xff] }
 0x2a0   : > { %2532 = vrot.lane.b32.xlu1 %v2490_v45, %s3482_s16  ;;  %v2585_v39 = vsel %vm768_vm11, %v2582_v36, %v4837_v62  ;;  %v2668_v45 = vsel %vm764_vm10, %v4837_v62, %v4840_v34  ;;  %v4976_v23 = vsel %vm772_vm12, %v2400_v12, %v4745_v51  ;;  %v2666_v1 = vsel %vm764_vm10, %v4849_v2, %v4852_v3 }
 0x2a1   : > { %1439 = vrot.lane.b32.xlu0 %v4621_v57, %s3484_s7  ;;  %v2486_v57 = vsel %vm768_vm11, %v2483_v20, %v4778_v41  ;;  %v4984_v41 = vsel %vm772_vm12, %v2585_v39, %v4840_v34  ;;  %v2671_v5 = vsel %vm768_vm11, %v2668_v45, %v4728_v59  ;;  %v2669_v7 = vsel %vm768_vm11, %v2666_v1, %v4753_v8 }
 0x2a2   : > { %v4980_v16 = vsel %vm772_vm12, %v2486_v57, %v4646_v0  ;;  %v4993_v51 = vsel %vm772_vm12, %v2671_v5, %v4814_v11  ;;  %v2590_v49 = vsel %vm764_vm10, %v4870_v32, %v4763_v14  ;;  %v2676_v48 = vsel %vm764_vm10, %v4864_v15, %v4867_v9 }
 0x2a3   : > { %v2593_v20 = vsel %vm768_vm11, %v2590_v49, %v4864_v15  ;;  %v2679_v36 = vsel %vm768_vm11, %v2676_v48, %v4870_v32  ;;  %v2775_v45 = vsel %vm764_vm10, %v4749_v22, %v6211_v21  ;;  %v6244_v5 = vrot.slane %v4793_v13, 6 }
 0x2a4   : > { %2442 = vrot.lane.b32.xlu1 %v4811_v44, %s3470_s11  ;;  %v2583_v44 = vsel %vm768_vm11, %v2580_v54, %v4849_v2  ;;  %v5031_v57 = vsel %vm772_vm12, %v2593_v20, %v4867_v9  ;;  %v5035_v39 = vsel %vm772_vm12, %v2679_v36, %v4763_v14  ;;  %v6208_v1 = vrot.slane %v4805_v58, 4 }
 0x2a5   : > { %1516 = vrot.lane.b32.xlu0 %v4656_v55, %s3485_s23  ;;  %v5017_v50 = vsel %vm772_vm12, %v2583_v44, %v4852_v3  ;;  %v5021_v55 = vsel %vm772_vm12, %v2669_v7, %v4843_v43  ;;  %v2773_v54 = vsel %vm764_vm10, %v4793_v13, %v6244_v5  ;;  %v6245_v44 = vrot.slane %v4749_v22, 4 }
 0x2a6   : > { %v6246_v49 = vrot.slane %v4793_v13, 4  ;;  %v2783_v20 = vsel %vm764_vm10, %v6207_v31, %v4805_v58 }
 0x2a7   : > { %v5027_v12 = vpop.permute.xlu0 %822  ;;  %v2778_v7 = vsel %vm768_vm11, %v2775_v45, %v6245_v44  ;;  %v2786_v5 = vsel %vm768_vm11, %v2783_v20, %v6209_v37  ;;  %v6252_v37 = vld [vmem:[#allocation19_spill] sm:$0xff] }
 0x2a8   : > { %2528 = vrot.lane.b32.xlu1 %v4822_v4, %s3482_s16  ;;  %v2776_v48 = vsel %vm768_vm11, %v2773_v54, %v6246_v49  ;;  %v6247_v4 = vrot.slane %v4749_v22, 2  ;;  %v2057_v54 = vsel %vm764_vm10, %v4660_v61, %v4718_v40  ;;  %v5081_v44 = vsel %vm772_vm12, %v2786_v5, %v6208_v1 }
 0x2a9   : > { %1552 = vrot.lane.b32.xlu0 %v4667_v30, %s3485_s23  ;;  %v5068_v45 = vsel %vm772_vm12, %v2776_v48, %v6210_v6  ;;  %6249 = vst [vmem:[#allocation28_spill] sm:$0xff] %v5081_v44  ;;  %v2066_v49 = vsel %vm764_vm10, %v4724_v38, %v4660_v61  ;;  %v2058_v48 = vsel %vm764_vm10, %v4486_v63, %v4506_v47  ;;  %v6255_v44 = vld [vmem:[#allocation18_spill] sm:$0xff] }
 0x2aa   : > { %v5063_v36 = vsel %vm772_vm12, %v2778_v7, %v6247_v4  ;;  %6248 = vst [vmem:[#allocation27_spill] sm:$0xff] %v5068_v45  ;;  %v5076_v30 = vpop.permute.xlu1 %820  ;;  %v2060_v7 = vsel %vm768_vm11, %v2057_v54, %v4721_v25  ;;  %v2477_v4 = vsel %vm768_vm11, %v4831_v18, %v4646_v0  ;;  %v2069_v54 = vsel %vm768_vm11, %v2066_v49, %v4718_v40  ;;  %v5110_v18 = vld [vmem:[%s3626_s26 + $0x30] sm:$0xff]  ;;  %v6258_v45 = vld [vmem:[#allocation20_spill] sm:$0xff] }
 0x2ab   : > { %v5091_v20 = vpop.permute.xlu0 %856  ;;  %v2063_v5 = vsel %vm772_vm12, %v2060_v7, %v4724_v38  ;;  %v2061_v31 = vsel %vm768_vm11, %v2058_v48, %v4509_v46  ;;  %v2591_v1 = vsel %vm764_vm10, %v4840_v34, %v4728_v59  ;;  %v2072_v0 = vsel %vm772_vm12, %v2069_v54, %v4721_v25  ;;  %6250 = vst [vmem:[#allocation29_spill] sm:$0xff] %v5110_v18 }
 0x2ac   : > { %2410 = vrot.lane.b32.xlu1 %v4826_v42, %s3470_s11  ;;  %v2075_v7 = vmul.f32 %v5110_v18, %v2063_v5  ;;  %v2064_v49 = vsel %vm772_vm12, %v2061_v31, %v4512_v17  ;;  %v5118_v42 = vld [vmem:[%s3626_s26 + $0x48] sm:$0xff]  ;;  %v2065_v6 = vsel %vm772_vm12, %v6252_v37, %v4673_v10  ;;  %v2067_v54 = vsel %vm764_vm10, %v4512_v17, %v4486_v63  ;;  %v6253_v5 = vld [vmem:[#allocation15_spill] sm:$0xff] }
 0x2ad   : > { %1512 = vrot.lane.b32.xlu0 %v4684_v33, %s3485_s23  ;;  %6251 = vst [vmem:[#allocation30_spill] sm:$0xff] %v5118_v42  ;;  %v2081_v48 = vmul.f32 %v5118_v42, %v2072_v0  ;;  %v2068_v31 = vsel %vm764_vm10, %v4673_v10, %v6253_v5  ;;  %v2480_v33 = vsel %vm772_vm12, %v2477_v4, %v4708_v26  ;;  %v5151_v4 = vld [vmem:[%s3626_s26 + $0x40] sm:$0xff] }
 0x2ae   : > { %v5130_v21 = vpop.permute.xlu1 %854  ;;  %v2070_v0 = vsel %vm768_vm11, %v2067_v54, %v4506_v47  ;;  %v2071_v37 = vsel %vm768_vm11, %v2068_v31, %v6254_v29  ;;  %v2076_v63 = vmul.f32 %v5139_v24, %v2064_v49  ;;  %v2077_v47 = vmul.f32 %v5151_v4, %v2065_v6  ;;  %v6256_v54 = vld [vmem:[#allocation16_spill] sm:$0xff] }
 0x2af   : > { %v5142_v17 = vpop.permute.xlu0 %818  ;;  %v5144_v42 = vadd.f32 %v2081_v48, %v2075_v7  ;;  %v2073_v18 = vsel %vm772_vm12, %v2070_v0, %v4509_v46  ;;  %v2074_v26 = vsel %vm772_vm12, %v2071_v37, %v6255_v44  ;;  %v6257_v31 = vrot.slane %v6256_v54, 4  ;;  %v5162_v48 = vld [vmem:[%s3626_s26 + $0x50] sm:$0xff]  ;;  %v6259_v0 = vld [vmem:[#allocation21_spill] sm:$0xff]  ;;  %v5173_v37 = vld [vmem:[%s3626_s26 + $0x58] sm:$0xff] }
 0x2b0   : > { %2496 = vrot.lane.b32.xlu1 %v2480_v33, %s3482_s16  ;;  %v2594_v7 = vsel %vm768_vm11, %v2591_v1, %v4814_v11  ;;  %v2082_v46 = vmul.f32 %v5162_v48, %v2073_v18  ;;  %v2092_v6 = vsel %vm768_vm11, %v6259_v0, %v6253_v5  ;;  %v2677_v33 = vsel %vm764_vm10, %v4814_v11, %v4837_v62 }
 0x2b1   : > { %v1506_v49 = vsel %vm772_vm12, %v6258_v45, %v6257_v31  ;;  %v2083_v45 = vmul.f32 %v5173_v37, %v2074_v26  ;;  %v2098_v1 = vsel %vm764_vm10, %v6254_v29, %v6255_v44  ;;  %v2095_v11 = vsel %vm772_vm12, %v2092_v6, %v6254_v29 }
 0x2b2   : > { %1548 = vrot.lane.b32.xlu0 %v1506_v49, %s3485_s23  ;;  %v5176_v54 = vpop.permute.xlu1 %927  ;;  %v5181_v18 = vadd.f32 %v2082_v46, %v2076_v63  ;;  %v2597_v49 = vsel %vm772_vm12, %v2594_v7, %v4837_v62  ;;  %v2680_v26 = vsel %vm768_vm11, %v2677_v33, %v4840_v34  ;;  %v2101_v44 = vsel %vm768_vm11, %v2098_v1, %v4673_v10 }
 0x2b3   : > { %v5183_v31 = vpop.permute.xlu0 %852  ;;  %v5187_v0 = vadd.f32 %v2083_v45, %v2077_v47  ;;  %v2589_v63 = vsel %vm764_vm10, %v4852_v3, %v4753_v8  ;;  %v2087_v47 = vsel %vm764_vm10, %v4721_v25, %v4724_v38  ;;  %v2683_v34 = vsel %vm772_vm12, %v2680_v26, %v4728_v59 }
 0x2b4   : > { %6260 = vst [vmem:[#allocation19_spill] sm:$0xff] %v5181_v18  ;;  %2639 = vrot.lane.b32.xlu1 %v2597_v49, %s3483_s28  ;;  %v2104_v10 = vsel %vm772_vm12, %v2101_v44, %v6253_v5  ;;  %v2592_v29 = vsel %vm768_vm11, %v2589_v63, %v4843_v43  ;;  %v2090_v46 = vsel %vm768_vm11, %v2087_v47, %v4660_v61  ;;  %v6262_v47 = vld [vmem:[#allocation22_spill] sm:$0xff] }
 0x2b5   : > { %6261 = vst [vmem:[#allocation15_spill] sm:$0xff] %v5187_v0  ;;  %v2675_v6 = vsel %vm764_vm10, %v4843_v43, %v4849_v2  ;;  %v2096_v59 = vsel %vm764_vm10, %v4718_v40, %v4721_v25  ;;  %v2595_v5 = vsel %vm772_vm12, %v2592_v29, %v4849_v2  ;;  %v2093_v1 = vsel %vm772_vm12, %v2090_v46, %v4718_v40 }
 0x2b6   : > { %2112 = vrot.lane.b32.xlu0 %v2095_v11, %s3473_s14  ;;  %v5200_v62 = vpop.permute.xlu1 %963  ;;  %v2678_v49 = vsel %vm768_vm11, %v2675_v6, %v4852_v3  ;;  %v2099_v43 = vsel %vm768_vm11, %v2096_v59, %v4724_v38  ;;  %v2581_v25 = vsel %vm764_vm10, %v4763_v14, %v4864_v15  ;;  %v2667_v38 = vsel %vm764_vm10, %v4867_v9, %v4870_v32  ;;  %v6265_v6 = vld [vmem:[#allocation23_spill] sm:$0xff] }
 0x2b7   : > { %v5205_v7 = vpop.permute.xlu0 %929  ;;  %v2681_v26 = vsel %vm772_vm12, %v2678_v49, %v4753_v8  ;;  %v2102_v40 = vsel %vm772_vm12, %v2099_v43, %v4660_v61  ;;  %v2584_v3 = vsel %vm768_vm11, %v2581_v25, %v4867_v9  ;;  %v2670_v61 = vsel %vm768_vm11, %v2667_v38, %v4763_v14 }
 0x2b8   : > { %2725 = vrot.lane.b32.xlu1 %v2683_v34, %s3484_s7  ;;  %v2587_v8 = vsel %vm772_vm12, %v2584_v3, %v4870_v32  ;;  %v6263_v34 = vrot.slane %v4749_v22, 2  ;;  %v2673_v32 = vsel %vm772_vm12, %v2670_v61, %v4864_v15  ;;  %v6264_v46 = vrot.slane %v4749_v22, 6 }
 0x2b9   : > { %v6266_v59 = vrot.slane %v4793_v13, 2  ;;  %v6267_v15 = vrot.slane %v4749_v22, 4  ;;  %v6268_v25 = vrot.slane %v4793_v13, 6  ;;  %v6270_v3 = vrot.slane %v4805_v58, 6 }
 0x2ba   : > { %2146 = vrot.lane.b32.xlu0 %v2104_v10, %s3473_s14  ;;  %v5220_v33 = vpop.permute.xlu1 %1015  ;;  %v2784_v9 = vsel %vm764_vm10, %v6263_v34, %v4749_v22  ;;  %v6271_v22 = vrot.slane %v4793_v13, 4  ;;  %v6272_v34 = vrot.slane %v4805_v58, 4 }
 0x2bb   : > { %v5225_v45 = vpop.permute.xlu0 %965  ;;  %v2787_v14 = vsel %vm768_vm11, %v2784_v9, %v6264_v46  ;;  %v2774_v38 = vsel %vm764_vm10, %v4805_v58, %v6270_v3 }
 0x2bc   : > { %2635 = vrot.lane.b32.xlu1 %v2595_v5, %s3483_s28  ;;  %v2782_v5 = vsel %vm764_vm10, %v6266_v59, %v4793_v13  ;;  %v2790_v43 = vsel %vm772_vm12, %v2787_v14, %v6267_v15  ;;  %v2777_v9 = vsel %vm768_vm11, %v2774_v38, %v6272_v34  ;;  %v6273_v14 = vrot.slane %v4805_v58, 2  ;;  %v6274_v13 = vld [vmem:[#allocation11_spill] sm:$0xff]  ;;  %v6275_v58 = vld [vmem:[#allocation12_spill] sm:$0xff] }
 0x2bd   : > { %v829_v59 = vmul.f32 %v6274_v13, %v5142_v17  ;;  %vm1597_vm10 = vcmask 244736  }
 0x2be   : > { %2108 = vrot.lane.b32.xlu0 %v2093_v1, %s3473_s14  ;;  %v5240_v11 = vpop.permute.xlu1 %1049 }
 0x2bf   : > { %v5242_v2 = vpop.permute.xlu0 %1017 }
 0x2c0   : > { %2721 = vrot.lane.b32.xlu1 %v2681_v26, %s3484_s7  ;;  %v2785_v26 = vsel %vm768_vm11, %v2782_v5, %v6268_v25 }
 0x2c2   : > { %2142 = vrot.lane.b32.xlu0 %v2102_v40, %s3473_s14  ;;  %v5255_v44 = vpop.permute.xlu1 %1122  ;;  %v6269_v40 = vld [vmem:[#allocation24_spill] sm:$0xff]  ;;  %s3488_s14 = smov 92  }
 0x2c3   : > { %v5257_v63 = vpop.permute.xlu0 %1051 }
 0x2c4   : > { %2603 = vrot.lane.b32.xlu1 %v2587_v8, %s3483_s28 }
 0x2c6   : > { %2219 = vrot.lane.b32.xlu0 %v6262_v47, %s3481_s13  ;;  %v5270_v10 = vpop.permute.xlu1 %1156  ;;  %v2788_v47 = vsel %vm772_vm12, %v2785_v26, %v6271_v22  ;;  %v6276_v26 = vld [vmem:[#allocation8_spill] sm:$0xff] }
 0x2c7   : > { %v5272_v29 = vpop.permute.xlu0 %925 }
 0x2c8   : > { %2689 = vrot.lane.b32.xlu1 %v2673_v32, %s3484_s7 }
 0x2ca   : > { %2253 = vrot.lane.b32.xlu0 %v6265_v6, %s3481_s13  ;;  %v5286_v1 = vpop.permute.xlu1 %1208  ;;  %v2780_v6 = vsel %vm772_vm12, %v2777_v9, %v6273_v14 }
 0x2cb   : > { %v5288_v49 = vpop.permute.xlu0 %961 }
 0x2cc   : > { %2832 = vrot.lane.b32.xlu1 %v2790_v43, %s3485_s23  ;;  %v825_v43 = vsel %vm319_vm3, %v5076_v30, %v5027_v12  ;;  %v6277_v12 = vld [vmem:[#allocation9_spill] sm:$0xff] }
 0x2ce   : > { %2305 = vrot.lane.b32.xlu0 %v6269_v40, %s3471_s12  ;;  %v5303_v8 = vpop.permute.xlu1 %1244  ;;  %v831_v40 = vmul.f32 %v6276_v26, %v825_v43 }
 0x2cf   : > { %v5305_v61 = vpop.permute.xlu0 %1013 }
 0x2d0   : > { %2828 = vrot.lane.b32.xlu1 %v2788_v47, %s3485_s23 }
 0x2d2   : > { %2215 = vrot.lane.b32.xlu0 %v4879_v35, %s3481_s13  ;;  %v5316_v32 = vpop.permute.xlu1 %1317  ;;  %v863_v35 = vmul.f32 %v6275_v58, %v5183_v31 }
 0x2d3   : > { %v5318_v46 = vpop.permute.xlu0 %1047 }
 0x2d4   : > { %2796 = vrot.lane.b32.xlu1 %v2780_v6, %s3485_s23 }
 0x2d6   : > { %2249 = vrot.lane.b32.xlu0 %v4903_v28, %s3481_s13  ;;  %v5328_v5 = vpop.permute.xlu1 %1353 }
 0x2d7   : > { %v5330_v15 = vpop.permute.xlu0 %1124 }
 0x2d8   : > { %835 = vrot.lane.b32.xlu1 %v829_v59, %s3474_s15 }
 0x2da   : > { %2301 = vrot.lane.b32.xlu0 %v4907_v52, %s3471_s12  ;;  %v5342_v25 = vpop.permute.xlu1 %1405  ;;  %v859_v52 = vsel %vm319_vm3, %v5130_v21, %v5091_v20 }
 0x2db   : > { %v5340_v28 = vpop.permute.xlu0 %1158  ;;  %v865_v38 = vmul.f32 %v6277_v12, %v859_v52 }
 0x2dc   : > { %869 = vrot.lane.b32.xlu1 %v863_v35, %s3474_s15 }
 0x2de   : > { %2337 = vrot.lane.b32.xlu0 %v4913_v53, %s3471_s12  ;;  %v5357_v22 = vpop.permute.xlu1 %1441  ;;  %v937_v53 = vmul.f32 %v6274_v13, %v5272_v29  ;;  %s3486_s12 = smov 126  }
 0x2df   : > { %v5351_v3 = vpop.permute.xlu0 %1210 }
 0x2e0   : > { %839 = vrot.lane.b32.xlu1 %v831_v40, %s3474_s15 }
 0x2e2   : > { %2412 = vrot.lane.b32.xlu0 %v4936_v19, %s3470_s11  ;;  %v5368_v34 = vpop.permute.xlu1 %1514  ;;  %v972_v19 = vmul.f32 %v6275_v58, %v5288_v49 }
 0x2e3   : > { %v5359_v47 = vpop.permute.xlu0 %1246 }
 0x2e4   : > { %873 = vrot.lane.b32.xlu1 %v865_v38, %s3474_s15 }
 0x2e6   : > { %2498 = vrot.lane.b32.xlu0 %v4940_v56, %s3482_s16  ;;  %v1024_v56 = vmul.f32 %v6274_v13, %v5305_v61  ;;  %v5382_v14 = vpop.permute.xlu1 %1550 }
 0x2e7   : > { %v5366_v20 = vpop.permute.xlu0 %1120 }
 0x2e8   : > { %943 = vrot.lane.b32.xlu1 %v937_v53, %s3486_s12 }
 0x2ea   : > { %2408 = vrot.lane.b32.xlu0 %v4944_v27, %s3470_s11  ;;  %v1058_v27 = vmul.f32 %v6275_v58, %v5318_v46 }
 0x2eb   : > { %v5375_v9 = vpop.permute.xlu0 %1154 }
 0x2ec   : > { %978 = vrot.lane.b32.xlu1 %v972_v19, %s3486_s12 }
 0x2ee   : > { %2494 = vrot.lane.b32.xlu0 %v4952_v60, %s3482_s16  ;;  %v933_v60 = vsel %vm931_vm13, %v5176_v54, %v5205_v7 }
 0x2ef   : > { %v5384_v6 = vpop.permute.xlu0 %1206  ;;  %v939_v43 = vmul.f32 %v6276_v26, %v933_v60 }
 0x2f0   : > { %1030 = vrot.lane.b32.xlu1 %v1024_v56, %s3476_s6 }
 0x2f2   : > { %2444 = vrot.lane.b32.xlu0 %v4976_v23, %s3470_s11  ;;  %v5391_v59 = vpop.permute.xlu1 %2110  ;;  %v968_v23 = vsel %vm931_vm13, %v5200_v62, %v5225_v45  ;;  %s3487_s11 = smov 108  }
 0x2f3   : > { %v5396_v35 = vpop.permute.xlu0 %1242  ;;  %v974_v7 = vmul.f32 %v6277_v12, %v968_v23 }
 0x2f4   : > { %1064 = vrot.lane.b32.xlu1 %v1058_v27, %s3476_s6 }
 0x2f6   : > { %2530 = vrot.lane.b32.xlu0 %v4980_v16, %s3482_s16  ;;  %v5402_v40 = vpop.permute.xlu1 %2144  ;;  %v1020_v16 = vsel %vm289_vm1, %v5220_v33, %v5242_v2 }
 0x2f7   : > { %v5407_v52 = vpop.permute.xlu0 %1319  ;;  %v1026_v45 = vmul.f32 %v6276_v26, %v1020_v16 }
 0x2f8   : > { %947 = vrot.lane.b32.xlu1 %v939_v43, %s3486_s12 }
 0x2fa   : > { %2605 = vrot.lane.b32.xlu0 %v4984_v41, %s3483_s28  ;;  %v5413_v38 = vpop.permute.xlu1 %2339  ;;  %v1054_v41 = vsel %vm289_vm1, %v5240_v11, %v5257_v63  ;;  %v1131_v63 = vmul.f32 %v6274_v13, %v5366_v20 }
 0x2fb   : > { %v5418_v53 = vpop.permute.xlu0 %1355  ;;  %v1060_v2 = vmul.f32 %v6277_v12, %v1054_v41  ;;  %v5482_v41 = vld [vmem:[%s3626_s26 + $0x10] sm:$0xff] }
 0x2fc   : > { %982 = vrot.lane.b32.xlu1 %v974_v7, %s3486_s12 }
 0x2fe   : > { %2691 = vrot.lane.b32.xlu0 %v4993_v51, %s3484_s7  ;;  %v5424_v19 = vpop.permute.xlu1 %2335 }
 0x2ff   : > { %v5429_v56 = vpop.permute.xlu0 %1407 }
 0x300   : > { %1034 = vrot.lane.b32.xlu1 %v1026_v45, %s3476_s6  ;;  %v6278_v45 = vld [vmem:[#allocation27_spill] sm:$0xff] }
 0x302   : > { %2601 = vrot.lane.b32.xlu0 %v5017_v50, %s3483_s28  ;;  %v5435_v27 = vpop.permute.xlu1 %2217  ;;  %v1165_v50 = vmul.f32 %v6275_v58, %v5375_v9 }
 0x303   : > { %v5437_v51 = vpop.permute.xlu0 %1443 }
 0x304   : > { %1068 = vrot.lane.b32.xlu1 %v1060_v2, %s3476_s6 }
 0x306   : > { %2687 = vrot.lane.b32.xlu0 %v5021_v55, %s3484_s7  ;;  %v5444_v26 = vpop.permute.xlu1 %2251  ;;  %v1218_v55 = vmul.f32 %v6274_v13, %v5384_v6 }
 0x307   : > { %v5446_v60 = vpop.permute.xlu0 %1315 }
 0x308   : > { %1137 = vrot.lane.b32.xlu1 %v1131_v63, %s3477_s8 }
 0x30a   : > { %2637 = vrot.lane.b32.xlu0 %v5031_v57, %s3483_s28  ;;  %v5453_v12 = vpop.permute.xlu1 %2303  ;;  %v1253_v57 = vmul.f32 %v6275_v58, %v5396_v35  ;;  %v1161_v58 = vsel %vm274_vm0, %v5270_v10, %v5340_v28  ;;  %v5505_v28 = vld [vmem:[%s3626_s26 + $0x8] sm:$0xff] }
 0x30b   : > { %v5455_v43 = vpop.permute.xlu0 %1351 }
 0x30c   : > { %1171 = vrot.lane.b32.xlu1 %v1165_v50, %s3477_s8  ;;  %v6279_v50 = vld [vmem:[#allocation28_spill] sm:$0xff] }
 0x30e   : > { %2723 = vrot.lane.b32.xlu0 %v5035_v39, %s3484_s7  ;;  %v5462_v23 = vpop.permute.xlu1 %2446  ;;  %v1127_v39 = vsel %vm274_vm0, %v5255_v44, %v5330_v15  ;;  %v824_v15 = vsel %vm319_vm3, %v5142_v17, %v5076_v30  ;;  %v1214_v30 = vsel %vm1212_vm14, %v5286_v1, %v5351_v3  ;;  %v1249_v3 = vsel %vm1212_vm14, %v5303_v8, %v5359_v47  ;;  %s3491_s7 = smov [#allocation5]  }
 0x30f   : > { %v5464_v7 = vpop.permute.xlu0 %1403  ;;  %v967_v47 = vsel %vm931_vm13, %v5288_v49, %v5200_v62  ;;  %v5562_v62 = vld [vmem:[%s3626_s26 + $0x18] sm:$0xff] }
 0x310   : > { %1224 = vrot.lane.b32.xlu1 %v1218_v55, %s3487_s11  ;;  %v5499_v55 = vld [vmem:[%s3626_s26 + $0x28] sm:$0xff]  ;;  %v1362_v49 = vmul.f32 %v5562_v62, %v5455_v43 }
 0x312   : > { %2798 = vrot.lane.b32.xlu0 %v5063_v36, %s3485_s23  ;;  %v5471_v16 = vpop.permute.xlu1 %2532  ;;  %v1133_v36 = vmul.f32 %v5482_v41, %v1127_v39 }
 0x313   : > { %v5476_v13 = vpop.permute.xlu0 %1439 }
 0x314   : > { %1259 = vrot.lane.b32.xlu1 %v1253_v57, %s3487_s11  ;;  %v1167_v57 = vmul.f32 %v5499_v55, %v1161_v58  ;;  %v1220_v58 = vmul.f32 %v5482_v41, %v1214_v30 }
 0x316   : > { %2794 = vrot.lane.b32.xlu0 %v6278_v45, %s3485_s23  ;;  %v5485_v2 = vpop.permute.xlu1 %2442  ;;  %v830_v45 = vmul.f32 %v5505_v28, %v824_v15  ;;  %v5522_v15 = vld [vmem:[%s3626_s26 + $0x20] sm:$0xff] }
 0x317   : > { %v5490_v63 = vpop.permute.xlu0 %1516 }
 0x318   : > { %1141 = vrot.lane.b32.xlu1 %v1133_v36, %s3477_s8  ;;  %v858_v36 = vsel %vm319_vm3, %v5183_v31, %v5130_v21  ;;  %v932_v21 = vsel %vm931_vm13, %v5272_v29, %v5176_v54  ;;  %v1255_v31 = vmul.f32 %v5499_v55, %v1249_v3  ;;  %v5547_v54 = vld [vmem:[%s3626_s26] sm:$0xff]  ;;  %v1019_v3 = vsel %vm289_vm1, %v5305_v61, %v5220_v33  ;;  %s3489_s26 = smov 91  }
 0x319   : > { %v864_v18 = vmul.f32 %v5522_v15, %v858_v36  ;;  %v973_v36 = vmul.f32 %v5522_v15, %v967_v47  ;;  %v1053_v33 = vsel %vm289_vm1, %v5318_v46, %v5240_v11  ;;  %v1415_v61 = vmul.f32 %v5547_v54, %v5464_v7 }
 0x31a   : > { %2830 = vrot.lane.b32.xlu0 %v6279_v50, %s3485_s23  ;;  %v5502_v39 = vpop.permute.xlu1 %2528  ;;  %v1450_v11 = vmul.f32 %v5562_v62, %v5476_v13  ;;  %s3402_s23 = sshll.u32 %s3491_s7, 4  ;;  %s3403_s23 = int_to_ptr.vmem [resolvable:$false] %s3402_s23 }
 0x31b   : > { %v5511_v17 = vpop.permute.xlu0 %1552 }
 0x31c   : > { %1175 = vrot.lane.b32.xlu1 %v1167_v57, %s3477_s8 }
 0x31e   : > { %837 = vrot.lane.b32.xlu0 %v830_v45, %s3474_s15  ;;  %v5519_v50 = vpop.permute.xlu1 %2410  ;;  %v938_v45 = vmul.f32 %v5505_v28, %v932_v21 }
 0x31f   : > { %v5528_v0 = vpop.permute.xlu0 %1512 }
 0x320   : > { %1228 = vrot.lane.b32.xlu1 %v1220_v58, %s3487_s11 }
 0x322   : > { %871 = vrot.lane.b32.xlu0 %v864_v18, %s3474_s15  ;;  %v5536_v57 = vpop.permute.xlu1 %2496  ;;  %v1327_v18 = vmul.f32 %v5547_v54, %v5446_v60 }
 0x324   : > { %v5539_v30 = vpop.permute.xlu0 %1548  ;;  %1263 = vrot.lane.b32.xlu1 %v1255_v31, %s3487_s11  ;;  %v1025_v31 = vmul.f32 %v5505_v28, %v1019_v3  ;;  %v1126_v3 = vsel %vm274_vm0, %v5366_v20, %v5255_v44  ;;  %v1160_v44 = vsel %vm274_vm0, %v5375_v9, %v5270_v10  ;;  %v1213_v10 = vsel %vm1212_vm14, %v5384_v6, %v5286_v1 }
 0x325   : > { %v1248_v1 = vsel %vm1212_vm14, %v5396_v35, %v5303_v8  ;;  %v1322_v8 = vsel %vm1321_vm15, %v5446_v60, %v5316_v32 }
 0x326   : > { %945 = vrot.lane.b32.xlu0 %v938_v45, %s3486_s12  ;;  %v5551_v29 = vpop.permute.xlu1 %2639 }
 0x328   : > { %v5554_v58 = vpop.permute.xlu0 %2112  ;;  %1333 = vrot.lane.b32.xlu1 %v1327_v18, %s3488_s14  ;;  %v1059_v18 = vmul.f32 %v5522_v15, %v1053_v33 }
 0x32a   : > { %980 = vrot.lane.b32.xlu0 %v973_v36, %s3486_s12  ;;  %v5566_v21 = vpop.permute.xlu1 %2725 }
 0x32c   : > { %v5569_v45 = vpop.permute.xlu0 %2146  ;;  %1368 = vrot.lane.b32.xlu1 %v1362_v49, %s3488_s14  ;;  %v1132_v49 = vmul.f32 %v5505_v28, %v1126_v3 }
 0x32e   : > { %1032 = vrot.lane.b32.xlu0 %v1025_v31, %s3476_s6  ;;  %v5578_v47 = vpop.permute.xlu1 %2635  ;;  %v1323_v31 = vsel %vm1321_vm15, %v5316_v32, %v5407_v52  ;;  %v1358_v52 = vsel %vm1321_vm15, %v5328_v5, %v5418_v53  ;;  %v1411_v53 = vsel %vm1409_vm2, %v5342_v25, %v5429_v56  ;;  %v1446_v56 = vsel %vm1409_vm2, %v5357_v22, %v5437_v51 }
 0x32f   : > { %v1329_v20 = vmul.f32 %v5482_v41, %v1323_v31  ;;  %v1364_v9 = vmul.f32 %v5499_v55, %v1358_v52  ;;  %v1417_v6 = vmul.f32 %v5482_v41, %v1411_v53  ;;  %v1452_v35 = vmul.f32 %v5499_v55, %v1446_v56 }
 0x330   : > { %v5581_v36 = vpop.permute.xlu0 %2108  ;;  %1421 = vrot.lane.b32.xlu1 %v1415_v61, %s3489_s26  ;;  %v1357_v51 = vsel %vm1321_vm15, %v5455_v43, %v5328_v5  ;;  %v1524_v32 = vmul.f32 %v5547_v54, %v5528_v0  ;;  %v1559_v5 = vmul.f32 %v5562_v62, %v5539_v30 }
 0x332   : > { %1066 = vrot.lane.b32.xlu0 %v1059_v18, %s3476_s6  ;;  %v5590_v46 = vpop.permute.xlu1 %2721  ;;  %v1166_v18 = vmul.f32 %v5522_v15, %v1160_v44 }
 0x334   : > { %v5596_v33 = vpop.permute.xlu0 %2142  ;;  %1456 = vrot.lane.b32.xlu1 %v1450_v11, %s3489_s26 }
 0x336   : > { %1139 = vrot.lane.b32.xlu0 %v1132_v49, %s3477_s8  ;;  %v5604_v61 = vpop.permute.xlu1 %2603  ;;  %v1219_v49 = vmul.f32 %v5505_v28, %v1213_v10  ;;  %v1328_v10 = vmul.f32 %v5505_v28, %v1322_v8 }
 0x338   : > { %v5610_v3 = vpop.permute.xlu0 %2219  ;;  %1337 = vrot.lane.b32.xlu1 %v1329_v20, %s3488_s14  ;;  %v1254_v20 = vmul.f32 %v5522_v15, %v1248_v1  ;;  %v1410_v1 = vsel %vm1409_vm2, %v5464_v7, %v5342_v25  ;;  %v1445_v25 = vsel %vm1409_vm2, %v5476_v13, %v5357_v22  ;;  %v1519_v22 = vsel %vm1518_vm5, %v5528_v0, %v5368_v34  ;;  %v6280_v0 = vld [vmem:[#allocation29_spill] sm:$0xff] }
 0x339   : > { %v1416_v54 = vmul.f32 %v5505_v28, %v1410_v1  ;;  %v1451_v56 = vmul.f32 %v5522_v15, %v1445_v25  ;;  %v2115_v1 = vsel %vm319_vm3, %v5391_v59, %v5554_v58 }
 0x33a   : > { %1173 = vrot.lane.b32.xlu0 %v1166_v18, %s3477_s8  ;;  %v5618_v11 = vpop.permute.xlu1 %2689 }
 0x33c   : > { %v5624_v31 = vpop.permute.xlu0 %2253  ;;  %1372 = vrot.lane.b32.xlu1 %v1364_v9, %s3488_s14 }
 0x33e   : > { %1226 = vrot.lane.b32.xlu0 %v1219_v49, %s3487_s11  ;;  %v5632_v44 = vpop.permute.xlu1 %2832  ;;  %v1363_v49 = vmul.f32 %v5522_v15, %v1357_v51 }
 0x340   : > { %v5638_v18 = vpop.permute.xlu0 %2305  ;;  %1425 = vrot.lane.b32.xlu1 %v1417_v6, %s3489_s26  ;;  %v1520_v6 = vsel %vm1518_vm5, %v5368_v34, %v5490_v63  ;;  %v1555_v63 = vsel %vm1518_vm5, %v5382_v14, %v5511_v17  ;;  %v1554_v17 = vsel %vm1518_vm5, %v5539_v30, %v5382_v14  ;;  %v2119_v34 = vmul.f32 %v6280_v0, %v5581_v36  ;;  %v6281_v14 = vld [vmem:[#allocation30_spill] sm:$0xff] }
 0x341   : > { %v1526_v7 = vmul.f32 %v5482_v41, %v1520_v6  ;;  %v1561_v13 = vmul.f32 %v5499_v55, %v1555_v63  ;;  %v1560_v55 = vmul.f32 %v5522_v15, %v1554_v17  ;;  %v2153_v30 = vmul.f32 %v6281_v14, %v5596_v33 }
 0x342   : > { %1261 = vrot.lane.b32.xlu0 %v1254_v20, %s3487_s11  ;;  %v5646_v52 = vpop.permute.xlu1 %2828 }
 0x344   : > { %v5649_v9 = vpop.permute.xlu0 %2215  ;;  %1460 = vrot.lane.b32.xlu1 %v1452_v35, %s3489_s26  ;;  %v1525_v35 = vmul.f32 %v5505_v28, %v1519_v22  ;;  %v2114_v28 = vsel %vm319_vm3, %v5581_v36, %v5391_v59  ;;  %v2148_v36 = vsel %vm319_vm3, %v5596_v33, %v5402_v40  ;;  %v2149_v59 = vsel %vm319_vm3, %v5402_v40, %v5569_v45 }
 0x345   : > { %v2120_v15 = vmul.f32 %v5139_v24, %v2114_v28  ;;  %v2154_v58 = vmul.f32 %v5162_v48, %v2148_v36  ;;  %v2155_v33 = vmul.f32 %v5173_v37, %v2149_v59  ;;  %v2221_v40 = vsel %vm931_vm13, %v5649_v9, %v5435_v27 }
 0x346   : > { %1335 = vrot.lane.b32.xlu0 %v1328_v10, %s3488_s14  ;;  %v5658_v60 = vpop.permute.xlu1 %2796  ;;  %v2226_v45 = vmul.f32 %v6280_v0, %v5649_v9  ;;  %v2308_v36 = vsel %vm289_vm1, %v5453_v12, %v5638_v18  ;;  %vm1339_vm3 = vcmask 752640  }
 0x348   : > { %v5661_v53 = vpop.permute.xlu0 %2249  ;;  %1530 = vrot.lane.b32.xlu1 %v1524_v32, %s3490_s25 }
 0x349   : > { %v2255_v17 = vsel %vm931_vm13, %v5661_v53, %v5444_v26  ;;  %v2260_v9 = vmul.f32 %v6281_v14, %v5661_v53  ;;  %v2346_v53 = vmul.f32 %v6281_v14, %v5424_v19 }
 0x34a   : > { %1370 = vrot.lane.b32.xlu0 %v1363_v49, %s3488_s14  ;;  %v5670_v43 = vpop.permute.xlu1 %835 }
 0x34c   : > { %v5676_v20 = vpop.permute.xlu0 %2301  ;;  %1565 = vrot.lane.b32.xlu1 %v1559_v5, %s3490_s25 }
 0x34e   : > { %1423 = vrot.lane.b32.xlu0 %v1416_v54, %s3489_s26  ;;  %v5684_v62 = vpop.permute.xlu1 %869  ;;  %v2121_v54 = vmul.f32 %v5151_v4, %v2115_v1 }
 0x350   : > { %v5690_v8 = vpop.permute.xlu0 %2337  ;;  %1534 = vrot.lane.b32.xlu1 %v1526_v7, %s3490_s25 }
 0x352   : > { %1458 = vrot.lane.b32.xlu0 %v1451_v56, %s3489_s26  ;;  %v5698_v41 = vpop.permute.xlu1 %839  ;;  %v2312_v56 = vmul.f32 %v6280_v0, %v5676_v20 }
 0x354   : > { %v5701_v10 = vpop.permute.xlu0 %2412  ;;  %1569 = vrot.lane.b32.xlu1 %v1561_v13, %s3490_s25  ;;  %v2227_v13 = vmul.f32 %v5139_v24, %v2221_v40  ;;  %v2341_v40 = vsel %vm289_vm1, %v5424_v19, %v5690_v8 }
 0x356   : > { %1532 = vrot.lane.b32.xlu0 %v1525_v35, %s3490_s25  ;;  %v5710_v51 = vpop.permute.xlu1 %873 }
 0x358   : > { %v5713_v32 = vpop.permute.xlu0 %2498  ;;  %2125 = vrot.lane.b32.xlu1 %v2119_v34, %s3474_s15  ;;  %v6282_v34 = vld [vmem:[#allocation10_spill] sm:$0xff] }
 0x35a   : > { %1567 = vrot.lane.b32.xlu0 %v1560_v55, %s3490_s25  ;;  %v5722_v49 = vpop.permute.xlu1 %943  ;;  %v848_v55 = vadd.f32 %v5698_v41, %v6282_v34 }
 0x35c   : > { %v5728_v5 = vpop.permute.xlu0 %2408  ;;  %2159 = vrot.lane.b32.xlu1 %v2153_v30, %s3474_s15  ;;  %v2261_v30 = vmul.f32 %v5162_v48, %v2255_v17  ;;  %v882_v1 = vadd.f32 %v5710_v51, %v848_v55  ;;  %v2307_v55 = vsel %vm289_vm1, %v5676_v20, %v5453_v12 }
 0x35e   : > { %2127 = vrot.lane.b32.xlu0 %v2120_v15, %s3474_s15  ;;  %v5736_v6 = vpop.permute.xlu1 %978 }
 0x360   : > { %v5742_v25 = vpop.permute.xlu0 %2494  ;;  %2129 = vrot.lane.b32.xlu1 %v2121_v54, %s3474_s15 }
 0x361   : > { %v2505_v12 = vmul.f32 %v6280_v0, %v5742_v25 }
 0x362   : > { %2161 = vrot.lane.b32.xlu0 %v2154_v58, %s3474_s15  ;;  %v5747_v7 = vpop.permute.xlu1 %1030  ;;  %v2222_v58 = vsel %vm931_vm13, %v5435_v27, %v5610_v3  ;;  %v2256_v27 = vsel %vm931_vm13, %v5444_v26, %v5624_v31  ;;  %v2347_v3 = vmul.f32 %v5162_v48, %v2341_v40  ;;  %v2313_v31 = vmul.f32 %v5139_v24, %v2307_v55 }
 0x363   : > { %v2262_v19 = vmul.f32 %v5173_v37, %v2256_v27  ;;  %v2501_v27 = vsel %vm1212_vm14, %v5536_v57, %v5713_v32  ;;  %v2414_v55 = vsel %vm274_vm0, %v5728_v5, %v5519_v50 }
 0x364   : > { %v5751_v63 = vpop.permute.xlu0 %2444  ;;  %2163 = vrot.lane.b32.xlu1 %v2155_v33, %s3474_s15  ;;  %v2314_v33 = vmul.f32 %v5151_v4, %v2308_v36  ;;  %v2415_v36 = vsel %vm274_vm0, %v5519_v50, %v5701_v10  ;;  %v2453_v10 = vmul.f32 %v6281_v14, %v5485_v2  ;;  %s3154_s15 = smul.u32 48, %s3622_s17 }
 0x366   : > { %2318 = vrot.lane.b32.xlu0 %v2312_v56, %s3476_s6  ;;  %v5760_v22 = vpop.permute.xlu1 %1064 }
 0x368   : > { %v5763_v35 = vpop.permute.xlu0 %2530  ;;  %2232 = vrot.lane.b32.xlu1 %v2226_v45, %s3486_s12  ;;  %v2228_v45 = vmul.f32 %v5151_v4, %v2222_v58  ;;  %v2421_v58 = vmul.f32 %v5151_v4, %v2415_v36 }
 0x369   : > { %v2534_v32 = vsel %vm1212_vm14, %v5502_v39, %v5763_v35 }
 0x36a   : > { %2234 = vrot.lane.b32.xlu0 %v2227_v13, %s3486_s12  ;;  %v5774_v28 = vpop.permute.xlu1 %947  ;;  %v2540_v50 = vmul.f32 %v5162_v48, %v2534_v32 }
 0x36b   : > { %v957_v54 = vadd.f32 %v5774_v28, %v882_v1  ;;  %v2342_v1 = vsel %vm289_vm1, %v5690_v8, %v5413_v38  ;;  %v2448_v8 = vsel %vm274_vm0, %v5485_v2, %v5751_v63  ;;  %v2507_v2 = vmul.f32 %v5151_v4, %v2501_v27 }
 0x36c   : > { %v5778_v15 = vpop.permute.xlu0 %2605  ;;  %2266 = vrot.lane.b32.xlu1 %v2260_v9, %s3486_s12  ;;  %v2419_v9 = vmul.f32 %v6280_v0, %v5728_v5  ;;  %v2454_v40 = vmul.f32 %v5162_v48, %v2448_v8  ;;  %vm1230_vm1 = vcmask 883712  }
 0x36e   : > { %2268 = vrot.lane.b32.xlu0 %v2261_v30, %s3486_s12  ;;  %v5788_v59 = vpop.permute.xlu1 %982 }
 0x36f   : > { %v5795_v56 = vadd.f32 %v5788_v59, %v957_v54  ;;  %v2348_v54 = vmul.f32 %v5173_v37, %v2342_v1 }
 0x370   : > { %v5797_v18 = vpop.permute.xlu0 %2691  ;;  %2352 = vrot.lane.b32.xlu1 %v2346_v53, %s3476_s6 }
 0x372   : > { %2322 = vrot.lane.b32.xlu0 %v2314_v33, %s3476_s6  ;;  %v5805_v13 = vpop.permute.xlu1 %1034 }
 0x374   : > { %v5811_v17 = vpop.permute.xlu0 %2601  ;;  %2236 = vrot.lane.b32.xlu1 %v2228_v45, %s3486_s12 }
 0x376   : > { %2354 = vrot.lane.b32.xlu0 %v2347_v3, %s3476_s6  ;;  %v5816_v34 = vpop.permute.xlu1 %1068  ;;  %v2539_v3 = vmul.f32 %v6281_v14, %v5502_v39 }
 0x378   : > { %v5823_v26 = vpop.permute.xlu0 %2687  ;;  %2270 = vrot.lane.b32.xlu1 %v2262_v19, %s3486_s12  ;;  %s3404_s12 = scalar_lea.vmem %s3403_s23, 1536 }
 0x37a   : > { %2425 = vrot.lane.b32.xlu0 %v2419_v9, %s3477_s8  ;;  %v5828_v30 = vpop.permute.xlu1 %1137 }
 0x37c   : > { %v5835_v20 = vpop.permute.xlu0 %2637  ;;  %2320 = vrot.lane.b32.xlu1 %v2313_v31, %s3476_s6  ;;  %v2420_v31 = vmul.f32 %v5139_v24, %v2414_v55 }
 0x37e   : > { %2511 = vrot.lane.b32.xlu0 %v2505_v12, %s3487_s11  ;;  %v5843_v53 = vpop.permute.xlu1 %1171  ;;  %v2449_v12 = vsel %vm274_vm0, %v5751_v63, %v5462_v23  ;;  %vm949_vm0 = vcmask 1031168  }
 0x37f   : > { %v2455_v39 = vmul.f32 %v5173_v37, %v2449_v12 }
 0x380   : > { %v5846_v38 = vpop.permute.xlu0 %2723  ;;  %2356 = vrot.lane.b32.xlu1 %v2348_v54, %s3476_s6  ;;  %v2500_v54 = vsel %vm1212_vm14, %v5742_v25, %v5536_v57  ;;  %v2698_v57 = vmul.f32 %v6280_v0, %v5823_v26  ;;  %s6079_s6 = scalar_lea.vmem [#allocation5], %s3154_s15 }
 0x381   : > { %v2506_v63 = vmul.f32 %v5139_v24, %v2500_v54  ;;  %s2884_s9 = sshll.u32 %s6079_s6, 4  ;;  %s6138_s9 = int_to_ptr.vmem [resolvable:$true] %s2884_s9 }
 0x382   : > { %2429 = vrot.lane.b32.xlu0 %v2421_v58, %s3477_s8  ;;  %v5855_v33 = vpop.permute.xlu1 %1224  ;;  %v2612_v58 = vmul.f32 %v6280_v0, %v5811_v17  ;;  %s3398_s28 = scalar_lea.vmem %s6138_s9, 768  ;;  %p3405_p8 = scmp.lt.s32.totalorder %s6138_s9, %s3403_s23 }
 0x383   : > { %p3399_p6 = scmp.ne.s32.totalorder %s6138_s9, %s3398_s28  ;;  %p3406_p10 = scmp.lt.s32.totalorder %s3404_s12, %s3398_s28 }
 0x384   : > { %v5858_v45 = vpop.permute.xlu0 %2798  ;;  %2459 = vrot.lane.b32.xlu1 %v2453_v10, %s3477_s8  ;;  %v2535_v10 = vsel %vm1212_vm14, %v5763_v35, %v5471_v16 }
 0x385   : > { %v2541_v16 = vmul.f32 %v5173_v37, %v2535_v10  ;;  %p3400_p12 = pnand %p3399_p6, %p6289_p11  ;;  %p3407_p0 = por %p3406_p10, %p3405_p8 }
 0x386   : > { %2461 = vrot.lane.b32.xlu0 %v2454_v40, %s3477_s8  ;;  %v5867_v19 = vpop.permute.xlu1 %1259  ;;  %v2608_v40 = vsel %vm1321_vm15, %v5604_v61, %v5778_v15  ;;  %v6283_v15 = vld [vmem:[#allocation13_spill] sm:$0xff] }
 0x387   : > { %p3401_p13 = pneg %p3400_p12 }
 0x388   : > { %v5873_v9 = vpop.permute.xlu0 %2794  ;;  %2545 = vrot.lane.b32.xlu1 %v2539_v3, %s3487_s11 }
 0x389   : > { %p3408_p2 = pnand %p3407_p0, %p3401_p13 }
 0x38a   : > { %2515 = vrot.lane.b32.xlu0 %v2507_v2, %s3487_s11  ;;  %v5881_v1 = vpop.permute.xlu1 %1141  ;;  %v2614_v2 = vmul.f32 %v5151_v4, %v2608_v40 }
 0x38c   : > { %v5887_v5 = vpop.permute.xlu0 %2830  ;;  %2427 = vrot.lane.b32.xlu1 %v2420_v31, %s3477_s8 }
 0x38e   : > { %2547 = vrot.lane.b32.xlu0 %v2540_v50, %s3487_s11  ;;  %v5892_v36 = vpop.permute.xlu1 %1175 }
 0x390   : > { %v5899_v23 = vpop.permute.xlu0 %837  ;;  %2463 = vrot.lane.b32.xlu1 %v2455_v39, %s3477_s8  ;;  %s3155_s8 = smul.u32 768, %s3545_s22  ;;  %s2870_s22 = scalar_lea.sflag [#allocation4], %s3622_s17 }
 0x391   : > { %v842_v27 = vsel %vm337_vm4, %v5899_v23, %v5698_v41  ;;  %v2641_v41 = vsel %vm1321_vm15, %v5578_v47, %v5835_v20 }
 0x392   : > { %2618 = vrot.lane.b32.xlu0 %v2612_v58, %s3488_s14  ;;  %v5904_v8 = vpop.permute.xlu1 %1228  ;;  %v847_v55 = vadd.f32 %v842_v27, %v6283_v15  ;;  %v2647_v39 = vmul.f32 %v5162_v48, %v2641_v41  ;;  %v2607_v27 = vsel %vm1321_vm15, %v5811_v17, %v5604_v61  ;;  %v2642_v61 = vsel %vm1321_vm15, %v5835_v20, %v5551_v29  ;;  %s6134_s16 = scalar_lea.hbm %s6190_s5, %s3155_s8 }
 0x393   : > { %v2805_v29 = vmul.f32 %v6280_v0, %v5873_v9 }
 0x394   : > { %v5911_v25 = vpop.permute.xlu0 %871  ;;  %2513 = vrot.lane.b32.xlu1 %v2506_v63, %s3487_s11  ;;  %v2694_v63 = vsel %vm1409_vm2, %v5618_v11, %v5797_v18 }
 0x395   : > { %v876_v35 = vsel %vm337_vm4, %v5911_v25, %v5710_v51  ;;  %v2646_v51 = vmul.f32 %v6281_v14, %v5578_v47  ;;  %v2732_v47 = vmul.f32 %v6281_v14, %v5590_v46  ;;  %v2700_v40 = vmul.f32 %v5151_v4, %v2694_v63 }
 0x396   : > { %2704 = vrot.lane.b32.xlu0 %v2698_v57, %s3489_s26  ;;  %v5925_v3 = vpop.permute.xlu1 %1263  ;;  %v881_v12 = vadd.f32 %v876_v35, %v847_v55 }
 0x398   : > { %v946_v32 = vpop.permute.xlu0 %945  ;;  %2549 = vrot.lane.b32.xlu1 %v2541_v16, %s3487_s11 }
 0x399   : > { %v951_v31 = vsel %vm949_vm0, %v946_v32, %v5774_v28 }
 0x39a   : > { %2622 = vrot.lane.b32.xlu0 %v2614_v2, %s3488_s14  ;;  %v5938_v50 = vpop.permute.xlu1 %1333  ;;  %v956_v54 = vadd.f32 %v951_v31, %v881_v12  ;;  %v2613_v2 = vmul.f32 %v5139_v24, %v2607_v27  ;;  %v2648_v31 = vmul.f32 %v5173_v37, %v2642_v61 }
 0x39c   : > { %v981_v58 = vpop.permute.xlu0 %980  ;;  %2652 = vrot.lane.b32.xlu1 %v2646_v51, %s3488_s14  ;;  %v2693_v51 = vsel %vm1409_vm2, %v5823_v26, %v5618_v11  ;;  %v2728_v11 = vsel %vm1409_vm2, %v5846_v38, %v5566_v21  ;;  %v875_v21 = vsel %vm337_vm4, %v5684_v62, %v5911_v25  ;;  %v2839_v62 = vmul.f32 %v6281_v14, %v5646_v52 }
 0x39d   : > { %v985_v28 = vsel %vm949_vm0, %v981_v58, %v5788_v59  ;;  %v2727_v59 = vsel %vm1409_vm2, %v5590_v46, %v5846_v38 }
 0x39e   : > { %v990_v10 = vadd.f32 %v985_v28, %v956_v54  ;;  %2654 = vrot.lane.b32.xlu0 %v2647_v39, %s3488_s14  ;;  %v5950_v57 = vpop.permute.xlu1 %1368  ;;  %v2733_v17 = vmul.f32 %v5162_v48, %v2727_v59  ;;  %v2801_v39 = vsel %vm1518_vm5, %v5658_v60, %v5858_v45  ;;  %v2699_v54 = vmul.f32 %v5139_v24, %v2693_v51 }
 0x39f   : > { %v2807_v26 = vmul.f32 %v5151_v4, %v2801_v39  ;;  %v2834_v28 = vsel %vm1518_vm5, %v5646_v52, %v5887_v5  ;;  %v841_v45 = vsel %vm337_vm4, %v5670_v43, %v5899_v23  ;;  %v950_v43 = vsel %vm949_vm0, %v5722_v49, %v946_v32 }
 0x3a0   : > { %v1033_v18 = vpop.permute.xlu0 %1032  ;;  %2738 = vrot.lane.b32.xlu1 %v2732_v47, %s3489_s26  ;;  %v2840_v38 = vmul.f32 %v5162_v48, %v2834_v28  ;;  %v6284_v47 = vld [vmem:[#allocation14_spill] sm:$0xff]  ;;  %v1043_v23 = vadd.f32 %v5805_v13, %v5795_v56  ;;  %v984_v48 = vsel %vm949_vm0, %v5736_v6, %v981_v58  ;;  %v2800_v49 = vsel %vm1518_vm5, %v5873_v9, %v5658_v60 }
 0x3a1   : > { %v1037_v16 = vsel %vm367_vm6, %v1033_v18, %v5805_v13  ;;  %v1036_v56 = vsel %vm367_vm6, %v5747_v7, %v1033_v18  ;;  %v2806_v14 = vmul.f32 %v5139_v24, %v2800_v49  ;;  %v2835_v60 = vsel %vm1518_vm5, %v5887_v5, %v5632_v44 }
 0x3a2   : > { %v1042_v35 = vadd.f32 %v1037_v16, %v990_v10  ;;  %2708 = vrot.lane.b32.xlu0 %v2700_v40, %s3489_s26  ;;  %v5964_v15 = vpop.permute.xlu1 %1421  ;;  %v2734_v10 = vmul.f32 %v5173_v37, %v2728_v11  ;;  %v846_v40 = vadd.f32 %v841_v45, %v6284_v47  ;;  %v1077_v16 = vadd.f32 %v5816_v34, %v1043_v23 }
 0x3a3   : > { %v2841_v61 = vmul.f32 %v5173_v37, %v2835_v60 }
 0x3a4   : > { %v1067_v55 = vpop.permute.xlu0 %1066  ;;  %2620 = vrot.lane.b32.xlu1 %v2613_v2, %s3488_s14  ;;  %v880_v59 = vadd.f32 %v875_v21, %v846_v40  ;;  %v1150_v13 = vadd.f32 %v5881_v1, %v1077_v16 }
 0x3a5   : > { %v1071_v46 = vsel %vm367_vm6, %v1067_v55, %v5816_v34  ;;  %v1070_v6 = vsel %vm367_vm6, %v5760_v22, %v1067_v55 }
 0x3a6   : > { %v1076_v41 = vadd.f32 %v1071_v46, %v1042_v35  ;;  %2740 = vrot.lane.b32.xlu0 %v2733_v17, %s3489_s26  ;;  %v5975_v12 = vpop.permute.xlu1 %1456  ;;  %v955_v32 = vadd.f32 %v950_v43, %v880_v59  ;;  %v1184_v9 = vadd.f32 %v5892_v36, %v1150_v13 }
 0x3a8   : > { %v1140_v20 = vpop.permute.xlu0 %1139  ;;  %2656 = vrot.lane.b32.xlu1 %v2648_v31, %s3488_s14  ;;  %v989_v52 = vadd.f32 %v984_v48, %v955_v32  ;;  %v1238_v24 = vadd.f32 %v5904_v8, %v1184_v9 }
 0x3a9   : > { %v1143_v7 = vsel %vm382_vm8, %v5828_v30, %v1140_v20  ;;  %v1144_v18 = vsel %vm382_vm8, %v1140_v20, %v5881_v1 }
 0x3aa   : > { %2811 = vrot.lane.b32.xlu0 %v2805_v29, %s3490_s25  ;;  %v5988_v63 = vpop.permute.xlu1 %1337  ;;  %v1041_v58 = vadd.f32 %v1036_v56, %v989_v52  ;;  %v1272_v30 = vadd.f32 %v5925_v3, %v1238_v24  ;;  %v1149_v46 = vadd.f32 %v1144_v18, %v1076_v41  ;;  %v6285_v56 = vld [vmem:[#allocation25_spill] sm:$0xff] }
 0x3ac   : > { %v1174_v0 = vpop.permute.xlu0 %1173  ;;  %2706 = vrot.lane.b32.xlu1 %v2699_v54, %s3489_s26  ;;  %v1075_v22 = vadd.f32 %v1070_v6, %v1041_v58  ;;  %v1347_v37 = vadd.f32 %v5988_v63, %v1272_v30 }
 0x3ad   : > { %v1177_v44 = vsel %vm382_vm8, %v5843_v53, %v1174_v0  ;;  %v1178_v5 = vsel %vm382_vm8, %v1174_v0, %v5892_v36 }
 0x3ae   : > { %2815 = vrot.lane.b32.xlu0 %v2807_v26, %s3490_s25  ;;  %v6006_v4 = vpop.permute.xlu1 %1372  ;;  %v1148_v55 = vadd.f32 %v1143_v7, %v1075_v22  ;;  %v1183_v29 = vadd.f32 %v1178_v5, %v1149_v46 }
 0x3af   : > { %v1381_v39 = vadd.f32 %v6006_v4, %v1347_v37 }
 0x3b0   : > { %v1227_v27 = vpop.permute.xlu0 %1226  ;;  %2742 = vrot.lane.b32.xlu1 %v2734_v10, %s3489_s26  ;;  %v1182_v53 = vadd.f32 %v1177_v44, %v1148_v55 }
 0x3b1   : > { %v1231_v31 = vsel %vm1230_vm1, %v5855_v33, %v1227_v27  ;;  %v1232_v51 = vsel %vm1230_vm1, %v1227_v27, %v5904_v8 }
 0x3b2   : > { %2847 = vrot.lane.b32.xlu0 %v2840_v38, %s3490_s25  ;;  %v1426_v25 = vpop.permute.xlu1 %1425  ;;  %v1236_v33 = vadd.f32 %v1231_v31, %v1182_v53  ;;  %v1237_v54 = vadd.f32 %v1232_v51, %v1183_v29 }
 0x3b3   : > { %v1435_v0 = vadd.f32 %v1426_v25, %v1381_v39 }
 0x3b4   : > { %v1262_v35 = vpop.permute.xlu0 %1261  ;;  %2845 = vrot.lane.b32.xlu1 %v2839_v62, %s3490_s25 }
 0x3b5   : > { %v1265_v36 = vsel %vm1230_vm1, %v5867_v19, %v1262_v35  ;;  %v1266_v41 = vsel %vm1230_vm1, %v1262_v35, %v5925_v3 }
 0x3b6   : > { %v1461_v34 = vpop.permute.xlu1 %1460  ;;  %v1270_v28 = vadd.f32 %v1265_v36, %v1236_v33  ;;  %v1271_v45 = vadd.f32 %v1266_v41, %v1237_v54 }
 0x3b7   : > { %v1469_v21 = vadd.f32 %v1461_v34, %v1435_v0 }
 0x3b8   : > { %v1336_v2 = vpop.permute.xlu0 %1335  ;;  %2813 = vrot.lane.b32.xlu1 %v2806_v14, %s3490_s25  ;;  %v6286_v14 = vld [vmem:[#allocation26_spill] sm:$0xff] }
 0x3b9   : > { %v1340_v8 = vsel %vm1339_vm3, %v5938_v50, %v1336_v2  ;;  %v1341_v26 = vsel %vm1339_vm3, %v1336_v2, %v5988_v63 }
 0x3ba   : > { %v1531_v17 = vpop.permute.xlu1 %1530  ;;  %v1345_v38 = vadd.f32 %v1340_v8, %v1270_v28  ;;  %v1346_v47 = vadd.f32 %v1341_v26, %v1271_v45 }
 0x3bc   : > { %v1371_v1 = vpop.permute.xlu0 %1370  ;;  %2849 = vrot.lane.b32.xlu1 %v2841_v61, %s3490_s25 }
 0x3bd   : > { %v1374_v19 = vsel %vm1339_vm3, %v5950_v57, %v1371_v1  ;;  %v1375_v3 = vsel %vm1339_vm3, %v1371_v1, %v6006_v4 }
 0x3be   : > { %v1566_v20 = vpop.permute.xlu1 %1565  ;;  %v1379_v27 = vadd.f32 %v1374_v19, %v1345_v38  ;;  %v1380_v43 = vadd.f32 %v1375_v3, %v1346_v47 }
 0x3c0   : > { %v1424_v11 = vpop.permute.xlu0 %1423 }
 0x3c1   : > { %v1428_v50 = vsel %vm1427_vm7, %v5964_v15, %v1424_v11  ;;  %v1429_v63 = vsel %vm1427_vm7, %v1424_v11, %v1426_v25 }
 0x3c2   : > { %v1535_v10 = vpop.permute.xlu1 %1534  ;;  %v1433_v62 = vadd.f32 %v1428_v50, %v1379_v27  ;;  %v1434_v48 = vadd.f32 %v1429_v63, %v1380_v43  ;;  %v6287_v50 = vld [vmem:[#allocation15_spill] sm:$0xff] }
 0x3c3   : > { %v1544_v23 = vadd.f32 %v1535_v10, %v1469_v21 }
 0x3c4   : > { %v1459_v40 = vpop.permute.xlu0 %1458 }
 0x3c5   : > { %v1462_v57 = vsel %vm1427_vm7, %v5975_v12, %v1459_v40  ;;  %v1463_v59 = vsel %vm1427_vm7, %v1459_v40, %v1461_v34 }
 0x3c6   : > { %v1570_v4 = vpop.permute.xlu1 %1569  ;;  %v1467_v25 = vadd.f32 %v1462_v57, %v1433_v62  ;;  %v1468_v35 = vadd.f32 %v1463_v59, %v1434_v48 }
 0x3c7   : > { %v1578_v16 = vadd.f32 %v1570_v4, %v1544_v23 }
 0x3c8   : > { %v1533_v49 = vpop.permute.xlu0 %1532 }
 0x3c9   : > { %v1537_v32 = vsel %vm1536_vm9, %v1531_v17, %v1533_v49  ;;  %v1538_v15 = vsel %vm1536_vm9, %v1533_v49, %v1535_v10  ;;  %v1586_v13 = vmul.f32 %v6285_v56, %v1578_v16 }
 0x3ca   : > { %v2126_v52 = vpop.permute.xlu1 %2125  ;;  %v1542_v6 = vadd.f32 %v1537_v32, %v1467_v25  ;;  %v1543_v34 = vadd.f32 %v1538_v15, %v1468_v35 }
 0x3cb   : > { %v1594_v12 = vadd.f32 %v6286_v14, %v1586_v13 }
 0x3cc   : > { %v1568_v60 = vpop.permute.xlu0 %1567 }
 0x3cd   : > { %v1571_v9 = vsel %vm1536_vm9, %v1566_v20, %v1568_v60  ;;  %v1572_v58 = vsel %vm1536_vm9, %v1568_v60, %v1570_v4  ;;  %1598 = vst.msk [vmem:[%s6079_s6 + $0x10] sm:$0xff] %vm1597_vm10, %v1594_v12 }
 0x3ce   : > { %v1576_v2 = vadd.f32 %v1571_v9, %v1542_v6  ;;  %v1577_v7 = vadd.f32 %v1572_v58, %v1543_v34  ;;  %v2160_v18 = vpop.permute.xlu1 %2159  ;;  %v6288_v58 = vld [vmem:[#allocation19_spill] sm:$0xff] }
 0x3d0   : > { %v1584_v24 = vmul.f32 %v6285_v56, %v1576_v2  ;;  %v1585_v22 = vmul.f32 %v6285_v56, %v1577_v7  ;;  %v2128_v61 = vpop.permute.xlu0 %2127 }
 0x3d1   : > { %v2131_v44 = vsel %vm337_vm4, %v2126_v52, %v2128_v61 }
 0x3d2   : > { %v1592_v5 = vadd.f32 %v6286_v14, %v1584_v24  ;;  %v1593_v17 = vadd.f32 %v6286_v14, %v1585_v22  ;;  %v2136_v30 = vadd.f32 %v2131_v44, %v5144_v42  ;;  %v2130_v55 = vpop.permute.xlu1 %2129 }
 0x3d3   : > { %v2138_v63 = vadd.f32 %v2130_v55, %v6287_v50  ;;  %v2132_v13 = vsel %vm337_vm4, %v2128_v61, %v2130_v55 }
 0x3d4   : > { %1595 = vst [vmem:[%s6079_s6] sm:$0xff] %v1592_v5  ;;  %1596 = vst [vmem:[%s6079_s6 + $0x8] sm:$0xff] %v1593_v17  ;;  %v2162_v46 = vpop.permute.xlu0 %2161  ;;  %v2137_v2 = vadd.f32 %v2132_v13, %v6288_v58 }
 0x3d5   : > { %v2165_v1 = vsel %vm337_vm4, %v2160_v18, %v2162_v46 }
 0x3d6   : > { %v2170_v31 = vadd.f32 %v2165_v1, %v2136_v30  ;;  %v2164_v51 = vpop.permute.xlu1 %2163 }
 0x3d7   : > { %v2172_v43 = vadd.f32 %v2164_v51, %v2138_v63  ;;  %v2166_v6 = vsel %vm337_vm4, %v2162_v46, %v2164_v51 }
 0x3d8   : > { %v2319_v37 = vpop.permute.xlu0 %2318  ;;  %v2171_v22 = vadd.f32 %v2166_v6, %v2137_v2 }
 0x3da   : > { %v2233_v53 = vpop.permute.xlu1 %2232 }
 0x3dc   : > { %v2235_v29 = vpop.permute.xlu0 %2234 }
 0x3dd   : > { %v2238_v23 = vsel %vm949_vm0, %v2233_v53, %v2235_v29 }
 0x3de   : > { %v2267_v36 = vpop.permute.xlu1 %2266  ;;  %v2243_v62 = vadd.f32 %v2238_v23, %v2170_v31 }
 0x3e0   : > { %v2269_v41 = vpop.permute.xlu0 %2268 }
 0x3e1   : > { %v2272_v59 = vsel %vm949_vm0, %v2267_v36, %v2269_v41 }
 0x3e2   : > { %v2353_v20 = vpop.permute.xlu1 %2352  ;;  %v2277_v15 = vadd.f32 %v2272_v59, %v2243_v62 }
 0x3e4   : > { %v2323_v39 = vpop.permute.xlu0 %2322 }
 0x3e6   : > { %v2237_v33 = vpop.permute.xlu1 %2236 }
 0x3e7   : > { %v2245_v4 = vadd.f32 %v2237_v33, %v2172_v43  ;;  %v2239_v24 = vsel %vm949_vm0, %v2235_v29, %v2237_v33 }
 0x3e8   : > { %v2355_v54 = vpop.permute.xlu0 %2354  ;;  %v2244_v30 = vadd.f32 %v2239_v24, %v2171_v22 }
 0x3e9   : > { %v2358_v34 = vsel %vm367_vm6, %v2353_v20, %v2355_v54 }
 0x3ea   : > { %v2271_v11 = vpop.permute.xlu1 %2270 }
 0x3eb   : > { %v2279_v16 = vadd.f32 %v2271_v11, %v2245_v4  ;;  %v2273_v61 = vsel %vm949_vm0, %v2269_v41, %v2271_v11 }
 0x3ec   : > { %v2426_v8 = vpop.permute.xlu0 %2425 }
 0x3ed   : > { %v2331_v52 = vadd.f32 %v2323_v39, %v2279_v16 }
 0x3ee   : > { %v2321_v42 = vpop.permute.xlu1 %2320 }
 0x3ef   : > { %v2324_v49 = vsel %vm367_vm6, %v2319_v37, %v2321_v42  ;;  %v2325_v46 = vsel %vm367_vm6, %v2321_v42, %v2323_v39  ;;  %v2278_v37 = vadd.f32 %v2273_v61, %v2244_v30 }
 0x3f0   : > { %v2512_v26 = vpop.permute.xlu0 %2511  ;;  %v2329_v25 = vadd.f32 %v2324_v49, %v2277_v15 }
 0x3f1   : > { %v2330_v29 = vadd.f32 %v2325_v46, %v2278_v37 }
 0x3f2   : > { %v2357_v0 = vpop.permute.xlu1 %2356  ;;  %v2363_v7 = vadd.f32 %v2358_v34, %v2329_v25 }
 0x3f3   : > { %v2365_v60 = vadd.f32 %v2357_v0, %v2331_v52  ;;  %v2359_v36 = vsel %vm367_vm6, %v2355_v54, %v2357_v0 }
 0x3f4   : > { %v2430_v28 = vpop.permute.xlu0 %2429  ;;  %v2364_v50 = vadd.f32 %v2359_v36, %v2330_v29 }
 0x3f5   : > { %v2438_v17 = vadd.f32 %v2430_v28, %v2365_v60 }
 0x3f6   : > { %v2460_v45 = vpop.permute.xlu1 %2459 }
 0x3f8   : > { %v2462_v19 = vpop.permute.xlu0 %2461 }
 0x3f9   : > { %v2465_v1 = vsel %vm382_vm8, %v2460_v45, %v2462_v19 }
 0x3fa   : > { %v2546_v3 = vpop.permute.xlu1 %2545 }
 0x3fc   : > { %v2516_v10 = vpop.permute.xlu0 %2515 }
 0x3fe   : > { %v2428_v21 = vpop.permute.xlu1 %2427 }
 0x3ff   : > { %v2431_v9 = vsel %vm382_vm8, %v2426_v8, %v2428_v21  ;;  %v2432_v41 = vsel %vm382_vm8, %v2428_v21, %v2430_v28 }
 0x400   : > { %v2548_v38 = vpop.permute.xlu0 %2547  ;;  %v2436_v44 = vadd.f32 %v2431_v9, %v2363_v7 }
 0x401   : > { %v2551_v63 = vsel %vm1230_vm1, %v2546_v3, %v2548_v38 }
 0x402   : > { %v2464_v47 = vpop.permute.xlu1 %2463  ;;  %v2470_v53 = vadd.f32 %v2465_v1, %v2436_v44 }
 0x403   : > { %v2472_v31 = vadd.f32 %v2464_v47, %v2438_v17  ;;  %v2466_v39 = vsel %vm382_vm8, %v2462_v19, %v2464_v47 }
 0x404   : > { %v2619_v40 = vpop.permute.xlu0 %2618 }
 0x405   : > { %v2524_v11 = vadd.f32 %v2516_v10, %v2472_v31 }
 0x406   : > { %v2514_v27 = vpop.permute.xlu1 %2513 }
 0x407   : > { %v2517_v51 = vsel %vm1230_vm1, %v2512_v26, %v2514_v27  ;;  %v2437_v26 = vadd.f32 %v2432_v41, %v2364_v50  ;;  %v2518_v54 = vsel %vm1230_vm1, %v2514_v27, %v2516_v10 }
 0x408   : > { %v2705_v57 = vpop.permute.xlu0 %2704  ;;  %v2522_v20 = vadd.f32 %v2517_v51, %v2470_v53 }
 0x409   : > { %v2471_v0 = vadd.f32 %v2466_v39, %v2437_v26 }
 0x40a   : > { %v2550_v48 = vpop.permute.xlu1 %2549  ;;  %v2556_v43 = vadd.f32 %v2551_v63, %v2522_v20 }
 0x40b   : > { %v2558_v42 = vadd.f32 %v2550_v48, %v2524_v11  ;;  %v2552_v62 = vsel %vm1230_vm1, %v2548_v38, %v2550_v48  ;;  %v2523_v21 = vadd.f32 %v2518_v54, %v2471_v0 }
 0x40c   : > { %v2623_v32 = vpop.permute.xlu0 %2622 }
 0x40d   : > { %v2631_v28 = vadd.f32 %v2623_v32, %v2558_v42  ;;  %v2557_v49 = vadd.f32 %v2552_v62, %v2523_v21 }
 0x40e   : > { %v2653_v35 = vpop.permute.xlu1 %2652 }
 0x410   : > { %v2655_v12 = vpop.permute.xlu0 %2654 }
 0x411   : > { %v2658_v3 = vsel %vm1339_vm3, %v2653_v35, %v2655_v12 }
 0x412   : > { %v2739_v18 = vpop.permute.xlu1 %2738 }
 0x414   : > { %v2709_v5 = vpop.permute.xlu0 %2708 }
 0x416   : > { %v2621_v55 = vpop.permute.xlu1 %2620 }
 0x417   : > { %v2624_v45 = vsel %vm1339_vm3, %v2619_v40, %v2621_v55  ;;  %v2625_v19 = vsel %vm1339_vm3, %v2621_v55, %v2623_v32 }
 0x418   : > { %v2741_v33 = vpop.permute.xlu0 %2740  ;;  %v2629_v59 = vadd.f32 %v2624_v45, %v2556_v43  ;;  %v2630_v10 = vadd.f32 %v2625_v19, %v2557_v49 }
 0x419   : > { %v2744_v34 = vsel %vm1427_vm7, %v2739_v18, %v2741_v33 }
 0x41a   : > { %v2657_v8 = vpop.permute.xlu1 %2656  ;;  %v2663_v15 = vadd.f32 %v2658_v3, %v2629_v59 }
 0x41b   : > { %v2665_v47 = vadd.f32 %v2657_v8, %v2631_v28  ;;  %v2659_v25 = vsel %vm1339_vm3, %v2655_v12, %v2657_v8 }
 0x41c   : > { %v2812_v4 = vpop.permute.xlu0 %2811  ;;  %v2664_v6 = vadd.f32 %v2659_v25, %v2630_v10 }
 0x41d   : > { %v2717_v48 = vadd.f32 %v2709_v5, %v2665_v47 }
 0x41e   : > { %v2707_v23 = vpop.permute.xlu1 %2706 }
 0x41f   : > { %v2710_v40 = vsel %vm1427_vm7, %v2705_v57, %v2707_v23  ;;  %v2711_v38 = vsel %vm1427_vm7, %v2707_v23, %v2709_v5 }
 0x420   : > { %v2715_v27 = vadd.f32 %v2710_v40, %v2663_v15  ;;  %v2816_v13 = vpop.permute.xlu0 %2815  ;;  %v2716_v60 = vadd.f32 %v2711_v38, %v2664_v6 }
 0x422   : > { %v2743_v16 = vpop.permute.xlu1 %2742  ;;  %v2749_v9 = vadd.f32 %v2744_v34, %v2715_v27 }
 0x423   : > { %v2745_v35 = vsel %vm1427_vm7, %v2741_v33, %v2743_v16  ;;  %v2751_v32 = vadd.f32 %v2743_v16, %v2717_v48 }
 0x424   : > { %v2750_v2 = vadd.f32 %v2745_v35, %v2716_v60  ;;  %v2848_v7 = vpop.permute.xlu0 %2847 }
 0x425   : > { %v2824_v44 = vadd.f32 %v2816_v13, %v2751_v32 }
 0x426   : > { %v2846_v52 = vpop.permute.xlu1 %2845 }
 0x427   : > { %v2851_v22 = vsel %vm1536_vm9, %v2846_v52, %v2848_v7 }
 0x42a   : > { %v2814_v57 = vpop.permute.xlu1 %2813 }
 0x42b   : > { %v2817_v58 = vsel %vm1536_vm9, %v2812_v4, %v2814_v57  ;;  %v2818_v12 = vsel %vm1536_vm9, %v2814_v57, %v2816_v13 }
 0x42c   : > { %v2822_v24 = vadd.f32 %v2817_v58, %v2749_v9  ;;  %v2823_v18 = vadd.f32 %v2818_v12, %v2750_v2 }
 0x42e   : > { %v2856_v5 = vadd.f32 %v2851_v22, %v2822_v24  ;;  %v2850_v61 = vpop.permute.xlu1 %2849 }
 0x42f   : > { %v2852_v17 = vsel %vm1536_vm9, %v2848_v7, %v2850_v61  ;;  %v2858_v30 = vadd.f32 %v2850_v61, %v2824_v44 }
 0x430   : > { %v2859_v55 = vmul.f32 %v2856_v5, %v6285_v56  ;;  %v2857_v46 = vadd.f32 %v2852_v17, %v2823_v18 }
 0x431   : > { %v2861_v1 = vmul.f32 %v2858_v30, %v6285_v56 }
 0x432   : > { %v2862_v31 = vadd.f32 %v2859_v55, %v6286_v14  ;;  %v2860_v51 = vmul.f32 %v2857_v46, %v6285_v56 }
 0x433   : > { %v2864_v37 = vadd.f32 %v2861_v1, %v6286_v14 }
 0x434   : > { %2993 = vst [vmem:[%s6079_s6 + $0x18] sm:$0xff] %v2862_v31  ;;  %v2863_v53 = vadd.f32 %v2860_v51, %v6286_v14 }
 0x435   : > { %2995 = vst.msk [vmem:[%s6079_s6 + $0x28] sm:$0xff] %vm1597_vm10, %v2864_v37 }
 0x436   : > { %2994 = vst [vmem:[%s6079_s6 + $0x20] sm:$0xff] %v2863_v53 }
 0x437   : > { %3411 = shalt.err (!%p3408_p2)
}
 0x438   : > { %s3412_s11 = scalar_lea.hbm %s6134_s16, 768  ;;  %s3416_s25 = scalar_lea.hbm %s6190_s5, 1536 }
 0x439   : > { %p3413_p4 = scmp.ne.s32.totalorder %s6134_s16, %s3412_s11  ;;  %p3417_p9 = scmp.lt.u32.totalorder %s6134_s16, %s6190_s5 }
 0x43a   : > { %p3418_p1 = scmp.lt.u32.totalorder %s3416_s25, %s3412_s11  ;;  %p3420_p6 = scmp.lt.u32.totalorder %s3412_s11, %s6134_s16 }
 0x43b   : > { %p3414_p5 = pnand %p3413_p4, %p6289_p11 }
 0x43c   : > { %p3419_p3 = por %p3418_p1, %p3417_p9 }
 0x43d   : > { %p3415_p7 = pneg %p3414_p5 }
 0x43e   : > { %p3421_p12 = por %p3420_p6, %p3419_p3 }
 0x440   : > { %p3422_p13 = pnand %p3421_p12, %p3415_p7 }
 0x442   : > { %3425 = shalt.err (!%p3422_p13)
}
 0x443   : > { %s3492_s8 = smov 384   ;;  %s3493_s10 = smov 24  }
 0x444   : > { %3158 = dma.vmem_to_hbm [thread:$0]  (%p6289_p11), %s6138_s9, 768, %s6134_s16, %s2870_s22, %s3492_s8, %s3492_s8, %s3493_s10  }
 0x445 PF: > { %s2899_s13 = sand.u32 1, %s3452_s18   ;;  %p6290_p8 = scmp.ne.s32.totalorder %s6220_s30, 0 }
 0x446   : > { %p6291_p10 = scmp.ge.s32.totalorder %s3464_s21, 2  ;;  %s2900_s28 = scalar_lea.sflag [#allocation4], %s2899_s13 }
 0x448   : > { %p3165_p0 = pnand %p6291_p10, %p6290_p8 }
 0x44a   : > { %3447 = dma.done.wait (!%p3165_p0), %s2900_s28, 768  }
 0x44b   : > { %3449 = vsyncadd (!%p3165_p0), %s2900_s28, 4294966528  ;;  %p18_p2 = scmp.ge.s32.totalorder %s3549_s24, 4   ;;  %s6292_s18 = smov %s3456_s19 }
 0x44c   : > { %s6293_s19 = smov %s3460_s20  ;;  %s6294_s20 = smov %s3561_s27 }
 0x44d   : > { %s6295_s21 = smov %s3549_s24  ;;  %20 = sbr.rel (!%p18_p2) target bundleno = 5 (0x5), region = 89 }
 0x454   :  { %2905 = vsyncpa [#allocation3], 1 }
 0x455   :  { %2907 = vsyncpa [#allocation3 + $0x1], 1 }
 0x456   :  { %2908 = vsyncpa [#allocation4], 1 }
 0x457   :  { %2910 = vsyncpa [#allocation4 + $0x1], 1 }

</bundles_post_ra>
